<compile_context>
chip_gen: v7x
topology: tpu7x:2x2x1
jax: 0.10.0
libtpu: 0.0.40
codegen_flags: <defaults>
</compile_context>

<pallas_src>
import functools

import jax
import jax.numpy as jnp
from jax.experimental import pallas as pl
from jax.experimental.pallas import tpu as pltpu


# ----------------------------------------------------------------------------
# In-kernel helpers
# ----------------------------------------------------------------------------
def _conv_stage(x, w_ref, b_ref, *, kh, kw, stride):
    """Valid conv + bias + ReLU on a VMEM-resident activation value.

    x:     (B, H, W, Cin) f32 value (rows=(b,h,w), lanes=channels)
    w_ref: (kh*kw, Cin, Cout) bf16 ref  (per-kernel-tap weight slices)
    b_ref: (1, Cout) f32 ref
    Returns (B, ho, wo, Cout) f32.
    Stride is handled with an H -> (H//s, s) reshape so every slice is
    unit-stride and the lane (channel) dimension is never reshaped.
    """
    B, H, W, Cin = x.shape
    Cout = w_ref.shape[-1]
    assert H % stride == 0 and W % stride == 0, (H, W, stride)
    ho = (H - kh) // stride + 1
    wo = (W - kw) // stride + 1

    acc = jnp.zeros((B * ho * wo, Cout), jnp.float32)
    xh = x.reshape(B, H // stride, stride, W, Cin)
    for i in range(kh):
        qi, ri = divmod(i, stride)
        rows = xh[:, qi:qi + ho, ri, :, :]                    # (B, ho, W, Cin)
        rows = rows.reshape(B, ho, W // stride, stride, Cin)
        for j in range(kw):
            qj, rj = divmod(j, stride)
            patch = rows[:, :, qj:qj + wo, rj, :]             # (B, ho, wo, Cin)
            patch = patch.reshape(B * ho * wo, Cin).astype(jnp.bfloat16)
            acc = acc + jnp.dot(patch, w_ref[i * kw + j],
                                preferred_element_type=jnp.float32)
    acc = jnp.maximum(acc + b_ref[...], 0.0)
    return acc.reshape(B, ho, wo, Cout)


def _qlearner_kernel(col1_ref, w1_ref, b1_ref, w2_ref, b2_ref, w3_ref, b3_ref,
                     wf1_ref, bf1_ref, wf2_ref, bf2_ref, o_ref,
                     *, batch, ho1, wo1):
    """Whole QLearner forward in one kernel; everything resident in VMEM."""
    # conv1 (8x8, stride 4) + ReLU, as one matmul on pre-extracted patches.
    a1 = jnp.dot(col1_ref[...], w1_ref[...],
                 preferred_element_type=jnp.float32)          # (B*ho1*wo1, 32)
    a1 = jnp.maximum(a1 + b1_ref[...], 0.0)
    x = a1.reshape(batch, ho1, wo1, a1.shape[-1])

    # conv2 (4x4, stride 2) + ReLU and conv3 (3x3, stride 1) + ReLU, in VMEM.
    x = _conv_stage(x, w2_ref, b2_ref, kh=4, kw=4, stride=2)
    x = _conv_stage(x, w3_ref, b3_ref, kh=3, kw=3, stride=1)

    # Flatten (fc1 weight columns were permuted at init to match this order).
    feat = x.reshape(batch, -1)

    # fc1 + ReLU, fc2.  bf16 operands, f32 accumulate / bias / ReLU.
    h = jnp.dot(feat.astype(jnp.bfloat16), wf1_ref[...],
                preferred_element_type=jnp.float32)
    h = jnp.maximum(h + bf1_ref[...], 0.0)
    q = jnp.dot(h.astype(jnp.bfloat16), wf2_ref[...],
                preferred_element_type=jnp.float32) + bf2_ref[...]
    o_ref[...] = q.astype(o_ref.dtype)


# ----------------------------------------------------------------------------
# Host-side glue
# ----------------------------------------------------------------------------
def _im2col(x, kh, kw, stride):
    """NCHW -> (N*ho*wo, C*kh*kw); K order (C, kh, kw) matches torch's
    weight.reshape(O, C*kh*kw) flattening."""
    N, C, H, W = x.shape
    ho = (H - kh) // stride + 1
    wo = (W - kw) // stride + 1
    cols = []
    for i in range(kh):
        for j in range(kw):
            cols.append(x[:, :, i:i + stride * ho:stride, j:j + stride * wo:stride])
    col = jnp.stack(cols, axis=2)                          # (N, C, kh*kw, ho, wo)
    col = col.reshape(N, C * kh * kw, ho, wo)
    col = col.transpose(0, 2, 3, 1).reshape(N * ho * wo, C * kh * kw)
    return col, ho, wo


def qlearner_forward(kp, x):
    """x: (B, C, H, W) f32; kp: kernel-layout params from prepare_params()."""
    B = x.shape[0]
    col1, ho1, wo1 = _im2col(x, 8, 8, 4)                   # only XLA glue left
    num_actions = kp["wf2"].shape[1]

    kernel = functools.partial(_qlearner_kernel, batch=B, ho1=ho1, wo1=wo1)
    vmem = pl.BlockSpec(memory_space=pltpu.MemorySpace.VMEM)
    # Note: grid-less => single program on one TensorCore.  On v7x, once the
    # batch grows, add a leading 'parallel' batch grid axis to use both cores.
    return pl.pallas_call(
        kernel,
        out_shape=jax.ShapeDtypeStruct((B, num_actions), jnp.float32),
        in_specs=[vmem] * 11,
        out_specs=vmem,
    )(col1.astype(jnp.bfloat16),
      kp["w1"], kp["b1"], kp["w2"], kp["b2"], kp["w3"], kp["b3"],
      kp["wf1"], kp["bf1"], kp["wf2"], kp["bf2"])


def init_params(key, in_channels, num_actions, feature_size):
    """PyTorch-layout params, uniform(-1/sqrt(fan_in), 1/sqrt(fan_in)) init."""
    keys = jax.random.split(key, 10)

    def u(k, shape, fan_in):
        bound = 1.0 / jnp.sqrt(jnp.float32(fan_in))
        return jax.random.uniform(k, shape, jnp.float32, -bound, bound)

    return {
        "conv1_w": u(keys[0], (32, in_channels, 8, 8), in_channels * 8 * 8),
        "conv1_b": u(keys[1], (32,), in_channels * 8 * 8),
        "conv2_w": u(keys[2], (64, 32, 4, 4), 32 * 4 * 4),
        "conv2_b": u(keys[3], (64,), 32 * 4 * 4),
        "conv3_w": u(keys[4], (64, 64, 3, 3), 64 * 3 * 3),
        "conv3_b": u(keys[5], (64,), 64 * 3 * 3),
        "fc1_w":   u(keys[6], (512, feature_size), feature_size),
        "fc1_b":   u(keys[7], (512,), feature_size),
        "fc2_w":   u(keys[8], (num_actions, 512), 512),
        "fc2_b":   u(keys[9], (num_actions,), 512),
    }


def prepare_params(p, h3, w3):
    """One-time conversion PyTorch layout -> kernel layout (bf16 matmul weights,
    f32 (1, N) biases).  Done at init, never per forward call."""
    bf16 = jnp.bfloat16

    def conv_taps(w):  # (O, C, kh, kw) -> (kh*kw, C, O), tap k = i*kw + j
        O, C, kh, kw = w.shape
        return jnp.transpose(w, (2, 3, 1, 0)).reshape(kh * kw, C, O).astype(bf16)

    fc1_w = p["fc1_w"]                                     # (512, C3*h3*w3)
    n_fc1, feat = fc1_w.shape
    c3 = feat // (h3 * w3)
    # torch flatten order (ch, oh, ow) -> kernel flatten order (oh, ow, ch)
    fc1_perm = (fc1_w.reshape(n_fc1, c3, h3, w3)
                .transpose(0, 2, 3, 1).reshape(n_fc1, feat))

    return {
        "w1": p["conv1_w"].reshape(p["conv1_w"].shape[0], -1).T.astype(bf16),
        "b1": p["conv1_b"].reshape(1, -1).astype(jnp.float32),
        "w2": conv_taps(p["conv2_w"]),
        "b2": p["conv2_b"].reshape(1, -1).astype(jnp.float32),
        "w3": conv_taps(p["conv3_w"]),
        "b3": p["conv3_b"].reshape(1, -1).astype(jnp.float32),
        "wf1": fc1_perm.T.astype(bf16),                    # (feature, 512)
        "bf1": p["fc1_b"].reshape(1, -1).astype(jnp.float32),
        "wf2": p["fc2_w"].T.astype(bf16),                  # (512, num_actions)
        "bf2": p["fc2_b"].reshape(1, -1).astype(jnp.float32),
    }


def reference_forward(p, x):
    """Plain-JAX f32 reference with PyTorch semantics (for a sanity check)."""
    def conv(x, w, b, s):
        y = jax.lax.conv_general_dilated(
            x, w, window_strides=(s, s), padding="VALID",
            dimension_numbers=("NCHW", "OIHW", "NCHW"))
        return jax.nn.relu(y + b.reshape(1, -1, 1, 1))

    x = conv(x, p["conv1_w"], p["conv1_b"], 4)
    x = conv(x, p["conv2_w"], p["conv2_b"], 2)
    x = conv(x, p["conv3_w"], p["conv3_b"], 1)
    x = x.reshape(x.shape[0], -1)
    x = jax.nn.relu(x @ p["fc1_w"].T + p["fc1_b"])
    return x @ p["fc2_w"].T + p["fc2_b"]


if __name__ == "__main__":
    key = jax.random.PRNGKey(0)
    # DQN-style stacked-frame input (num_frames=4).  36x36 is the smallest
    # spatial size the 8/4 -> 4/2 -> 3/1 conv stack accepts:
    #   36 -> 8 -> 3 -> 1  =>  feature_size = 64 * 1 * 1 = 64
    B, C, H, W = 2, 4, 36, 36
    num_actions = 6  # Pong action space

    h1 = (H - 8) // 4 + 1
    h2 = (h1 - 4) // 2 + 1
    h3 = (h2 - 3) // 1 + 1
    feature_size = 64 * h3 * h3

    k_x, k_p = jax.random.split(key)
    x = jax.random.normal(k_x, (B, C, H, W), jnp.float32)
    torch_params = init_params(k_p, C, num_actions, feature_size)
    kparams = prepare_params(torch_params, h3, h3)

    q_values = jax.jit(qlearner_forward)(kparams, x)
    jax.block_until_ready(q_values)
    assert q_values.shape == (B, num_actions), q_values.shape

    # Numerical sanity check vs. plain-JAX f32 reference (bf16 MXU operands
    # give ~1e-3 absolute error at these scales; 5e-2 is a generous bound).
    q_ref = reference_forward(torch_params, x)
    max_err = float(jnp.max(jnp.abs(q_values - q_ref)))
    assert max_err < 5e-2, f"max |q - q_ref| = {max_err}"

    print("KERNEL_OK")
</pallas_src>

<mosaic_0001>
module attributes {stable_mosaic.version = 11 : i64} {
  func.func @_qlearner_kernel(%arg0: memref<128x256xbf16, #tpu.memory_space<vmem>>, %arg1: memref<256x32xbf16, #tpu.memory_space<vmem>>, %arg2: memref<1x32xf32, #tpu.memory_space<vmem>>, %arg3: memref<16x32x64xbf16, #tpu.memory_space<vmem>>, %arg4: memref<1x64xf32, #tpu.memory_space<vmem>>, %arg5: memref<9x64x64xbf16, #tpu.memory_space<vmem>>, %arg6: memref<1x64xf32, #tpu.memory_space<vmem>>, %arg7: memref<64x512xbf16, #tpu.memory_space<vmem>>, %arg8: memref<1x512xf32, #tpu.memory_space<vmem>>, %arg9: memref<512x6xbf16, #tpu.memory_space<vmem>>, %arg10: memref<1x6xf32, #tpu.memory_space<vmem>>, %arg11: memref<2x6xf32, #tpu.memory_space<vmem>>) attributes {dimension_semantics = [], scalar_prefetch = 0 : i64, scratch_operands = 0 : i64, tpu.core_type = #tpu.core_type<tc>} {
    %c0 = arith.constant 0 : index
    %c0_0 = arith.constant 0 : index
    %0 = vector.load %arg0[%c0, %c0_0] : memref<128x256xbf16, #tpu.memory_space<vmem>>, vector<128x256xbf16>
    %c0_1 = arith.constant 0 : index
    %c0_2 = arith.constant 0 : index
    %1 = vector.load %arg1[%c0_1, %c0_2] : memref<256x32xbf16, #tpu.memory_space<vmem>>, vector<256x32xbf16>
    %cst = arith.constant dense<0.000000e+00> : vector<128x32xf32>
    %2 = tpu.matmul %0, %1, %cst {dimension_numbers = #tpu.dot_dimension_numbers<[1], [0], [0], [1], [0, 0, 1, 1], [], []>} : vector<128x256xbf16>, vector<256x32xbf16>, vector<128x32xf32> -> vector<128x32xf32>
    %c0_3 = arith.constant 0 : index
    %c0_4 = arith.constant 0 : index
    %3 = vector.load %arg2[%c0_3, %c0_4] : memref<1x32xf32, #tpu.memory_space<vmem>>, vector<1x32xf32>
    %4 = vector.broadcast %3 : vector<1x32xf32> to vector<128x32xf32>
    %5 = arith.addf %2, %4 : vector<128x32xf32>
    %cst_5 = arith.constant 0.000000e+00 : f32
    %6 = vector.broadcast %cst_5 : f32 to vector<128x32xf32>
    %7 = arith.maximumf %5, %6 : vector<128x32xf32>
    %8 = vector.shape_cast %7 : vector<128x32xf32> to vector<2x8x8x32xf32>
    %cst_6 = arith.constant 0.000000e+00 : f32
    %9 = vector.broadcast %cst_6 : f32 to vector<18x64xf32>
    %10 = vector.shape_cast %8 : vector<2x8x8x32xf32> to vector<2x4x2x8x32xf32>
    %11 = vector.extract_strided_slice %10 {offsets = [0, 0, 0, 0, 0], sizes = [2, 3, 1, 8, 32], strides = [1, 1, 1, 1, 1]} : vector<2x4x2x8x32xf32> to vector<2x3x1x8x32xf32>
    %12 = vector.shape_cast %11 : vector<2x3x1x8x32xf32> to vector<2x3x8x32xf32>
    %13 = vector.shape_cast %12 : vector<2x3x8x32xf32> to vector<2x3x4x2x32xf32>
    %14 = vector.extract_strided_slice %13 {offsets = [0, 0, 0, 0, 0], sizes = [2, 3, 3, 1, 32], strides = [1, 1, 1, 1, 1]} : vector<2x3x4x2x32xf32> to vector<2x3x3x1x32xf32>
    %15 = vector.shape_cast %14 : vector<2x3x3x1x32xf32> to vector<2x3x3x32xf32>
    %16 = vector.shape_cast %15 : vector<2x3x3x32xf32> to vector<18x32xf32>
    %17 = arith.truncf %16 : vector<18x32xf32> to vector<18x32xbf16>
    %c0_7 = arith.constant 0 : index
    %c0_8 = arith.constant 0 : index
    %c0_9 = arith.constant 0 : index
    %18 = vector.load %arg3[%c0_7, %c0_8, %c0_9] : memref<16x32x64xbf16, #tpu.memory_space<vmem>>, vector<1x32x64xbf16>
    %19 = vector.shape_cast %18 : vector<1x32x64xbf16> to vector<32x64xbf16>
    %cst_10 = arith.constant dense<0.000000e+00> : vector<18x64xf32>
    %20 = tpu.matmul %17, %19, %cst_10 {dimension_numbers = #tpu.dot_dimension_numbers<[1], [0], [0], [1], [0, 0, 1, 1], [], []>} : vector<18x32xbf16>, vector<32x64xbf16>, vector<18x64xf32> -> vector<18x64xf32>
    %21 = arith.addf %9, %20 : vector<18x64xf32>
    %22 = vector.extract_strided_slice %13 {offsets = [0, 0, 0, 1, 0], sizes = [2, 3, 3, 1, 32], strides = [1, 1, 1, 1, 1]} : vector<2x3x4x2x32xf32> to vector<2x3x3x1x32xf32>
    %23 = vector.shape_cast %22 : vector<2x3x3x1x32xf32> to vector<2x3x3x32xf32>
    %24 = vector.shape_cast %23 : vector<2x3x3x32xf32> to vector<18x32xf32>
    %25 = arith.truncf %24 : vector<18x32xf32> to vector<18x32xbf16>
    %c1 = arith.constant 1 : index
    %c0_11 = arith.constant 0 : index
    %c0_12 = arith.constant 0 : index
    %26 = vector.load %arg3[%c1, %c0_11, %c0_12] : memref<16x32x64xbf16, #tpu.memory_space<vmem>>, vector<1x32x64xbf16>
    %27 = vector.shape_cast %26 : vector<1x32x64xbf16> to vector<32x64xbf16>
    %cst_13 = arith.constant dense<0.000000e+00> : vector<18x64xf32>
    %28 = tpu.matmul %25, %27, %cst_13 {dimension_numbers = #tpu.dot_dimension_numbers<[1], [0], [0], [1], [0, 0, 1, 1], [], []>} : vector<18x32xbf16>, vector<32x64xbf16>, vector<18x64xf32> -> vector<18x64xf32>
    %29 = arith.addf %21, %28 : vector<18x64xf32>
    %30 = vector.extract_strided_slice %13 {offsets = [0, 0, 1, 0, 0], sizes = [2, 3, 3, 1, 32], strides = [1, 1, 1, 1, 1]} : vector<2x3x4x2x32xf32> to vector<2x3x3x1x32xf32>
    %31 = vector.shape_cast %30 : vector<2x3x3x1x32xf32> to vector<2x3x3x32xf32>
    %32 = vector.shape_cast %31 : vector<2x3x3x32xf32> to vector<18x32xf32>
    %33 = arith.truncf %32 : vector<18x32xf32> to vector<18x32xbf16>
    %c2 = arith.constant 2 : index
    %c0_14 = arith.constant 0 : index
    %c0_15 = arith.constant 0 : index
    %34 = vector.load %arg3[%c2, %c0_14, %c0_15] : memref<16x32x64xbf16, #tpu.memory_space<vmem>>, vector<1x32x64xbf16>
    %35 = vector.shape_cast %34 : vector<1x32x64xbf16> to vector<32x64xbf16>
    %cst_16 = arith.constant dense<0.000000e+00> : vector<18x64xf32>
    %36 = tpu.matmul %33, %35, %cst_16 {dimension_numbers = #tpu.dot_dimension_numbers<[1], [0], [0], [1], [0, 0, 1, 1], [], []>} : vector<18x32xbf16>, vector<32x64xbf16>, vector<18x64xf32> -> vector<18x64xf32>
    %37 = arith.addf %29, %36 : vector<18x64xf32>
    %38 = vector.extract_strided_slice %13 {offsets = [0, 0, 1, 1, 0], sizes = [2, 3, 3, 1, 32], strides = [1, 1, 1, 1, 1]} : vector<2x3x4x2x32xf32> to vector<2x3x3x1x32xf32>
    %39 = vector.shape_cast %38 : vector<2x3x3x1x32xf32> to vector<2x3x3x32xf32>
    %40 = vector.shape_cast %39 : vector<2x3x3x32xf32> to vector<18x32xf32>
    %41 = arith.truncf %40 : vector<18x32xf32> to vector<18x32xbf16>
    %c3 = arith.constant 3 : index
    %c0_17 = arith.constant 0 : index
    %c0_18 = arith.constant 0 : index
    %42 = vector.load %arg3[%c3, %c0_17, %c0_18] : memref<16x32x64xbf16, #tpu.memory_space<vmem>>, vector<1x32x64xbf16>
    %43 = vector.shape_cast %42 : vector<1x32x64xbf16> to vector<32x64xbf16>
    %cst_19 = arith.constant dense<0.000000e+00> : vector<18x64xf32>
    %44 = tpu.matmul %41, %43, %cst_19 {dimension_numbers = #tpu.dot_dimension_numbers<[1], [0], [0], [1], [0, 0, 1, 1], [], []>} : vector<18x32xbf16>, vector<32x64xbf16>, vector<18x64xf32> -> vector<18x64xf32>
    %45 = arith.addf %37, %44 : vector<18x64xf32>
    %46 = vector.extract_strided_slice %10 {offsets = [0, 0, 1, 0, 0], sizes = [2, 3, 1, 8, 32], strides = [1, 1, 1, 1, 1]} : vector<2x4x2x8x32xf32> to vector<2x3x1x8x32xf32>
    %47 = vector.shape_cast %46 : vector<2x3x1x8x32xf32> to vector<2x3x8x32xf32>
    %48 = vector.shape_cast %47 : vector<2x3x8x32xf32> to vector<2x3x4x2x32xf32>
    %49 = vector.extract_strided_slice %48 {offsets = [0, 0, 0, 0, 0], sizes = [2, 3, 3, 1, 32], strides = [1, 1, 1, 1, 1]} : vector<2x3x4x2x32xf32> to vector<2x3x3x1x32xf32>
    %50 = vector.shape_cast %49 : vector<2x3x3x1x32xf32> to vector<2x3x3x32xf32>
    %51 = vector.shape_cast %50 : vector<2x3x3x32xf32> to vector<18x32xf32>
    %52 = arith.truncf %51 : vector<18x32xf32> to vector<18x32xbf16>
    %c4 = arith.constant 4 : index
    %c0_20 = arith.constant 0 : index
    %c0_21 = arith.constant 0 : index
    %53 = vector.load %arg3[%c4, %c0_20, %c0_21] : memref<16x32x64xbf16, #tpu.memory_space<vmem>>, vector<1x32x64xbf16>
    %54 = vector.shape_cast %53 : vector<1x32x64xbf16> to vector<32x64xbf16>
    %cst_22 = arith.constant dense<0.000000e+00> : vector<18x64xf32>
    %55 = tpu.matmul %52, %54, %cst_22 {dimension_numbers = #tpu.dot_dimension_numbers<[1], [0], [0], [1], [0, 0, 1, 1], [], []>} : vector<18x32xbf16>, vector<32x64xbf16>, vector<18x64xf32> -> vector<18x64xf32>
    %56 = arith.addf %45, %55 : vector<18x64xf32>
    %57 = vector.extract_strided_slice %48 {offsets = [0, 0, 0, 1, 0], sizes = [2, 3, 3, 1, 32], strides = [1, 1, 1, 1, 1]} : vector<2x3x4x2x32xf32> to vector<2x3x3x1x32xf32>
    %58 = vector.shape_cast %57 : vector<2x3x3x1x32xf32> to vector<2x3x3x32xf32>
    %59 = vector.shape_cast %58 : vector<2x3x3x32xf32> to vector<18x32xf32>
    %60 = arith.truncf %59 : vector<18x32xf32> to vector<18x32xbf16>
    %c5 = arith.constant 5 : index
    %c0_23 = arith.constant 0 : index
    %c0_24 = arith.constant 0 : index
    %61 = vector.load %arg3[%c5, %c0_23, %c0_24] : memref<16x32x64xbf16, #tpu.memory_space<vmem>>, vector<1x32x64xbf16>
    %62 = vector.shape_cast %61 : vector<1x32x64xbf16> to vector<32x64xbf16>
    %cst_25 = arith.constant dense<0.000000e+00> : vector<18x64xf32>
    %63 = tpu.matmul %60, %62, %cst_25 {dimension_numbers = #tpu.dot_dimension_numbers<[1], [0], [0], [1], [0, 0, 1, 1], [], []>} : vector<18x32xbf16>, vector<32x64xbf16>, vector<18x64xf32> -> vector<18x64xf32>
    %64 = arith.addf %56, %63 : vector<18x64xf32>
    %65 = vector.extract_strided_slice %48 {offsets = [0, 0, 1, 0, 0], sizes = [2, 3, 3, 1, 32], strides = [1, 1, 1, 1, 1]} : vector<2x3x4x2x32xf32> to vector<2x3x3x1x32xf32>
    %66 = vector.shape_cast %65 : vector<2x3x3x1x32xf32> to vector<2x3x3x32xf32>
    %67 = vector.shape_cast %66 : vector<2x3x3x32xf32> to vector<18x32xf32>
    %68 = arith.truncf %67 : vector<18x32xf32> to vector<18x32xbf16>
    %c6 = arith.constant 6 : index
    %c0_26 = arith.constant 0 : index
    %c0_27 = arith.constant 0 : index
    %69 = vector.load %arg3[%c6, %c0_26, %c0_27] : memref<16x32x64xbf16, #tpu.memory_space<vmem>>, vector<1x32x64xbf16>
    %70 = vector.shape_cast %69 : vector<1x32x64xbf16> to vector<32x64xbf16>
    %cst_28 = arith.constant dense<0.000000e+00> : vector<18x64xf32>
    %71 = tpu.matmul %68, %70, %cst_28 {dimension_numbers = #tpu.dot_dimension_numbers<[1], [0], [0], [1], [0, 0, 1, 1], [], []>} : vector<18x32xbf16>, vector<32x64xbf16>, vector<18x64xf32> -> vector<18x64xf32>
    %72 = arith.addf %64, %71 : vector<18x64xf32>
    %73 = vector.extract_strided_slice %48 {offsets = [0, 0, 1, 1, 0], sizes = [2, 3, 3, 1, 32], strides = [1, 1, 1, 1, 1]} : vector<2x3x4x2x32xf32> to vector<2x3x3x1x32xf32>
    %74 = vector.shape_cast %73 : vector<2x3x3x1x32xf32> to vector<2x3x3x32xf32>
    %75 = vector.shape_cast %74 : vector<2x3x3x32xf32> to vector<18x32xf32>
    %76 = arith.truncf %75 : vector<18x32xf32> to vector<18x32xbf16>
    %c7 = arith.constant 7 : index
    %c0_29 = arith.constant 0 : index
    %c0_30 = arith.constant 0 : index
    %77 = vector.load %arg3[%c7, %c0_29, %c0_30] : memref<16x32x64xbf16, #tpu.memory_space<vmem>>, vector<1x32x64xbf16>
    %78 = vector.shape_cast %77 : vector<1x32x64xbf16> to vector<32x64xbf16>
    %cst_31 = arith.constant dense<0.000000e+00> : vector<18x64xf32>
    %79 = tpu.matmul %76, %78, %cst_31 {dimension_numbers = #tpu.dot_dimension_numbers<[1], [0], [0], [1], [0, 0, 1, 1], [], []>} : vector<18x32xbf16>, vector<32x64xbf16>, vector<18x64xf32> -> vector<18x64xf32>
    %80 = arith.addf %72, %79 : vector<18x64xf32>
    %81 = vector.extract_strided_slice %10 {offsets = [0, 1, 0, 0, 0], sizes = [2, 3, 1, 8, 32], strides = [1, 1, 1, 1, 1]} : vector<2x4x2x8x32xf32> to vector<2x3x1x8x32xf32>
    %82 = vector.shape_cast %81 : vector<2x3x1x8x32xf32> to vector<2x3x8x32xf32>
    %83 = vector.shape_cast %82 : vector<2x3x8x32xf32> to vector<2x3x4x2x32xf32>
    %84 = vector.extract_strided_slice %83 {offsets = [0, 0, 0, 0, 0], sizes = [2, 3, 3, 1, 32], strides = [1, 1, 1, 1, 1]} : vector<2x3x4x2x32xf32> to vector<2x3x3x1x32xf32>
    %85 = vector.shape_cast %84 : vector<2x3x3x1x32xf32> to vector<2x3x3x32xf32>
    %86 = vector.shape_cast %85 : vector<2x3x3x32xf32> to vector<18x32xf32>
    %87 = arith.truncf %86 : vector<18x32xf32> to vector<18x32xbf16>
    %c8 = arith.constant 8 : index
    %c0_32 = arith.constant 0 : index
    %c0_33 = arith.constant 0 : index
    %88 = vector.load %arg3[%c8, %c0_32, %c0_33] : memref<16x32x64xbf16, #tpu.memory_space<vmem>>, vector<1x32x64xbf16>
    %89 = vector.shape_cast %88 : vector<1x32x64xbf16> to vector<32x64xbf16>
    %cst_34 = arith.constant dense<0.000000e+00> : vector<18x64xf32>
    %90 = tpu.matmul %87, %89, %cst_34 {dimension_numbers = #tpu.dot_dimension_numbers<[1], [0], [0], [1], [0, 0, 1, 1], [], []>} : vector<18x32xbf16>, vector<32x64xbf16>, vector<18x64xf32> -> vector<18x64xf32>
    %91 = arith.addf %80, %90 : vector<18x64xf32>
    %92 = vector.extract_strided_slice %83 {offsets = [0, 0, 0, 1, 0], sizes = [2, 3, 3, 1, 32], strides = [1, 1, 1, 1, 1]} : vector<2x3x4x2x32xf32> to vector<2x3x3x1x32xf32>
    %93 = vector.shape_cast %92 : vector<2x3x3x1x32xf32> to vector<2x3x3x32xf32>
    %94 = vector.shape_cast %93 : vector<2x3x3x32xf32> to vector<18x32xf32>
    %95 = arith.truncf %94 : vector<18x32xf32> to vector<18x32xbf16>
    %c9 = arith.constant 9 : index
    %c0_35 = arith.constant 0 : index
    %c0_36 = arith.constant 0 : index
    %96 = vector.load %arg3[%c9, %c0_35, %c0_36] : memref<16x32x64xbf16, #tpu.memory_space<vmem>>, vector<1x32x64xbf16>
    %97 = vector.shape_cast %96 : vector<1x32x64xbf16> to vector<32x64xbf16>
    %cst_37 = arith.constant dense<0.000000e+00> : vector<18x64xf32>
    %98 = tpu.matmul %95, %97, %cst_37 {dimension_numbers = #tpu.dot_dimension_numbers<[1], [0], [0], [1], [0, 0, 1, 1], [], []>} : vector<18x32xbf16>, vector<32x64xbf16>, vector<18x64xf32> -> vector<18x64xf32>
    %99 = arith.addf %91, %98 : vector<18x64xf32>
    %100 = vector.extract_strided_slice %83 {offsets = [0, 0, 1, 0, 0], sizes = [2, 3, 3, 1, 32], strides = [1, 1, 1, 1, 1]} : vector<2x3x4x2x32xf32> to vector<2x3x3x1x32xf32>
    %101 = vector.shape_cast %100 : vector<2x3x3x1x32xf32> to vector<2x3x3x32xf32>
    %102 = vector.shape_cast %101 : vector<2x3x3x32xf32> to vector<18x32xf32>
    %103 = arith.truncf %102 : vector<18x32xf32> to vector<18x32xbf16>
    %c10 = arith.constant 10 : index
    %c0_38 = arith.constant 0 : index
    %c0_39 = arith.constant 0 : index
    %104 = vector.load %arg3[%c10, %c0_38, %c0_39] : memref<16x32x64xbf16, #tpu.memory_space<vmem>>, vector<1x32x64xbf16>
    %105 = vector.shape_cast %104 : vector<1x32x64xbf16> to vector<32x64xbf16>
    %cst_40 = arith.constant dense<0.000000e+00> : vector<18x64xf32>
    %106 = tpu.matmul %103, %105, %cst_40 {dimension_numbers = #tpu.dot_dimension_numbers<[1], [0], [0], [1], [0, 0, 1, 1], [], []>} : vector<18x32xbf16>, vector<32x64xbf16>, vector<18x64xf32> -> vector<18x64xf32>
    %107 = arith.addf %99, %106 : vector<18x64xf32>
    %108 = vector.extract_strided_slice %83 {offsets = [0, 0, 1, 1, 0], sizes = [2, 3, 3, 1, 32], strides = [1, 1, 1, 1, 1]} : vector<2x3x4x2x32xf32> to vector<2x3x3x1x32xf32>
    %109 = vector.shape_cast %108 : vector<2x3x3x1x32xf32> to vector<2x3x3x32xf32>
    %110 = vector.shape_cast %109 : vector<2x3x3x32xf32> to vector<18x32xf32>
    %111 = arith.truncf %110 : vector<18x32xf32> to vector<18x32xbf16>
    %c11 = arith.constant 11 : index
    %c0_41 = arith.constant 0 : index
    %c0_42 = arith.constant 0 : index
    %112 = vector.load %arg3[%c11, %c0_41, %c0_42] : memref<16x32x64xbf16, #tpu.memory_space<vmem>>, vector<1x32x64xbf16>
    %113 = vector.shape_cast %112 : vector<1x32x64xbf16> to vector<32x64xbf16>
    %cst_43 = arith.constant dense<0.000000e+00> : vector<18x64xf32>
    %114 = tpu.matmul %111, %113, %cst_43 {dimension_numbers = #tpu.dot_dimension_numbers<[1], [0], [0], [1], [0, 0, 1, 1], [], []>} : vector<18x32xbf16>, vector<32x64xbf16>, vector<18x64xf32> -> vector<18x64xf32>
    %115 = arith.addf %107, %114 : vector<18x64xf32>
    %116 = vector.extract_strided_slice %10 {offsets = [0, 1, 1, 0, 0], sizes = [2, 3, 1, 8, 32], strides = [1, 1, 1, 1, 1]} : vector<2x4x2x8x32xf32> to vector<2x3x1x8x32xf32>
    %117 = vector.shape_cast %116 : vector<2x3x1x8x32xf32> to vector<2x3x8x32xf32>
    %118 = vector.shape_cast %117 : vector<2x3x8x32xf32> to vector<2x3x4x2x32xf32>
    %119 = vector.extract_strided_slice %118 {offsets = [0, 0, 0, 0, 0], sizes = [2, 3, 3, 1, 32], strides = [1, 1, 1, 1, 1]} : vector<2x3x4x2x32xf32> to vector<2x3x3x1x32xf32>
    %120 = vector.shape_cast %119 : vector<2x3x3x1x32xf32> to vector<2x3x3x32xf32>
    %121 = vector.shape_cast %120 : vector<2x3x3x32xf32> to vector<18x32xf32>
    %122 = arith.truncf %121 : vector<18x32xf32> to vector<18x32xbf16>
    %c12 = arith.constant 12 : index
    %c0_44 = arith.constant 0 : index
    %c0_45 = arith.constant 0 : index
    %123 = vector.load %arg3[%c12, %c0_44, %c0_45] : memref<16x32x64xbf16, #tpu.memory_space<vmem>>, vector<1x32x64xbf16>
    %124 = vector.shape_cast %123 : vector<1x32x64xbf16> to vector<32x64xbf16>
    %cst_46 = arith.constant dense<0.000000e+00> : vector<18x64xf32>
    %125 = tpu.matmul %122, %124, %cst_46 {dimension_numbers = #tpu.dot_dimension_numbers<[1], [0], [0], [1], [0, 0, 1, 1], [], []>} : vector<18x32xbf16>, vector<32x64xbf16>, vector<18x64xf32> -> vector<18x64xf32>
    %126 = arith.addf %115, %125 : vector<18x64xf32>
    %127 = vector.extract_strided_slice %118 {offsets = [0, 0, 0, 1, 0], sizes = [2, 3, 3, 1, 32], strides = [1, 1, 1, 1, 1]} : vector<2x3x4x2x32xf32> to vector<2x3x3x1x32xf32>
    %128 = vector.shape_cast %127 : vector<2x3x3x1x32xf32> to vector<2x3x3x32xf32>
    %129 = vector.shape_cast %128 : vector<2x3x3x32xf32> to vector<18x32xf32>
    %130 = arith.truncf %129 : vector<18x32xf32> to vector<18x32xbf16>
    %c13 = arith.constant 13 : index
    %c0_47 = arith.constant 0 : index
    %c0_48 = arith.constant 0 : index
    %131 = vector.load %arg3[%c13, %c0_47, %c0_48] : memref<16x32x64xbf16, #tpu.memory_space<vmem>>, vector<1x32x64xbf16>
    %132 = vector.shape_cast %131 : vector<1x32x64xbf16> to vector<32x64xbf16>
    %cst_49 = arith.constant dense<0.000000e+00> : vector<18x64xf32>
    %133 = tpu.matmul %130, %132, %cst_49 {dimension_numbers = #tpu.dot_dimension_numbers<[1], [0], [0], [1], [0, 0, 1, 1], [], []>} : vector<18x32xbf16>, vector<32x64xbf16>, vector<18x64xf32> -> vector<18x64xf32>
    %134 = arith.addf %126, %133 : vector<18x64xf32>
    %135 = vector.extract_strided_slice %118 {offsets = [0, 0, 1, 0, 0], sizes = [2, 3, 3, 1, 32], strides = [1, 1, 1, 1, 1]} : vector<2x3x4x2x32xf32> to vector<2x3x3x1x32xf32>
    %136 = vector.shape_cast %135 : vector<2x3x3x1x32xf32> to vector<2x3x3x32xf32>
    %137 = vector.shape_cast %136 : vector<2x3x3x32xf32> to vector<18x32xf32>
    %138 = arith.truncf %137 : vector<18x32xf32> to vector<18x32xbf16>
    %c14 = arith.constant 14 : index
    %c0_50 = arith.constant 0 : index
    %c0_51 = arith.constant 0 : index
    %139 = vector.load %arg3[%c14, %c0_50, %c0_51] : memref<16x32x64xbf16, #tpu.memory_space<vmem>>, vector<1x32x64xbf16>
    %140 = vector.shape_cast %139 : vector<1x32x64xbf16> to vector<32x64xbf16>
    %cst_52 = arith.constant dense<0.000000e+00> : vector<18x64xf32>
    %141 = tpu.matmul %138, %140, %cst_52 {dimension_numbers = #tpu.dot_dimension_numbers<[1], [0], [0], [1], [0, 0, 1, 1], [], []>} : vector<18x32xbf16>, vector<32x64xbf16>, vector<18x64xf32> -> vector<18x64xf32>
    %142 = arith.addf %134, %141 : vector<18x64xf32>
    %143 = vector.extract_strided_slice %118 {offsets = [0, 0, 1, 1, 0], sizes = [2, 3, 3, 1, 32], strides = [1, 1, 1, 1, 1]} : vector<2x3x4x2x32xf32> to vector<2x3x3x1x32xf32>
    %144 = vector.shape_cast %143 : vector<2x3x3x1x32xf32> to vector<2x3x3x32xf32>
    %145 = vector.shape_cast %144 : vector<2x3x3x32xf32> to vector<18x32xf32>
    %146 = arith.truncf %145 : vector<18x32xf32> to vector<18x32xbf16>
    %c15 = arith.constant 15 : index
    %c0_53 = arith.constant 0 : index
    %c0_54 = arith.constant 0 : index
    %147 = vector.load %arg3[%c15, %c0_53, %c0_54] : memref<16x32x64xbf16, #tpu.memory_space<vmem>>, vector<1x32x64xbf16>
    %148 = vector.shape_cast %147 : vector<1x32x64xbf16> to vector<32x64xbf16>
    %cst_55 = arith.constant dense<0.000000e+00> : vector<18x64xf32>
    %149 = tpu.matmul %146, %148, %cst_55 {dimension_numbers = #tpu.dot_dimension_numbers<[1], [0], [0], [1], [0, 0, 1, 1], [], []>} : vector<18x32xbf16>, vector<32x64xbf16>, vector<18x64xf32> -> vector<18x64xf32>
    %150 = arith.addf %142, %149 : vector<18x64xf32>
    %c0_56 = arith.constant 0 : index
    %c0_57 = arith.constant 0 : index
    %151 = vector.load %arg4[%c0_56, %c0_57] : memref<1x64xf32, #tpu.memory_space<vmem>>, vector<1x64xf32>
    %152 = vector.broadcast %151 : vector<1x64xf32> to vector<18x64xf32>
    %153 = arith.addf %150, %152 : vector<18x64xf32>
    %cst_58 = arith.constant 0.000000e+00 : f32
    %154 = vector.broadcast %cst_58 : f32 to vector<18x64xf32>
    %155 = arith.maximumf %153, %154 : vector<18x64xf32>
    %156 = vector.shape_cast %155 : vector<18x64xf32> to vector<2x3x3x64xf32>
    %cst_59 = arith.constant 0.000000e+00 : f32
    %157 = vector.broadcast %cst_59 : f32 to vector<2x64xf32>
    %158 = vector.shape_cast %156 : vector<2x3x3x64xf32> to vector<2x3x1x3x64xf32>
    %159 = vector.extract_strided_slice %158 {offsets = [0, 0, 0, 0, 0], sizes = [2, 1, 1, 3, 64], strides = [1, 1, 1, 1, 1]} : vector<2x3x1x3x64xf32> to vector<2x1x1x3x64xf32>
    %160 = vector.shape_cast %159 : vector<2x1x1x3x64xf32> to vector<2x1x3x64xf32>
    %161 = vector.shape_cast %160 : vector<2x1x3x64xf32> to vector<2x1x3x1x64xf32>
    %162 = vector.extract_strided_slice %161 {offsets = [0, 0, 0, 0, 0], sizes = [2, 1, 1, 1, 64], strides = [1, 1, 1, 1, 1]} : vector<2x1x3x1x64xf32> to vector<2x1x1x1x64xf32>
    %163 = vector.shape_cast %162 : vector<2x1x1x1x64xf32> to vector<2x1x1x64xf32>
    %164 = vector.shape_cast %163 : vector<2x1x1x64xf32> to vector<2x64xf32>
    %165 = arith.truncf %164 : vector<2x64xf32> to vector<2x64xbf16>
    %c0_60 = arith.constant 0 : index
    %c0_61 = arith.constant 0 : index
    %c0_62 = arith.constant 0 : index
    %166 = vector.load %arg5[%c0_60, %c0_61, %c0_62] : memref<9x64x64xbf16, #tpu.memory_space<vmem>>, vector<1x64x64xbf16>
    %167 = vector.shape_cast %166 : vector<1x64x64xbf16> to vector<64x64xbf16>
    %cst_63 = arith.constant dense<0.000000e+00> : vector<2x64xf32>
    %168 = tpu.matmul %165, %167, %cst_63 {dimension_numbers = #tpu.dot_dimension_numbers<[1], [0], [0], [1], [0, 0, 1, 1], [], []>} : vector<2x64xbf16>, vector<64x64xbf16>, vector<2x64xf32> -> vector<2x64xf32>
    %169 = arith.addf %157, %168 : vector<2x64xf32>
    %170 = vector.extract_strided_slice %161 {offsets = [0, 0, 1, 0, 0], sizes = [2, 1, 1, 1, 64], strides = [1, 1, 1, 1, 1]} : vector<2x1x3x1x64xf32> to vector<2x1x1x1x64xf32>
    %171 = vector.shape_cast %170 : vector<2x1x1x1x64xf32> to vector<2x1x1x64xf32>
    %172 = vector.shape_cast %171 : vector<2x1x1x64xf32> to vector<2x64xf32>
    %173 = arith.truncf %172 : vector<2x64xf32> to vector<2x64xbf16>
    %c1_64 = arith.constant 1 : index
    %c0_65 = arith.constant 0 : index
    %c0_66 = arith.constant 0 : index
    %174 = vector.load %arg5[%c1_64, %c0_65, %c0_66] : memref<9x64x64xbf16, #tpu.memory_space<vmem>>, vector<1x64x64xbf16>
    %175 = vector.shape_cast %174 : vector<1x64x64xbf16> to vector<64x64xbf16>
    %cst_67 = arith.constant dense<0.000000e+00> : vector<2x64xf32>
    %176 = tpu.matmul %173, %175, %cst_67 {dimension_numbers = #tpu.dot_dimension_numbers<[1], [0], [0], [1], [0, 0, 1, 1], [], []>} : vector<2x64xbf16>, vector<64x64xbf16>, vector<2x64xf32> -> vector<2x64xf32>
    %177 = arith.addf %169, %176 : vector<2x64xf32>
    %178 = vector.extract_strided_slice %161 {offsets = [0, 0, 2, 0, 0], sizes = [2, 1, 1, 1, 64], strides = [1, 1, 1, 1, 1]} : vector<2x1x3x1x64xf32> to vector<2x1x1x1x64xf32>
    %179 = vector.shape_cast %178 : vector<2x1x1x1x64xf32> to vector<2x1x1x64xf32>
    %180 = vector.shape_cast %179 : vector<2x1x1x64xf32> to vector<2x64xf32>
    %181 = arith.truncf %180 : vector<2x64xf32> to vector<2x64xbf16>
    %c2_68 = arith.constant 2 : index
    %c0_69 = arith.constant 0 : index
    %c0_70 = arith.constant 0 : index
    %182 = vector.load %arg5[%c2_68, %c0_69, %c0_70] : memref<9x64x64xbf16, #tpu.memory_space<vmem>>, vector<1x64x64xbf16>
    %183 = vector.shape_cast %182 : vector<1x64x64xbf16> to vector<64x64xbf16>
    %cst_71 = arith.constant dense<0.000000e+00> : vector<2x64xf32>
    %184 = tpu.matmul %181, %183, %cst_71 {dimension_numbers = #tpu.dot_dimension_numbers<[1], [0], [0], [1], [0, 0, 1, 1], [], []>} : vector<2x64xbf16>, vector<64x64xbf16>, vector<2x64xf32> -> vector<2x64xf32>
    %185 = arith.addf %177, %184 : vector<2x64xf32>
    %186 = vector.extract_strided_slice %158 {offsets = [0, 1, 0, 0, 0], sizes = [2, 1, 1, 3, 64], strides = [1, 1, 1, 1, 1]} : vector<2x3x1x3x64xf32> to vector<2x1x1x3x64xf32>
    %187 = vector.shape_cast %186 : vector<2x1x1x3x64xf32> to vector<2x1x3x64xf32>
    %188 = vector.shape_cast %187 : vector<2x1x3x64xf32> to vector<2x1x3x1x64xf32>
    %189 = vector.extract_strided_slice %188 {offsets = [0, 0, 0, 0, 0], sizes = [2, 1, 1, 1, 64], strides = [1, 1, 1, 1, 1]} : vector<2x1x3x1x64xf32> to vector<2x1x1x1x64xf32>
    %190 = vector.shape_cast %189 : vector<2x1x1x1x64xf32> to vector<2x1x1x64xf32>
    %191 = vector.shape_cast %190 : vector<2x1x1x64xf32> to vector<2x64xf32>
    %192 = arith.truncf %191 : vector<2x64xf32> to vector<2x64xbf16>
    %c3_72 = arith.constant 3 : index
    %c0_73 = arith.constant 0 : index
    %c0_74 = arith.constant 0 : index
    %193 = vector.load %arg5[%c3_72, %c0_73, %c0_74] : memref<9x64x64xbf16, #tpu.memory_space<vmem>>, vector<1x64x64xbf16>
    %194 = vector.shape_cast %193 : vector<1x64x64xbf16> to vector<64x64xbf16>
    %cst_75 = arith.constant dense<0.000000e+00> : vector<2x64xf32>
    %195 = tpu.matmul %192, %194, %cst_75 {dimension_numbers = #tpu.dot_dimension_numbers<[1], [0], [0], [1], [0, 0, 1, 1], [], []>} : vector<2x64xbf16>, vector<64x64xbf16>, vector<2x64xf32> -> vector<2x64xf32>
    %196 = arith.addf %185, %195 : vector<2x64xf32>
    %197 = vector.extract_strided_slice %188 {offsets = [0, 0, 1, 0, 0], sizes = [2, 1, 1, 1, 64], strides = [1, 1, 1, 1, 1]} : vector<2x1x3x1x64xf32> to vector<2x1x1x1x64xf32>
    %198 = vector.shape_cast %197 : vector<2x1x1x1x64xf32> to vector<2x1x1x64xf32>
    %199 = vector.shape_cast %198 : vector<2x1x1x64xf32> to vector<2x64xf32>
    %200 = arith.truncf %199 : vector<2x64xf32> to vector<2x64xbf16>
    %c4_76 = arith.constant 4 : index
    %c0_77 = arith.constant 0 : index
    %c0_78 = arith.constant 0 : index
    %201 = vector.load %arg5[%c4_76, %c0_77, %c0_78] : memref<9x64x64xbf16, #tpu.memory_space<vmem>>, vector<1x64x64xbf16>
    %202 = vector.shape_cast %201 : vector<1x64x64xbf16> to vector<64x64xbf16>
    %cst_79 = arith.constant dense<0.000000e+00> : vector<2x64xf32>
    %203 = tpu.matmul %200, %202, %cst_79 {dimension_numbers = #tpu.dot_dimension_numbers<[1], [0], [0], [1], [0, 0, 1, 1], [], []>} : vector<2x64xbf16>, vector<64x64xbf16>, vector<2x64xf32> -> vector<2x64xf32>
    %204 = arith.addf %196, %203 : vector<2x64xf32>
    %205 = vector.extract_strided_slice %188 {offsets = [0, 0, 2, 0, 0], sizes = [2, 1, 1, 1, 64], strides = [1, 1, 1, 1, 1]} : vector<2x1x3x1x64xf32> to vector<2x1x1x1x64xf32>
    %206 = vector.shape_cast %205 : vector<2x1x1x1x64xf32> to vector<2x1x1x64xf32>
    %207 = vector.shape_cast %206 : vector<2x1x1x64xf32> to vector<2x64xf32>
    %208 = arith.truncf %207 : vector<2x64xf32> to vector<2x64xbf16>
    %c5_80 = arith.constant 5 : index
    %c0_81 = arith.constant 0 : index
    %c0_82 = arith.constant 0 : index
    %209 = vector.load %arg5[%c5_80, %c0_81, %c0_82] : memref<9x64x64xbf16, #tpu.memory_space<vmem>>, vector<1x64x64xbf16>
    %210 = vector.shape_cast %209 : vector<1x64x64xbf16> to vector<64x64xbf16>
    %cst_83 = arith.constant dense<0.000000e+00> : vector<2x64xf32>
    %211 = tpu.matmul %208, %210, %cst_83 {dimension_numbers = #tpu.dot_dimension_numbers<[1], [0], [0], [1], [0, 0, 1, 1], [], []>} : vector<2x64xbf16>, vector<64x64xbf16>, vector<2x64xf32> -> vector<2x64xf32>
    %212 = arith.addf %204, %211 : vector<2x64xf32>
    %213 = vector.extract_strided_slice %158 {offsets = [0, 2, 0, 0, 0], sizes = [2, 1, 1, 3, 64], strides = [1, 1, 1, 1, 1]} : vector<2x3x1x3x64xf32> to vector<2x1x1x3x64xf32>
    %214 = vector.shape_cast %213 : vector<2x1x1x3x64xf32> to vector<2x1x3x64xf32>
    %215 = vector.shape_cast %214 : vector<2x1x3x64xf32> to vector<2x1x3x1x64xf32>
    %216 = vector.extract_strided_slice %215 {offsets = [0, 0, 0, 0, 0], sizes = [2, 1, 1, 1, 64], strides = [1, 1, 1, 1, 1]} : vector<2x1x3x1x64xf32> to vector<2x1x1x1x64xf32>
    %217 = vector.shape_cast %216 : vector<2x1x1x1x64xf32> to vector<2x1x1x64xf32>
    %218 = vector.shape_cast %217 : vector<2x1x1x64xf32> to vector<2x64xf32>
    %219 = arith.truncf %218 : vector<2x64xf32> to vector<2x64xbf16>
    %c6_84 = arith.constant 6 : index
    %c0_85 = arith.constant 0 : index
    %c0_86 = arith.constant 0 : index
    %220 = vector.load %arg5[%c6_84, %c0_85, %c0_86] : memref<9x64x64xbf16, #tpu.memory_space<vmem>>, vector<1x64x64xbf16>
    %221 = vector.shape_cast %220 : vector<1x64x64xbf16> to vector<64x64xbf16>
    %cst_87 = arith.constant dense<0.000000e+00> : vector<2x64xf32>
    %222 = tpu.matmul %219, %221, %cst_87 {dimension_numbers = #tpu.dot_dimension_numbers<[1], [0], [0], [1], [0, 0, 1, 1], [], []>} : vector<2x64xbf16>, vector<64x64xbf16>, vector<2x64xf32> -> vector<2x64xf32>
    %223 = arith.addf %212, %222 : vector<2x64xf32>
    %224 = vector.extract_strided_slice %215 {offsets = [0, 0, 1, 0, 0], sizes = [2, 1, 1, 1, 64], strides = [1, 1, 1, 1, 1]} : vector<2x1x3x1x64xf32> to vector<2x1x1x1x64xf32>
    %225 = vector.shape_cast %224 : vector<2x1x1x1x64xf32> to vector<2x1x1x64xf32>
    %226 = vector.shape_cast %225 : vector<2x1x1x64xf32> to vector<2x64xf32>
    %227 = arith.truncf %226 : vector<2x64xf32> to vector<2x64xbf16>
    %c7_88 = arith.constant 7 : index
    %c0_89 = arith.constant 0 : index
    %c0_90 = arith.constant 0 : index
    %228 = vector.load %arg5[%c7_88, %c0_89, %c0_90] : memref<9x64x64xbf16, #tpu.memory_space<vmem>>, vector<1x64x64xbf16>
    %229 = vector.shape_cast %228 : vector<1x64x64xbf16> to vector<64x64xbf16>
    %cst_91 = arith.constant dense<0.000000e+00> : vector<2x64xf32>
    %230 = tpu.matmul %227, %229, %cst_91 {dimension_numbers = #tpu.dot_dimension_numbers<[1], [0], [0], [1], [0, 0, 1, 1], [], []>} : vector<2x64xbf16>, vector<64x64xbf16>, vector<2x64xf32> -> vector<2x64xf32>
    %231 = arith.addf %223, %230 : vector<2x64xf32>
    %232 = vector.extract_strided_slice %215 {offsets = [0, 0, 2, 0, 0], sizes = [2, 1, 1, 1, 64], strides = [1, 1, 1, 1, 1]} : vector<2x1x3x1x64xf32> to vector<2x1x1x1x64xf32>
    %233 = vector.shape_cast %232 : vector<2x1x1x1x64xf32> to vector<2x1x1x64xf32>
    %234 = vector.shape_cast %233 : vector<2x1x1x64xf32> to vector<2x64xf32>
    %235 = arith.truncf %234 : vector<2x64xf32> to vector<2x64xbf16>
    %c8_92 = arith.constant 8 : index
    %c0_93 = arith.constant 0 : index
    %c0_94 = arith.constant 0 : index
    %236 = vector.load %arg5[%c8_92, %c0_93, %c0_94] : memref<9x64x64xbf16, #tpu.memory_space<vmem>>, vector<1x64x64xbf16>
    %237 = vector.shape_cast %236 : vector<1x64x64xbf16> to vector<64x64xbf16>
    %cst_95 = arith.constant dense<0.000000e+00> : vector<2x64xf32>
    %238 = tpu.matmul %235, %237, %cst_95 {dimension_numbers = #tpu.dot_dimension_numbers<[1], [0], [0], [1], [0, 0, 1, 1], [], []>} : vector<2x64xbf16>, vector<64x64xbf16>, vector<2x64xf32> -> vector<2x64xf32>
    %239 = arith.addf %231, %238 : vector<2x64xf32>
    %c0_96 = arith.constant 0 : index
    %c0_97 = arith.constant 0 : index
    %240 = vector.load %arg6[%c0_96, %c0_97] : memref<1x64xf32, #tpu.memory_space<vmem>>, vector<1x64xf32>
    %241 = vector.broadcast %240 : vector<1x64xf32> to vector<2x64xf32>
    %242 = arith.addf %239, %241 : vector<2x64xf32>
    %cst_98 = arith.constant 0.000000e+00 : f32
    %243 = vector.broadcast %cst_98 : f32 to vector<2x64xf32>
    %244 = arith.maximumf %242, %243 : vector<2x64xf32>
    %245 = vector.shape_cast %244 : vector<2x64xf32> to vector<2x1x1x64xf32>
    %246 = vector.shape_cast %245 : vector<2x1x1x64xf32> to vector<2x64xf32>
    %247 = arith.truncf %246 : vector<2x64xf32> to vector<2x64xbf16>
    %c0_99 = arith.constant 0 : index
    %c0_100 = arith.constant 0 : index
    %248 = vector.load %arg7[%c0_99, %c0_100] : memref<64x512xbf16, #tpu.memory_space<vmem>>, vector<64x512xbf16>
    %cst_101 = arith.constant dense<0.000000e+00> : vector<2x512xf32>
    %249 = tpu.matmul %247, %248, %cst_101 {dimension_numbers = #tpu.dot_dimension_numbers<[1], [0], [0], [1], [0, 0, 1, 1], [], []>} : vector<2x64xbf16>, vector<64x512xbf16>, vector<2x512xf32> -> vector<2x512xf32>
    %c0_102 = arith.constant 0 : index
    %c0_103 = arith.constant 0 : index
    %250 = vector.load %arg8[%c0_102, %c0_103] : memref<1x512xf32, #tpu.memory_space<vmem>>, vector<1x512xf32>
    %251 = vector.broadcast %250 : vector<1x512xf32> to vector<2x512xf32>
    %252 = arith.addf %249, %251 : vector<2x512xf32>
    %cst_104 = arith.constant 0.000000e+00 : f32
    %253 = vector.broadcast %cst_104 : f32 to vector<2x512xf32>
    %254 = arith.maximumf %252, %253 : vector<2x512xf32>
    %255 = arith.truncf %254 : vector<2x512xf32> to vector<2x512xbf16>
    %c0_105 = arith.constant 0 : index
    %c0_106 = arith.constant 0 : index
    %256 = vector.load %arg9[%c0_105, %c0_106] : memref<512x6xbf16, #tpu.memory_space<vmem>>, vector<512x6xbf16>
    %cst_107 = arith.constant dense<0.000000e+00> : vector<2x6xf32>
    %257 = tpu.matmul %255, %256, %cst_107 {dimension_numbers = #tpu.dot_dimension_numbers<[1], [0], [0], [1], [0, 0, 1, 1], [], []>} : vector<2x512xbf16>, vector<512x6xbf16>, vector<2x6xf32> -> vector<2x6xf32>
    %c0_108 = arith.constant 0 : index
    %c0_109 = arith.constant 0 : index
    %258 = vector.load %arg10[%c0_108, %c0_109] : memref<1x6xf32, #tpu.memory_space<vmem>>, vector<1x6xf32>
    %259 = vector.broadcast %258 : vector<1x6xf32> to vector<2x6xf32>
    %260 = arith.addf %257, %259 : vector<2x6xf32>
    %c0_110 = arith.constant 0 : index
    %c0_111 = arith.constant 0 : index
    %261 = vector.load %arg11[%c0_110, %c0_111] : memref<2x6xf32, #tpu.memory_space<vmem>>, vector<2x6xf32>
    tpu.vector_store %arg11[%c0_110, %c0_111], %260 {strides = array<i32>} : memref<2x6xf32, #tpu.memory_space<vmem>>, vector<2x6xf32>,
    return
  }
}

</mosaic_0001>

<bundles_post_ra>
// kernel: qlearner_forward.1
= control target key start
LH: loop header
LB: loop body
LE: loop exit
PB: predicated region body
PF: predicated region fallthrough
CT: control target
= control target key end

     0   :  { %s6683_s0 = inlined_call_operand.vmem [shape: bf16[128,256], index: 0, kind: input, shape index: {}]   ;;  %s6684_s1 = inlined_call_operand.vmem [shape: bf16[256,32], index: 1, kind: input, shape index: {}]   ;;  %s6685_s2 = inlined_call_operand.vmem [shape: f32[1,32], index: 2, kind: input, shape index: {}]   ;;  %s6686_s3 = inlined_call_operand.vmem [shape: bf16[16,32,64], index: 3, kind: input, shape index: {}]   ;;  %s6687_s4 = inlined_call_operand.vmem [shape: f32[1,64], index: 4, kind: input, shape index: {}]   ;;  %s6688_s5 = inlined_call_operand.vmem [shape: bf16[9,64,64], index: 5, kind: input, shape index: {}]   ;;  %s6689_s6 = inlined_call_operand.vmem [shape: f32[1,64], index: 6, kind: input, shape index: {}]   ;;  %s6690_s7 = inlined_call_operand.vmem [shape: bf16[64,512], index: 7, kind: input, shape index: {}]   ;;  %s6691_s8 = inlined_call_operand.vmem [shape: f32[1,512], index: 8, kind: input, shape index: {}]   ;;  %s6692_s9 = inlined_call_operand.vmem [shape: bf16[512,6], index: 9, kind: input, shape index: {}]   ;;  %s6693_s10 = inlined_call_operand.vmem [shape: f32[1,6], index: 10, kind: input, shape index: {}]   ;;  %s6694_s11 = inlined_call_operand.hbm [shape: f32[2,6], index: 11, kind: output, shape index: {}]  }
   0x1   :  { %v4869_v0 = vld [vmem:[%s6684_s1 + $0x40] sm:$0xff]   ;;  %v4871_v2 = vld [vmem:[%s6684_s1 + $0x48] sm:$0xff]   ;;  %v4873_v4 = vld [vmem:[%s6684_s1 + $0x50] sm:$0xff]  }
   0x2   :  { %v4870_v1 = vld [vmem:[%s6684_s1] sm:$0xff]   ;;  %4410 = vmatprep.subr.bf16.mxu0 %v4869_v0  ;;  %v4872_v3 = vld [vmem:[%s6684_s1 + $0x8] sm:$0xff]   ;;  %v4874_v5 = vld [vmem:[%s6684_s1 + $0x10] sm:$0xff]  }
   0x3   :  { %4411 = vmatpush3.bf16.msra.mxu0 %v4870_v1  ;;  %v4875_v6 = vld [vmem:[%s6684_s1 + $0x58] sm:$0xff]   ;;  %v4877_v8 = vld [vmem:[%s6684_s1 + $0x60] sm:$0xff]   ;;  %v4879_v10 = vld [vmem:[%s6684_s1 + $0x68] sm:$0xff]  }
   0x4   :  { %4412 = vmatprep.subr.bf16.mxu0 %v4871_v2  ;;  %v4876_v7 = vld [vmem:[%s6684_s1 + $0x18] sm:$0xff]   ;;  %v4878_v9 = vld [vmem:[%s6684_s1 + $0x20] sm:$0xff]   ;;  %v4880_v12 = vld [vmem:[%s6684_s1 + $0x28] sm:$0xff]  }
   0x5   :  { %v4887_v11 = vld [vmem:[%s6683_s0 + $0x4] ss:$8 sps:$4 sm:$0xff]   ;;  %v4881_v13 = vld [vmem:[%s6684_s1 + $0x70] sm:$0xff]   ;;  %v4883_v15 = vld [vmem:[%s6684_s1 + $0x78] sm:$0xff]  }
   0x6   :  { %303 = vmatprep.mubr.bf16.mxu0 %v4887_v11  ;;  %v4882_v14 = vld [vmem:[%s6684_s1 + $0x30] sm:$0xff]   ;;  %v4884_v16 = vld [vmem:[%s6684_s1 + $0x38] sm:$0xff]   ;;  %v4885_v17 = vld [vmem:[%s6683_s0] ss:$8 sps:$4 sm:$0xff]  }
   0x7   :  { %4413 = vmatpush3.bf16.msra.mxu0 %v4872_v3  ;;  %v4888_v18 = vld [vmem:[%s6683_s0 + $0x14] ss:$8 sps:$4 sm:$0xff]   ;;  %v4890_v19 = vld [vmem:[%s6683_s0 + $0x10] ss:$8 sps:$4 sm:$0xff]   ;;  %v4891_v20 = vld [vmem:[%s6683_s0 + $0x24] ss:$8 sps:$4 sm:$0xff]  }
   0x8   :  { %4414 = vmatprep.subr.bf16.mxu0 %v4873_v4  ;;  %v4893_v21 = vld [vmem:[%s6683_s0 + $0x20] ss:$8 sps:$4 sm:$0xff]   ;;  %v4894_v22 = vld [vmem:[%s6683_s0 + $0x34] ss:$8 sps:$4 sm:$0xff]   ;;  %v4896_v23 = vld [vmem:[%s6683_s0 + $0x30] ss:$8 sps:$4 sm:$0xff]  }
   0x9   :  { %v4897_v24 = vld [vmem:[%s6683_s0 + $0x44] ss:$8 sps:$4 sm:$0xff]   ;;  %v4899_v25 = vld [vmem:[%s6683_s0 + $0x40] ss:$8 sps:$4 sm:$0xff]   ;;  %v4900_v26 = vld [vmem:[%s6683_s0 + $0x54] ss:$8 sps:$4 sm:$0xff]  }
   0xa   :  { %v4902_v27 = vld [vmem:[%s6683_s0 + $0x50] ss:$8 sps:$4 sm:$0xff]   ;;  %v4903_v28 = vld [vmem:[%s6683_s0 + $0x64] ss:$8 sps:$4 sm:$0xff]   ;;  %v4905_v29 = vld [vmem:[%s6683_s0 + $0x60] ss:$8 sps:$4 sm:$0xff]  }
   0xb   :  { %4415 = vmatpush3.bf16.msra.mxu0 %v4874_v5  ;;  %v4906_v30 = vld [vmem:[%s6683_s0 + $0x74] ss:$8 sps:$4 sm:$0xff]   ;;  %v4908_v31 = vld [vmem:[%s6683_s0 + $0x70] ss:$8 sps:$4 sm:$0xff]  }
   0xc   :  { %4416 = vmatprep.subr.bf16.mxu0 %v4875_v6 }
   0xf   :  { %4417 = vmatpush3.bf16.msra.mxu0 %v4876_v7 }
  0x10   :  { %4418 = vmatprep.subr.bf16.mxu0 %v4877_v8 }
  0x13   :  { %4419 = vmatpush3.bf16.msra.mxu0 %v4878_v9 }
  0x14   :  { %4420 = vmatprep.subr.bf16.mxu0 %v4879_v10 }
  0x17   :  { %4421 = vmatpush3.bf16.msra.mxu0 %v4880_v12 }
  0x18   :  { %4422 = vmatprep.subr.bf16.mxu0 %v4881_v13 }
  0x1b   :  { %4423 = vmatpush3.bf16.msra.mxu0 %v4882_v14 }
  0x1c   :  { %4424 = vmatprep.subr.bf16.mxu0 %v4883_v15 }
  0x1f   :  { %4425 = vmatpush3.bf16.msra.mxu0 %v4884_v16 }
  0x22   :  { %304 = vmatmul.mubr.bf16.vlgmr.msra.gmra.mrb[0].mxu0 %v4885_v17 }
  0x23   :  { %311 = vmatprep.mubr.bf16.mxu0 %v4888_v18 }
  0x2a   :  { %312 = vmatmul.mubr.bf16.gmra.mrb[4].mxu0 %v4890_v19 }
  0x2b   :  { %319 = vmatprep.mubr.bf16.mxu0 %v4891_v20 }
  0x32   :  { %320 = vmatmul.mubr.bf16.gmra.mrb[8].mxu0 %v4893_v21 }
  0x33   :  { %327 = vmatprep.mubr.bf16.mxu0 %v4894_v22 }
  0x3a   :  { %328 = vmatmul.mubr.bf16.gmra.mrb[12].mxu0 %v4896_v23 }
  0x3b   :  { %335 = vmatprep.mubr.bf16.mxu0 %v4897_v24 }
  0x42   :  { %336 = vmatmul.mubr.bf16.gmra.mrb[16].mxu0 %v4899_v25 }
  0x43   :  { %343 = vmatprep.mubr.bf16.mxu0 %v4900_v26 }
  0x4a   :  { %344 = vmatmul.mubr.bf16.gmra.mrb[20].mxu0 %v4902_v27 }
  0x4b   :  { %351 = vmatprep.mubr.bf16.mxu0 %v4903_v28 }
  0x52   :  { %352 = vmatmul.mubr.bf16.gmra.mrb[24].mxu0 %v4905_v29 }
  0x53   :  { %359 = vmatprep.mubr.bf16.mxu0 %v4906_v30 }
  0x5a   :  { %360 = vmatmul.mubr.bf16.gmra.mrb[28].mxu0 %v4908_v31 }
  0x5b   :  { %16 = vsyncpa [#allocation3], 0  ;;  %v4909_v32 = vld [vmem:[%s6686_s3 + $0x10] sm:$0xff]   ;;  %v4910_v33 = vld [vmem:[%s6686_s3 + $0x18] sm:$0xff]   ;;  %v5058_v36 = vmov 1983009808   ;;  %v394_v38 = vlaneseq }
  0x5c   :  { %4627 = vmatprep.subr.bf16.mxu1 %v4909_v32  ;;  %v5229_v34 = vld [vmem:[%s6686_s3] sm:$0xff]   ;;  %v4912_v35 = vld [vmem:[%s6686_s3 + $0xb0] sm:$0xff]   ;;  %v392_v37 = vunpack.c.l.s4 %v5058_v36  ;;  %v4914_v39 = vld [vmem:[%s6686_s3 + $0xb8] sm:$0xff]   ;;  %vm580_vm0 = vcmask 1041409   ;;  %vm583_vm1 = vcmask 1042434   ;;  %vm586_vm2 = vcmask 1043459  }
  0x5d   :  { %4628 = vmatpush3.bf16.msra.mxu1 %v4909_v32  ;;  %4715 = vmatprep.subr.bf16.mxu0 %v4912_v35  ;;  %v5238_v42 = vshrl.u32 %v394_v38, 7  ;;  %v5243_v43 = vld [vmem:[%s6685_s2] ss:$0 sm:$0xff]  ;;  %v4916_v51 = vld [vmem:[%s6686_s3 + $0xd0] sm:$0xff]   ;;  %vm589_vm3 = vcmask 1044484   ;;  %vm592_vm4 = vcmask 1045509  }
  0x5e   :  { %4629 = vmatprep.subr.bf16.mxu1 %v4910_v33  ;;  %4716 = vmatpush3.bf16.msra.mxu0 %v4912_v35  ;;  %v393_v41 = vunpack.c.0.s8 %v392_v37  ;;  %vm595_vm5 = vcmask 1046534   ;;  %vm598_vm6 = vcmask 1047559   ;;  %vm630_vm7 = vcmask 261120   ;;  %s5063_s1 = smov [#allocation2]  }
  0x5f   :  { %4717 = vmatprep.subr.bf16.mxu0 %v4914_v39  ;;  %6731 = vst [vmem:[#allocation5_spill] sm:$0xff] %v5238_v42  ;;  %vm5060_vm8 = vmmov 0   ;;  %vm2791_vm9 = vcmask 523264   ;;  %s4083_s21 = sshll.u32 %s5063_s1, 4  ;;  %vm4075_vm10 = vcmask 41984   ;;  %s4084_s21 = int_to_ptr.vmem [resolvable:$true] %s4083_s21 }
  0x60   :  { %v5247_v49 = vsub.s32 %v393_v41, %v5238_v42  ;;  %s5034_s22 = scalar_lea.vmem %s4084_s21, 32  ;;  %p5039_p1 = scmp.lt.s32.totalorder %s4084_s21, %s4084_s21 }
  0x61   :  { %4630 = vmatpush3.bf16.msra.mxu1 %v4910_v33  ;;  %p5035_p0 = scmp.ne.s32.totalorder %s4084_s21, %s5034_s22  ;;  %p5040_p2 = scmp.lt.s32.totalorder %s5034_s22, %s5034_s22 }
  0x62   :  { %4635 = vmatprep.subr.bf16.mxu1 %v5229_v34  ;;  %4718 = vmatpush3.bf16.msra.mxu0 %v4914_v39 }
  0x63   :  { %4731 = vmatprep.subr.bf16.mxu0 %v4916_v51  ;;  %p5041_p3 = por %p5040_p2, %p5039_p1 }
  0x65   :  { %p5042_p4 = pnand %p5041_p3, %p5035_p0 }
  0xf5   :  { %v4426_v40 = vpop.f32.mrb[0].mxu0 }
  0xf6   :  { %v4427_v44 = vpop.f32.mrb[1].mxu0 }
  0xf7   :  { %v4428_v45 = vadd.f32 %v4427_v44, %v4426_v40  ;;  %v4429_v46 = vpop.f32.mrb[2].mxu0 }
  0xf8   :  { %v4430_v47 = vpop.f32.mrb[3].mxu0 }
  0xf9   :  { %v306_v48 = vadd.f32 %v4428_v45, %v5243_v43  ;;  %v4431_v50 = vadd.f32 %v4430_v47, %v4429_v46 }
  0xfb   :  { %v368_v52 = vmax.f32 %v306_v48, 0.0  ;;  %v309_v53 = vadd.f32 %v4431_v50, %v5243_v43 }
  0xfd   :  { %v390_v54 = vcombine.high %v368_v52, %v368_v52  ;;  %v397_v55 = vrot.slane %v368_v52, %v5247_v49  ;;  %v369_v56 = vmax.f32 %v309_v53, 0.0  ;;  %v4432_v57 = vpop.f32.mrb[4].mxu0 }
  0xfe   :  { %v4433_v58 = vpop.f32.mrb[5].mxu0 }
  0xff   :  { %v404_v59 = vrot.slane %v390_v54, %v5247_v49  ;;  %v405_v60 = vcombine.high %v397_v55, %v397_v55  ;;  %v516_v61 = vpack.c.bf16 %v397_v55, %v397_v55  ;;  %v1009_v62 = vcombine.high %v369_v56, %v369_v56  ;;  %v4435_v63 = vpop.f32.mrb[6].mxu0 }
 0x100   :  { %v1016_v0 = vrot.slane %v369_v56, %v5247_v49  ;;  %v4434_v1 = vadd.f32 %v4433_v58, %v4432_v57  ;;  %v4436_v2 = vpop.f32.mrb[7].mxu0 }
 0x101   :  { %v406_v3 = vcombine.high %v404_v59, %v404_v59  ;;  %v517_v4 = vpack.c.bf16 %v405_v60, %v405_v60  ;;  %v518_v5 = vpack.c.bf16 %v404_v59, %v404_v59  ;;  %v1023_v6 = vrot.slane %v1009_v62, %v5247_v49 }
 0x102   :  { %v1024_v7 = vcombine.high %v1016_v0, %v1016_v0  ;;  %v1135_v8 = vpack.c.bf16 %v1016_v0, %v1016_v0  ;;  %v561_v9 = vunpack.c.l.b16 %v516_v61  ;;  %v314_v23 = vadd.f32 %v4434_v1, %v5243_v43 }
 0x103   :  { %v562_v10 = vunpack.c.l.b16 %v517_v4  ;;  %v5257_v11 = vunpack.c.l.b16 %v518_v5  ;;  %v783_v12 = vpack.c.bf16 %v406_v3, %v406_v3  ;;  %v1025_v13 = vcombine.high %v1023_v6, %v1023_v6 }
 0x104   :  { %v1136_v14 = vpack.c.bf16 %v1024_v7, %v1024_v7  ;;  %v1137_v15 = vpack.c.bf16 %v1023_v6, %v1023_v6  ;;  %v1176_v16 = vunpack.c.l.b16 %v1135_v8  ;;  %v579_v25 = vrot.slane %v561_v9, 1 }
 0x105   :  { %v582_v17 = vrot.slane %v5257_v11, 7  ;;  %v685_v18 = vrot.slane %v562_v10, 7  ;;  %v4438_v19 = vpop.f32.mrb[8].mxu0  ;;  %v800_v20 = vunpack.c.l.b16 %v783_v12  ;;  %v902_v21 = vrot.slane %v562_v10, 1 }
 0x106   :  { %v1177_v22 = vunpack.c.l.b16 %v1136_v14  ;;  %v4439_v24 = vpop.f32.mrb[9].mxu0  ;;  %v687_v26 = vrot.slane %v5257_v11, 6  ;;  %v1178_v27 = vunpack.c.l.b16 %v1137_v15  ;;  %v1401_v28 = vpack.c.bf16 %v1025_v13, %v1025_v13 }
 0x107   :  { %v4441_v29 = vpop.f32.mrb[10].mxu0  ;;  %v686_v30 = vsel %vm580_vm0, %v685_v18, %v561_v9  ;;  %v807_v31 = vrot.slane %v800_v20, 6  ;;  %v904_v32 = vrot.slane %v800_v20, 7  ;;  %v1300_v33 = vrot.slane %v1176_v16, 1 }
 0x108   :  { %v4442_v35 = vpop.f32.mrb[11].mxu0  ;;  %v806_v36 = vsel %vm580_vm0, %v582_v17, %v562_v10  ;;  %v903_v37 = vsel %vm580_vm0, %v5257_v11, %v902_v21  ;;  %v1194_v38 = vrot.slane %v1177_v22, 7  ;;  %v1418_v39 = vunpack.c.l.b16 %v1401_v28 }
 0x109   :  { %v581_v40 = vsel %vm580_vm0, %v562_v10, %v579_v25  ;;  %v5270_v41 = vsel %vm583_vm1, %v687_v26, %v686_v30  ;;  %v1196_v44 = vrot.slane %v1178_v27, 6  ;;  %v370_v45 = vmax.f32 %v314_v23, 0.0 }
 0x10a   :  { %v5273_v46 = vsel %vm583_vm1, %v807_v31, %v806_v36  ;;  %v5276_v47 = vsel %vm583_vm1, %v904_v32, %v903_v37  ;;  %v1301_v48 = vsel %vm580_vm0, %v1177_v22, %v1300_v33  ;;  %v1302_v50 = vrot.slane %v1178_v27, 7 }
 0x10b   :  { %6732 = vst [vmem:[#allocation6_spill] sm:$0xff] %v5276_v47  ;;  %v407_v51 = vcombine.high %v370_v45, %v370_v45  ;;  %v414_v52 = vrot.slane %v370_v45, %v5247_v49  ;;  %v4437_v53 = vadd.f32 %v4436_v2, %v4435_v63  ;;  %v4440_v54 = vadd.f32 %v4439_v24, %v4438_v19 }
 0x10c   :  { %v1195_v56 = vsel %vm580_vm0, %v1194_v38, %v1176_v16  ;;  %v1425_v57 = vrot.slane %v1418_v39, 6  ;;  %v1520_v58 = vrot.slane %v1177_v22, 1  ;;  %v4443_v59 = vadd.f32 %v4442_v35, %v4441_v29 }
 0x10d   :  { %v4444_v55 = vpop.f32.mrb[12].mxu0  ;;  %v421_v61 = vrot.slane %v407_v51, %v5247_v49  ;;  %v422_v62 = vcombine.high %v414_v52, %v414_v52  ;;  %v519_v0 = vpack.c.bf16 %v414_v52, %v414_v52  ;;  %v317_v1 = vadd.f32 %v4437_v53, %v5243_v43 }
 0x10e   :  { %v4445_v60 = vpop.f32.mrb[13].mxu0  ;;  %v5286_v4 = vsel %vm583_vm1, %v1302_v50, %v1301_v48  ;;  %v1424_v63 = vsel %vm580_vm0, %v1302_v50, %v1177_v22  ;;  %v322_v2 = vadd.f32 %v4440_v54, %v5243_v43  ;;  %v1522_v7 = vrot.slane %v1418_v39, 7 }
 0x10f   :  { %v5283_v3 = vpop.f32.mrb[14].mxu0  ;;  %6733 = vst [vmem:[#allocation7_spill] sm:$0xff] %v5286_v4  ;;  %v4446_v5 = vadd.f32 %v4445_v60, %v4444_v55  ;;  %v423_v8 = vcombine.high %v421_v61, %v421_v61  ;;  %v520_v9 = vpack.c.bf16 %v422_v62, %v422_v62  ;;  %v521_v10 = vpack.c.bf16 %v421_v61, %v421_v61 }
 0x110   :  { %v5290_v6 = vpop.f32.mrb[15].mxu0  ;;  %v1521_v12 = vsel %vm580_vm0, %v1178_v27, %v1520_v58  ;;  %v371_v13 = vmax.f32 %v317_v1, 0.0  ;;  %v372_v14 = vmax.f32 %v322_v2, 0.0  ;;  %v325_v15 = vadd.f32 %v4443_v59, %v5243_v43 }
 0x111   :  { %v5295_v16 = vsel %vm583_vm1, %v1196_v44, %v1195_v56  ;;  %v5298_v18 = vsel %vm583_vm1, %v1425_v57, %v1424_v63  ;;  %v5300_v19 = vunpack.c.l.b16 %v519_v0  ;;  %v5302_v20 = vunpack.c.l.b16 %v520_v9 }
 0x112   :  { %6734 = vst [vmem:[#allocation8_spill] sm:$0xff] %v5295_v16  ;;  %6735 = vst [vmem:[#allocation9_spill] sm:$0xff] %v5298_v18  ;;  %v5304_v21 = vunpack.c.l.b16 %v521_v10  ;;  %v784_v22 = vpack.c.bf16 %v423_v8, %v423_v8  ;;  %v1026_v23 = vcombine.high %v371_v13, %v371_v13  ;;  %v1033_v24 = vrot.slane %v371_v13, %v5247_v49 }
 0x113   :  { %v5308_v25 = vsel %vm583_vm1, %v1522_v7, %v1521_v12  ;;  %v1688_v26 = vrot.slane %v5302_v20, 7  ;;  %v424_v27 = vcombine.high %v372_v14, %v372_v14  ;;  %v431_v28 = vrot.slane %v372_v14, %v5247_v49 }
 0x114   :  { %6736 = vst [vmem:[#allocation10_spill] sm:$0xff] %v5308_v25  ;;  %v1040_v30 = vrot.slane %v1026_v23, %v5247_v49  ;;  %v1041_v31 = vcombine.high %v1033_v24, %v1033_v24  ;;  %v373_v32 = vmax.f32 %v325_v15, 0.0  ;;  %v5316_v35 = vsel %vm583_vm1, %v582_v17, %v581_v40 }
 0x115   :  { %v4450_v29 = vpop.f32.mrb[16].mxu0  ;;  %v1138_v36 = vpack.c.bf16 %v1033_v24, %v1033_v24  ;;  %v438_v37 = vrot.slane %v424_v27, %v5247_v49  ;;  %v439_v38 = vcombine.high %v431_v28, %v431_v28  ;;  %v330_v39 = vadd.f32 %v4446_v5, %v5243_v43 }
 0x116   :  { %v4451_v33 = vpop.f32.mrb[17].mxu0  ;;  %v5322_v45 = vunpack.c.l.b16 %v784_v22  ;;  %v1690_v48 = vrot.slane %v5304_v21, 6  ;;  %v1794_v50 = vrot.slane %v5300_v19, 1  ;;  %v1042_v51 = vcombine.high %v1040_v30, %v1040_v30 }
 0x117   :  { %v5320_v44 = vpop.f32.mrb[18].mxu0  ;;  %v1689_v11 = vsel %vm580_vm0, %v1688_v26, %v5300_v19  ;;  %v1139_v17 = vpack.c.bf16 %v1041_v31, %v1041_v31  ;;  %v1140_v40 = vpack.c.bf16 %v1040_v30, %v1040_v30  ;;  %v5330_v53 = vunpack.c.l.b16 %v1138_v36 }
 0x118   :  { %v5326_v52 = vpop.f32.mrb[19].mxu0  ;;  %v1402_v55 = vpack.c.bf16 %v1042_v51, %v1042_v51  ;;  %v522_v56 = vpack.c.bf16 %v431_v28, %v431_v28  ;;  %v523_v57 = vpack.c.bf16 %v439_v38, %v439_v38  ;;  %v440_v60 = vcombine.high %v438_v37, %v438_v37 }
 0x119   :  { %6737 = vst [vmem:[#allocation11_spill] sm:$0xff] %v5330_v53  ;;  %v5333_v58 = vunpack.c.l.b16 %v1139_v17  ;;  %v5335_v59 = vunpack.c.l.b16 %v1140_v40  ;;  %v524_v61 = vpack.c.bf16 %v438_v37, %v438_v37  ;;  %v5339_v0 = vsel %vm583_vm1, %v1690_v48, %v1689_v11 }
 0x11a   :  { %6739 = vst [vmem:[#allocation13_spill] sm:$0xff] %v5339_v0  ;;  %v5343_v1 = vsel %vm580_vm0, %v5302_v20, %v1794_v50  ;;  %v2276_v63 = vrot.slane %v5330_v53, 1  ;;  %v5349_v8 = vunpack.c.l.b16 %v1402_v55  ;;  %v5355_v13 = vunpack.c.l.b16 %v522_v56 }
 0x11b   :  { %6738 = vst [vmem:[#allocation12_spill] sm:$0xff] %v5333_v58  ;;  %6740 = vst [vmem:[#allocation14_spill] sm:$0xff] %v5343_v1  ;;  %v2170_v12 = vrot.slane %v5333_v58, 7  ;;  %v5357_v14 = vunpack.c.l.b16 %v523_v57  ;;  %v2172_v22 = vrot.slane %v5335_v59, 6  ;;  %v5362_v23 = vunpack.c.l.b16 %v524_v61 }
 0x11c   :  { %6741 = vst [vmem:[#allocation15_spill] sm:$0xff] %v5349_v8  ;;  %6742 = vst [vmem:[#allocation16_spill] sm:$0xff] %v5355_v13  ;;  %v785_v24 = vpack.c.bf16 %v440_v60, %v440_v60  ;;  %v1043_v26 = vcombine.high %v373_v32, %v373_v32  ;;  %v5368_v28 = vsel %vm580_vm0, %v5333_v58, %v2276_v63  ;;  %v374_v31 = vmax.f32 %v330_v39, 0.0 }
 0x11d   :  { %v5351_v9 = vpop.f32.mrb[20].mxu0  ;;  %v1050_v30 = vrot.slane %v373_v32, %v5247_v49  ;;  %v4449_v36 = vadd.f32 %v5290_v6, %v5283_v3  ;;  %v4452_v51 = vadd.f32 %v4451_v33, %v4450_v29  ;;  %v2171_v32 = vsel %vm580_vm0, %v2170_v12, %v5330_v53 }
 0x11e   :  { %v5359_v15 = vpop.f32.mrb[21].mxu0  ;;  %v1057_v50 = vrot.slane %v1043_v26, %v5247_v49  ;;  %v1623_v40 = vcombine.high %v374_v31, %v374_v31  ;;  %v1630_v55 = vrot.slane %v374_v31, %v5247_v49  ;;  %v5383_v56 = vunpack.c.l.b16 %v785_v24 }
 0x11f   :  { %v5364_v27 = vpop.f32.mrb[22].mxu0  ;;  %v1058_v17 = vcombine.high %v1050_v30, %v1050_v30  ;;  %v1141_v3 = vpack.c.bf16 %v1050_v30, %v1050_v30  ;;  %v333_v6 = vadd.f32 %v4449_v36, %v5243_v43  ;;  %v338_v26 = vadd.f32 %v4452_v51, %v5243_v43 }
 0x120   :  { %v5373_v37 = vpop.f32.mrb[23].mxu0  ;;  %v1059_v39 = vcombine.high %v1057_v50, %v1057_v50  ;;  %v1143_v57 = vpack.c.bf16 %v1057_v50, %v1057_v50  ;;  %v1637_v60 = vrot.slane %v1623_v40, %v5247_v49  ;;  %v1638_v61 = vcombine.high %v1630_v55, %v1630_v55 }
 0x121   :  { %v1142_v29 = vpack.c.bf16 %v1058_v17, %v1058_v17  ;;  %v1665_v33 = vpack.c.bf16 %v1630_v55, %v1630_v55  ;;  %v375_v63 = vmax.f32 %v333_v6, 0.0  ;;  %v5390_v31 = vsel %vm583_vm1, %v2172_v22, %v2171_v32 }
 0x122   :  { %6743 = vst [vmem:[#allocation17_spill] sm:$0xff] %v5390_v31  ;;  %v1639_v30 = vcombine.high %v1637_v60, %v1637_v60  ;;  %v5394_v50 = vunpack.c.l.b16 %v1141_v3  ;;  %v1403_v40 = vpack.c.bf16 %v1059_v39, %v1059_v39  ;;  %v1666_v2 = vpack.c.bf16 %v1638_v61, %v1638_v61 }
 0x123   :  { %v1667_v17 = vpack.c.bf16 %v1637_v60, %v1637_v60  ;;  %v2105_v51 = vcombine.high %v375_v63, %v375_v63  ;;  %v2112_v11 = vrot.slane %v375_v63, %v5247_v49  ;;  %v5402_v12 = vunpack.c.l.b16 %v1142_v29 }
 0x124   :  { %v1895_v6 = vpack.c.bf16 %v1639_v30, %v1639_v30  ;;  %v5404_v10 = vunpack.c.l.b16 %v1143_v57  ;;  %v5406_v7 = vunpack.c.l.b16 %v1665_v33  ;;  %v376_v3 = vmax.f32 %v338_v26, 0.0 }
 0x125   :  { %v5387_v38 = vpop.f32.mrb[24].mxu0  ;;  %v5408_v39 = vunpack.c.l.b16 %v1666_v2  ;;  %v2119_v60 = vrot.slane %v2105_v51, %v5247_v49  ;;  %v2120_v61 = vcombine.high %v2112_v11, %v2112_v11  ;;  %v2147_v30 = vpack.c.bf16 %v2112_v11, %v2112_v11 }
 0x126   :  { %v4463_v36 = vpop.f32.mrb[25].mxu0  ;;  %6744 = vst [vmem:[#allocation18_spill] sm:$0xff] %v5406_v7  ;;  %v5411_v48 = vunpack.c.l.b16 %v1403_v40  ;;  %v5415_v62 = vunpack.c.l.b16 %v1667_v17  ;;  %v5417_v29 = vunpack.c.l.b16 %v1895_v6  ;;  %v441_v26 = vcombine.high %v376_v3, %v376_v3 }
 0x127   :  { %v5396_v55 = vpop.f32.mrb[26].mxu0  ;;  %v2121_v57 = vcombine.high %v2119_v60, %v2119_v60  ;;  %v2148_v33 = vpack.c.bf16 %v2120_v61, %v2120_v61  ;;  %v2149_v54 = vpack.c.bf16 %v2119_v60, %v2119_v60  ;;  %v448_v51 = vrot.slane %v376_v3, %v5247_v49 }
 0x128   :  { %v5400_v32 = vpop.f32.mrb[27].mxu0  ;;  %6745 = vst [vmem:[#allocation19_spill] sm:$0xff] %v5411_v48  ;;  %v4455_v11 = vadd.f32 %v5326_v52, %v5320_v44  ;;  %v5427_v5 = vunpack.c.l.b16 %v2147_v30  ;;  %v455_v3 = vrot.slane %v441_v26, %v5247_v49  ;;  %v4464_v26 = vadd.f32 %v4463_v36, %v5387_v38 }
 0x129   :  { %v2377_v6 = vpack.c.bf16 %v2121_v57, %v2121_v57  ;;  %v456_v2 = vcombine.high %v448_v51, %v448_v51  ;;  %v5438_v63 = vunpack.c.l.b16 %v2148_v33  ;;  %v5440_v30 = vunpack.c.l.b16 %v2149_v54 }
 0x12a   :  { %v457_v17 = vcombine.high %v455_v3, %v455_v3  ;;  %v525_v42 = vpack.c.bf16 %v448_v51, %v448_v51  ;;  %v527_v1 = vpack.c.bf16 %v455_v3, %v455_v3  ;;  %v341_v44 = vadd.f32 %v4455_v11, %v5243_v43 }
 0x12b   :  { %6746 = vst [vmem:[#allocation20_spill] sm:$0xff] %v5438_v63  ;;  %v526_v60 = vpack.c.bf16 %v456_v2, %v456_v2  ;;  %v5446_v31 = vunpack.c.l.b16 %v2377_v6  ;;  %v4458_v54 = vadd.f32 %v5359_v15, %v5351_v9  ;;  %v4461_v2 = vadd.f32 %v5373_v37, %v5364_v27 }
 0x12c   :  { %v570_v7 = vunpack.c.l.b16 %v525_v42  ;;  %v786_v33 = vpack.c.bf16 %v457_v17, %v457_v17  ;;  %v5453_v0 = vunpack.c.l.b16 %v527_v1  ;;  %v377_v51 = vmax.f32 %v341_v44, 0.0 }
 0x12d   :  { %v5423_v40 = vpop.f32.mrb[28].mxu0  ;;  %6747 = vst [vmem:[#allocation21_spill] sm:$0xff] %v5446_v31  ;;  %v5449_v52 = vunpack.c.l.b16 %v526_v60  ;;  %v1534_v38 = vrot.slane %v5411_v48, 1  ;;  %v6748_v36 = vrot.slane %v5362_v23, 1  ;;  %v346_v60 = vadd.f32 %v4458_v54, %v5243_v43 }
 0x12e   :  { %v5429_v22 = vpop.f32.mrb[29].mxu0  ;;  %v699_v11 = vrot.slane %v570_v7, 7  ;;  %v1060_v37 = vcombine.high %v377_v51, %v377_v51  ;;  %v803_v1 = vunpack.c.l.b16 %v786_v33  ;;  %v918_v17 = vrot.slane %v5453_v0, 7 }
 0x12f   :  { %v5434_v24 = vpop.f32.mrb[30].mxu0  ;;  %v6699_v42 = vrot.slane %v5449_v52, 7  ;;  %v701_v9 = vrot.slane %v5449_v52, 6  ;;  %v5472_v44 = vsel %vm580_vm0, %v570_v7, %v6748_v36  ;;  %v6749_v36 = vrot.slane %v5383_v56, 1 }
 0x130   :  { %v5442_v57 = vpop.f32.mrb[31].mxu0  ;;  %v700_v27 = vsel %vm580_vm0, %v699_v11, %v5362_v23  ;;  %v1067_v11 = vrot.slane %v377_v51, %v5247_v49  ;;  %v1074_v3 = vrot.slane %v1060_v37, %v5247_v49  ;;  %v349_v61 = vadd.f32 %v4461_v2, %v5243_v43 }
 0x131   :  { %v815_v15 = vsel %vm580_vm0, %v6699_v42, %v5383_v56  ;;  %v5484_v7 = vsel %vm583_vm1, %v701_v9, %v700_v27  ;;  %v917_v33 = vsel %vm580_vm0, %v5449_v52, %v6749_v36  ;;  %v6750_v37 = vrot.slane %v5453_v0, 6 }
 0x132   :  { %v1075_v42 = vcombine.high %v1067_v11, %v1067_v11  ;;  %v1076_v6 = vcombine.high %v1074_v3, %v1074_v3  ;;  %v1144_v51 = vpack.c.bf16 %v1067_v11, %v1067_v11  ;;  %v1146_v25 = vpack.c.bf16 %v1074_v3, %v1074_v3 }
 0x133   :  { %v816_v54 = vsel %vm583_vm1, %v6750_v37, %v815_v15  ;;  %v378_v18 = vmax.f32 %v346_v60, 0.0  ;;  %v379_v9 = vmax.f32 %v349_v61, 0.0  ;;  %v5497_v27 = vadd.f32 %v5400_v32, %v5396_v55 }
 0x134   :  { %v1145_v4 = vpack.c.bf16 %v1075_v42, %v1075_v42  ;;  %v1185_v36 = vunpack.c.l.b16 %v1144_v51  ;;  %v5499_v53 = vunpack.c.l.b16 %v1146_v25  ;;  %v1404_v16 = vpack.c.bf16 %v1076_v6, %v1076_v6 }
 0x135   :  { %v817_v2 = vrot.slane %v803_v1, 5  ;;  %v920_v31 = vrot.slane %v803_v1, 6  ;;  %v458_v8 = vcombine.high %v378_v18, %v378_v18  ;;  %v465_v3 = vrot.slane %v378_v18, %v5247_v49 }
 0x136   :  { %6751 = vst [vmem:[#allocation22_spill] sm:$0xff] %v5499_v53  ;;  %v919_v11 = vsel %vm583_vm1, %v918_v17, %v917_v33  ;;  %v1186_v58 = vunpack.c.l.b16 %v1145_v4  ;;  %v1077_v15 = vcombine.high %v379_v9, %v379_v9  ;;  %v354_v61 = vadd.f32 %v4464_v26, %v5243_v43 }
 0x137   :  { %v1318_v60 = vrot.slane %v5499_v53, 6  ;;  %v1421_v55 = vunpack.c.l.b16 %v1404_v16  ;;  %v1536_v32 = vrot.slane %v5499_v53, 7  ;;  %v472_v25 = vrot.slane %v458_v8, %v5247_v49 }
 0x138   :  { %v1208_v42 = vrot.slane %v1185_v36, 7  ;;  %v1316_v6 = vrot.slane %v1186_v58, 7  ;;  %v1535_v1 = vsel %vm580_vm0, %v1186_v58, %v1534_v38  ;;  %v1084_v51 = vrot.slane %v379_v9, %v5247_v49 }
 0x139   :  { %v1435_v18 = vrot.slane %v1421_v55, 5  ;;  %v1537_v17 = vsel %vm583_vm1, %v1536_v32, %v1535_v1  ;;  %v1538_v4 = vrot.slane %v1421_v55, 6  ;;  %v473_v33 = vcombine.high %v465_v3, %v465_v3 }
 0x13a   :  { %v5511_v26 = vsel %vm586_vm2, %v817_v2, %v816_v54  ;;  %v1433_v16 = vsel %vm580_vm0, %v1316_v6, %v5411_v48  ;;  %v474_v37 = vcombine.high %v472_v25, %v472_v25  ;;  %v380_v47 = vmax.f32 %v354_v61, 0.0 }
 0x13b   :  { %v5516_v8 = vsel %vm586_vm2, %v920_v31, %v919_v11  ;;  %v1434_v38 = vsel %vm583_vm1, %v1318_v60, %v1433_v16  ;;  %v5520_v9 = vsel %vm586_vm2, %v1538_v4, %v1537_v17  ;;  %v528_v63 = vpack.c.bf16 %v465_v3, %v465_v3 }
 0x13c   :  { %6752 = vst [vmem:[#allocation23_spill] sm:$0xff] %v5520_v9  ;;  %v6753_v55 = vrot.slane %v5404_v10, 1  ;;  %v5526_v54 = vsel %vm586_vm2, %v1435_v18, %v1434_v38  ;;  %v529_v2 = vpack.c.bf16 %v473_v33, %v473_v33  ;;  %v787_v1 = vpack.c.bf16 %v474_v37, %v474_v37 }
 0x13d   :  { %6754 = vst [vmem:[#allocation24_spill] sm:$0xff] %v5526_v54  ;;  %v1209_v61 = vsel %vm580_vm0, %v1208_v42, %v5404_v10  ;;  %v5530_v31 = vunpack.c.l.b16 %v528_v63  ;;  %v1091_v11 = vrot.slane %v1077_v15, %v5247_v49  ;;  %v1092_v16 = vcombine.high %v1084_v51, %v1084_v51 }
 0x13e   :  { %v1315_v32 = vsel %vm580_vm0, %v1185_v36, %v6753_v55  ;;  %v1210_v17 = vrot.slane %v1186_v58, 6  ;;  %v5533_v4 = vunpack.c.l.b16 %v529_v2  ;;  %v1147_v3 = vpack.c.bf16 %v1084_v51, %v1084_v51 }
 0x13f   :  { %v475_v9 = vcombine.high %v380_v47, %v380_v47  ;;  %v530_v48 = vpack.c.bf16 %v472_v25, %v472_v25  ;;  %v1702_v36 = vrot.slane %v5530_v31, 7  ;;  %v6755_v18 = vrot.slane %v5415_v62, 1 }
 0x140   :  { %v1093_v37 = vcombine.high %v1091_v11, %v1091_v11  ;;  %v1317_v63 = vsel %vm583_vm1, %v1316_v6, %v1315_v32  ;;  %v5541_v42 = vunpack.c.l.b16 %v787_v1  ;;  %v6712_v15 = vrot.slane %v5533_v4, 7 }
 0x141   :  { %v1809_v33 = vsel %vm580_vm0, %v5530_v31, %v6755_v18  ;;  %v1148_v58 = vpack.c.bf16 %v1092_v16, %v1092_v16  ;;  %v5547_v25 = vsel %vm580_vm0, %v1702_v36, %v5415_v62  ;;  %v1149_v51 = vpack.c.bf16 %v1091_v11, %v1091_v11 }
 0x142   :  { %6756 = vst [vmem:[#allocation25_spill] sm:$0xff] %v5547_v25  ;;  %v1405_v55 = vpack.c.bf16 %v1093_v37, %v1093_v37  ;;  %v5549_v2 = vunpack.c.l.b16 %v1147_v3  ;;  %v482_v18 = vrot.slane %v380_v47, %v5247_v49  ;;  %v489_v6 = vrot.slane %v475_v9, %v5247_v49 }
 0x143   :  { %v5551_v54 = vunpack.c.l.b16 %v1148_v58  ;;  %v5556_v32 = vsel %vm583_vm1, %v1210_v17, %v1209_v61  ;;  %v5559_v1 = vsel %vm586_vm2, %v1318_v60, %v1317_v63  ;;  %v5561_v16 = vunpack.c.l.b16 %v530_v48 }
 0x144   :  { %6757 = vst [vmem:[#allocation26_spill] sm:$0xff] %v5549_v2  ;;  %6758 = vst [vmem:[#allocation27_spill] sm:$0xff] %v5556_v32  ;;  %v5567_v11 = vsel %vm583_vm1, %v6712_v15, %v1809_v33  ;;  %v490_v9 = vcombine.high %v482_v18, %v482_v18  ;;  %v5571_v37 = vunpack.c.l.b16 %v1149_v51  ;;  %v5573_v61 = vunpack.c.l.b16 %v1405_v55 }
 0x145   :  { %6759 = vst [vmem:[#allocation28_spill] sm:$0xff] %v5559_v1  ;;  %6760 = vst [vmem:[#allocation29_spill] sm:$0xff] %v5567_v11  ;;  %v491_v60 = vcombine.high %v489_v6, %v489_v6  ;;  %v531_v17 = vpack.c.bf16 %v482_v18, %v482_v18  ;;  %v2184_v58 = vrot.slane %v5549_v2, 7  ;;  %v6713_v33 = vrot.slane %v5551_v54, 7 }
 0x146   :  { %6761 = vst [vmem:[#allocation30_spill] sm:$0xff] %v5573_v61  ;;  %v532_v15 = vpack.c.bf16 %v490_v9, %v490_v9  ;;  %v533_v3 = vpack.c.bf16 %v489_v6, %v489_v6  ;;  %v357_v38 = vadd.f32 %v5497_v27, %v5243_v43  ;;  %v4470_v51 = vadd.f32 %v5429_v22, %v5423_v40 }
 0x147   :  { %v5583_v55 = vunpack.c.l.b16 %v531_v17  ;;  %v788_v18 = vpack.c.bf16 %v491_v60, %v491_v60  ;;  %v4473_v48 = vadd.f32 %v5442_v57, %v5434_v24  ;;  %v6762_v63 = vrot.slane %v5300_v19, 6 }
 0x148   :  { %v6763_v9 = vrot.slane %v5440_v30, 1  ;;  %v381_v40 = vmax.f32 %v357_v38, 0.0  ;;  %v5599_v60 = vsel %vm580_vm0, %v2184_v58, %v5440_v30  ;;  %v5608_v17 = vunpack.c.l.b16 %v532_v15 }
 0x149   :  { %v587_v47 = vsel %vm586_vm2, %v6762_v63, %v5316_v35  ;;  %6764 = vst [vmem:[#allocation31_spill] sm:$0xff] %v5599_v60  ;;  %v362_v35 = vadd.f32 %v4470_v51, %v5243_v43  ;;  %v365_v57 = vadd.f32 %v4473_v48, %v5243_v43  ;;  %v5610_v63 = vunpack.c.l.b16 %v533_v3 }
 0x14a   :  { %v2291_v6 = vsel %vm580_vm0, %v5549_v2, %v6763_v9  ;;  %v1094_v9 = vcombine.high %v381_v40, %v381_v40  ;;  %v1101_v38 = vrot.slane %v381_v40, %v5247_v49  ;;  %v5613_v27 = vunpack.c.l.b16 %v788_v18 }
 0x14b   :  { %v5604_v24 = vsel %vm583_vm1, %v6713_v33, %v2291_v6  ;;  %v382_v22 = vmax.f32 %v362_v35, 0.0  ;;  %v383_v36 = vmax.f32 %v365_v57, 0.0  ;;  %v594_v35 = vrot.slane %v5355_v13, 3 }
 0x14c   :  { %v1108_v51 = vrot.slane %v1094_v9, %v5247_v49  ;;  %v1109_v33 = vcombine.high %v1101_v38, %v1101_v38  ;;  %v1150_v15 = vpack.c.bf16 %v1101_v38, %v1101_v38 }
 0x14d   :  { %v1640_v48 = vcombine.high %v382_v22, %v382_v22  ;;  %v1647_v3 = vrot.slane %v382_v22, %v5247_v49  ;;  %v2122_v60 = vcombine.high %v383_v36, %v383_v36  ;;  %v2129_v18 = vrot.slane %v383_v36, %v5247_v49 }
 0x14e   :  { %v1110_v40 = vcombine.high %v1108_v51, %v1108_v51  ;;  %v1151_v43 = vpack.c.bf16 %v1109_v33, %v1109_v33  ;;  %v1152_v38 = vpack.c.bf16 %v1108_v51, %v1108_v51  ;;  %v6765_v22 = vrot.slane %v5302_v20, 5 }
 0x14f   :  { %v1654_v57 = vrot.slane %v1640_v48, %v5247_v49  ;;  %v1655_v6 = vcombine.high %v1647_v3, %v1647_v3  ;;  %v1668_v9 = vpack.c.bf16 %v1647_v3, %v1647_v3  ;;  %v2136_v25 = vrot.slane %v2122_v60, %v5247_v49 }
 0x150   :  { %v590_v1 = vsel %vm589_vm3, %v6765_v22, %v587_v47  ;;  %v5629_v36 = vunpack.c.l.b16 %v1150_v15  ;;  %v1406_v32 = vpack.c.bf16 %v1110_v40, %v1110_v40  ;;  %v2137_v3 = vcombine.high %v2129_v18, %v2129_v18 }
 0x151   :  { %v1656_v58 = vcombine.high %v1654_v57, %v1654_v57  ;;  %v1669_v2 = vpack.c.bf16 %v1655_v6, %v1655_v6  ;;  %v1670_v53 = vpack.c.bf16 %v1654_v57, %v1654_v57  ;;  %v5631_v48 = vunpack.c.l.b16 %v1668_v9 }
 0x152   :  { %v6766_v33 = vrot.slane %v5449_v52, 7  ;;  %v2150_v22 = vpack.c.bf16 %v2129_v18, %v2129_v18  ;;  %v5641_v15 = vunpack.c.l.b16 %v1151_v43  ;;  %v2151_v11 = vpack.c.bf16 %v2137_v3, %v2137_v3 }
 0x153   :  { %v5637_v49 = vunpack.c.l.b16 %v1669_v2  ;;  %v5639_v60 = vunpack.c.l.b16 %v1670_v53  ;;  %v1896_v47 = vpack.c.bf16 %v1656_v58, %v1656_v58  ;;  %v2152_v6 = vpack.c.bf16 %v2136_v25, %v2136_v25 }
 0x154   :  { %v603_v51 = vsel %vm583_vm1, %v6766_v33, %v5472_v44  ;;  %v6768_v40 = vrot.slane %v5304_v21, 4  ;;  %v5646_v9 = vunpack.c.l.b16 %v1152_v38  ;;  %v5652_v53 = vunpack.c.l.b16 %v1406_v32 }
 0x155   :  { %6767 = vst [vmem:[#allocation32_spill] sm:$0xff] %v5639_v60  ;;  %v5649_v61 = vunpack.c.l.b16 %v1896_v47  ;;  %v2030_v44 = vrot.slane %v5639_v60, 1  ;;  %v5655_v58 = vunpack.c.l.b16 %v2150_v22  ;;  %v5657_v43 = vunpack.c.l.b16 %v2151_v11 }
 0x156   :  { %v593_v57 = vsel %vm592_vm4, %v6768_v40, %v590_v1  ;;  %v5665_v3 = vcombine.high %v2136_v25, %v2136_v25  ;;  %v5669_v33 = vunpack.c.l.b16 %v2152_v6  ;;  %v6771_v11 = vrot.slane %v5453_v0, 6 }
 0x157   :  { %6769 = vst [vmem:[#allocation33_spill] sm:$0xff] %v5649_v61  ;;  %v5663_v38 = vsel %vm580_vm0, %v5649_v61, %v2030_v44  ;;  %v596_v47 = vsel %vm595_vm5, %v594_v35, %v593_v57  ;;  %v606_v25 = vrot.slane %v5530_v31, 5  ;;  %v608_v18 = vrot.slane %v5533_v4, 4 }
 0x158   :  { %6770 = vst [vmem:[#allocation34_spill] sm:$0xff] %v5665_v3  ;;  %v605_v22 = vsel %vm586_vm2, %v6771_v11, %v603_v51  ;;  %v612_v6 = vrot.slane %v5583_v55, 2  ;;  %v6719_v35 = vrot.slane %v5608_v17, 1  ;;  %v6772_v57 = vrot.slane %v5357_v14, 2 }
 0x159   :  { %v607_v11 = vsel %vm589_vm3, %v606_v25, %v605_v22  ;;  %v6773_v52 = vrot.slane %v5300_v19, 5  ;;  %v691_v40 = vrot.slane %v5302_v20, 4  ;;  %v693_v32 = vrot.slane %v5304_v21, 3 }
 0x15a   :  { %v599_v51 = vsel %vm598_vm6, %v6772_v57, %v596_v47  ;;  %v609_v2 = vsel %vm592_vm4, %v608_v18, %v607_v11  ;;  %v615_v1 = vsel %vm580_vm0, %v5610_v63, %v6719_v35  ;;  %v695_v47 = vrot.slane %v5355_v13, 2 }
 0x15b   :  { %v690_v44 = vsel %vm586_vm2, %v6773_v52, %v5270_v41  ;;  %v6774_v22 = vrot.slane %v5561_v16, 3  ;;  %v617_v19 = vpack.c.b16 %v615_v1, %v615_v1  ;;  %v697_v52 = vrot.slane %v5357_v14, 1 }
 0x15c   :  { %v692_v41 = vsel %vm589_vm3, %v691_v40, %v690_v44  ;;  %v6775_v35 = vrot.slane %v5453_v0, 5  ;;  %v707_v60 = vrot.slane %v5533_v4, 3  ;;  %v709_v40 = vrot.slane %v5561_v16, 2  ;;  %v4913_v0 = vld [vmem:[%s6686_s3 + $0x8] sm:$0xff]  }
 0x15d   :  { %v611_v25 = vsel %vm595_vm5, %v6774_v22, %v609_v2  ;;  %v694_v11 = vsel %vm592_vm4, %v693_v32, %v692_v41  ;;  %v6776_v2 = vrot.slane %v5530_v31, 4  ;;  %v2014_v22 = vrot.slane %v5415_v62, 2 }
 0x15e   :  { %v613_v57 = vsel %vm598_vm6, %v612_v6, %v611_v25  ;;  %v704_v61 = vsel %vm586_vm2, %v6775_v35, %v5484_v7  ;;  %v696_v3 = vsel %vm595_vm5, %v695_v47, %v694_v11  ;;  %v711_v6 = vrot.slane %v5583_v55, 1 }
 0x15f   :  { %v616_v13 = vpack.c.b16 %v613_v57, %v599_v51  ;;  %v706_v1 = vsel %vm589_vm3, %v6776_v2, %v704_v61  ;;  %v698_v44 = vsel %vm598_vm6, %v697_v52, %v696_v3  ;;  %v713_v7 = vrot.slane %v5610_v63, 7  ;;  %v4915_v57 = vld [vmem:[%s6686_s3 + $0x20] sm:$0xff]  }
 0x160   :  { %v708_v32 = vsel %vm592_vm4, %v707_v60, %v706_v1  ;;  %v2002_v61 = vrot.slane %v5302_v20, 1  ;;  %v2006_v35 = vrot.slane %v5357_v14, 6  ;;  %v2008_v3 = vrot.slane %v5362_v23, 5 }
 0x161   :  { %4631 = vmatprep.mubr.msk.bf16.mxu1 %vm630_vm7, %v616_v13  ;;  %v710_v31 = vsel %vm595_vm5, %v709_v40, %v708_v32  ;;  %v714_v51 = vsel %vm580_vm0, %v713_v7, %v5608_v17  ;;  %v2010_v47 = vrot.slane %v5383_v56, 4  ;;  %v6777_v52 = vrot.slane %v5417_v29, 1 }
 0x162   :  { %4632 = vmatmul.mubr.msk.bf16.vlgmr.msra.gmra.mrb[0].mxu1 %vm630_vm7, %v617_v19  ;;  %v712_v60 = vsel %vm598_vm6, %v711_v6, %v710_v31  ;;  %v716_v25 = vpack.c.b16 %v714_v51, %v714_v51  ;;  %v2003_v41 = vsel %vm580_vm0, %v5304_v21, %v2002_v61  ;;  %v6778_v11 = vrot.slane %v5322_v45, 7 }
 0x163   :  { %4636 = vmatpush3.bf16.msra.mxu1 %v5229_v34  ;;  %v715_v13 = vpack.c.b16 %v712_v60, %v698_v44  ;;  %v2017_v19 = vsel %vm580_vm0, %v5533_v4, %v6777_v52  ;;  %v2018_v34 = vrot.slane %v5561_v16, 7  ;;  %v2022_v1 = vrot.slane %v5608_v17, 5 }
 0x164   :  { %4637 = vmatprep.subr.bf16.mxu1 %v4913_v0  ;;  %v2005_v2 = vsel %vm583_vm1, %v6778_v11, %v2003_v41  ;;  %v2024_v40 = vrot.slane %v5610_v63, 4  ;;  %v2026_v32 = vrot.slane %v5613_v27, 3  ;;  %v6779_v6 = vrot.slane %v5302_v20, 5 }
 0x165   :  { %4639 = vmatprep.mubr.msk.bf16.mxu1 %vm630_vm7, %v715_v13  ;;  %v2007_v44 = vsel %vm586_vm2, %v2006_v35, %v2005_v2  ;;  %v811_v31 = vrot.slane %v5322_v45, 3  ;;  %v2019_v60 = vsel %vm583_vm1, %v2018_v34, %v2017_v19  ;;  %v6780_v51 = vrot.slane %v5304_v21, 4 }
 0x166   :  { %v809_v7 = vsel %vm586_vm2, %v6779_v6, %v5273_v46  ;;  %v2009_v61 = vsel %vm589_vm3, %v2008_v3, %v2007_v44  ;;  %v819_v35 = vsel %vm589_vm3, %v608_v18, %v5511_v26  ;;  %v6781_v52 = vrot.slane %v5541_v42, 6  ;;  %v4917_v44 = vld [vmem:[%s6686_s3 + $0x28] sm:$0xff]  }
 0x167   :  { %v810_v41 = vsel %vm589_vm3, %v6780_v51, %v809_v7  ;;  %4638 = vmatpush3.bf16.msra.mxu1 %v4913_v0  ;;  %v2011_v13 = vsel %vm592_vm4, %v2010_v47, %v2009_v61  ;;  %v6782_v3 = vrot.slane %v5561_v16, 3  ;;  %v6783_v2 = vrot.slane %v5408_v39, 3 }
 0x168   :  { %v2021_v46 = vsel %vm586_vm2, %v6781_v52, %v2019_v60  ;;  %v812_v11 = vsel %vm592_vm4, %v811_v31, %v810_v41  ;;  %4643 = vmatprep.subr.bf16.mxu1 %v4915_v57  ;;  %v6784_v18 = vrot.slane %v5357_v14, 2  ;;  %v821_v47 = vrot.slane %v5541_v42, 2 }
 0x169   :  { %v820_v19 = vsel %vm592_vm4, %v6782_v3, %v819_v35  ;;  %v2013_v34 = vsel %vm595_vm5, %v6783_v2, %v2011_v13  ;;  %v2023_v26 = vsel %vm589_vm3, %v2022_v1, %v2021_v46  ;;  %v6785_v31 = vrot.slane %v5362_v23, 1  ;;  %v4919_v2 = vld [vmem:[%s6686_s3 + $0x30] sm:$0xff]  }
 0x16a   :  { %v813_v0 = vsel %vm595_vm5, %v6784_v18, %v812_v11  ;;  %v2015_v6 = vsel %vm598_vm6, %v2014_v22, %v2013_v34  ;;  %v2025_v7 = vsel %vm592_vm4, %v2024_v40, %v2023_v26  ;;  %v6730_v1 = vrot.slane %v5335_v59, 7  ;;  %4640 = vmatmul.mubr.msk.bf16.vlgmr.msra.gmra.mrb[4].mxu1 %vm630_vm7, %v716_v25  ;;  %v4918_v18 = vld [vmem:[%s6686_s3 + $0xd8] sm:$0xff]  }
 0x16b   :  { %v814_v61 = vsel %vm598_vm6, %v6785_v31, %v813_v0  ;;  %v2027_v60 = vsel %vm595_vm5, %v2026_v32, %v2025_v7  ;;  %v822_v51 = vsel %vm595_vm5, %v821_v47, %v820_v19  ;;  %v6729_v41 = vrot.slane %v5402_v12, 5  ;;  %4644 = vmatpush3.bf16.msra.mxu1 %v4915_v57 }
 0x16c   :  { %v6727_v35 = vrot.slane %v5404_v10, 4  ;;  %v6786_v22 = vrot.slane %v5637_v49, 2  ;;  %v6787_v13 = vrot.slane %v5608_v17, 1  ;;  %v2279_v25 = vsel %vm583_vm1, %v6730_v1, %v5368_v28  ;;  %4645 = vmatprep.subr.bf16.mxu1 %v4917_v44 }
 0x16d   :  { %v6728_v32 = vrot.slane %v5571_v37, 6  ;;  %v6788_v3 = vrot.slane %v5394_v50, 6  ;;  %v6726_v19 = vrot.slane %v5641_v15, 4  ;;  %v6725_v26 = vrot.slane %v5646_v9, 3 }
 0x16e   :  { %v2029_v40 = vsel %vm598_vm6, %v6786_v22, %v2027_v60  ;;  %v823_v52 = vsel %vm598_vm6, %v6787_v13, %v822_v51  ;;  %v824_v0 = vrot.slane %v5613_v27, 7  ;;  %v906_v7 = vrot.slane %v5302_v20, 6 }
 0x16f   :  { %v2032_v46 = vpack.c.b16 %v2029_v40, %v2015_v6  ;;  %v826_v11 = vpack.c.b16 %v823_v52, %v814_v61  ;;  %v2281_v57 = vsel %vm586_vm2, %v6788_v3, %v2279_v25  ;;  %v2295_v28 = vsel %vm586_vm2, %v6728_v32, %v5604_v24  ;;  %4646 = vmatpush3.bf16.msra.mxu1 %v4917_v44  ;;  %v6792_v52 = vld [vmem:[#allocation20_spill] sm:$0xff]  ;;  %v4922_v32 = vld [vmem:[%s6686_s3 + $0x48] sm:$0xff]  }
 0x170   :  { %v2283_v34 = vsel %vm589_vm3, %v6729_v41, %v2281_v57  ;;  %v6789_v6 = vrot.slane %v5629_v36, 5  ;;  %v908_v31 = vrot.slane %v5304_v21, 5  ;;  %v6790_v61 = vpack.c.b16 %v5663_v38, %v5663_v38  ;;  %v5033_v38 = vld [vmem:[%s6686_s3 + $0xd0] sm:$0xff]   ;;  %4651 = vmatprep.subr.bf16.mxu1 %v4919_v2 }
 0x171   :  { %4719 = vmatprep.mubr.msk.bf16.mxu0 %vm630_vm7, %v2032_v46  ;;  %4647 = vmatprep.mubr.msk.bf16.mxu1 %vm630_vm7, %v826_v11  ;;  %v2285_v47 = vsel %vm592_vm4, %v6727_v35, %v2283_v34  ;;  %v6791_v60 = vrot.slane %v5427_v5, 3  ;;  %v825_v40 = vsel %vm580_vm0, %v824_v0, %v5610_v63  ;;  %v910_v13 = vrot.slane %v5322_v45, 4 }
 0x172   :  { %v2297_v24 = vsel %vm589_vm3, %v6789_v6, %v2295_v28  ;;  %4720 = vmatmul.mubr.msk.bf16.vlgmr.msra.gmra.mrb[32].mxu0 %vm630_vm7, %v6790_v61  ;;  %v6793_v25 = vrot.slane %v6792_v52, 2  ;;  %v827_v44 = vpack.c.b16 %v825_v40, %v825_v40  ;;  %v912_v3 = vrot.slane %v5357_v14, 3  ;;  %v6795_v28 = vld [vmem:[#allocation6_spill] sm:$0xff] }
 0x173   :  { %v2287_v51 = vsel %vm595_vm5, %v6791_v60, %v2285_v47  ;;  %v2299_v22 = vsel %vm592_vm4, %v6726_v19, %v2297_v24  ;;  %4732 = vmatpush3.bf16.msra.mxu0 %v5033_v38  ;;  %v6794_v57 = vrot.slane %v5655_v58, 2  ;;  %v907_v0 = vsel %vm586_vm2, %v906_v7, %v6795_v28  ;;  %v4920_v24 = vld [vmem:[%s6686_s3 + $0x38] sm:$0xff]   ;;  %v4929_v61 = vld [vmem:[%s6686_s3 + $0xf0] sm:$0xff]  }
 0x174   :  { %v2289_v46 = vsel %vm598_vm6, %v6793_v25, %v2287_v51  ;;  %v2301_v11 = vsel %vm595_vm5, %v6725_v26, %v2299_v22  ;;  %4733 = vmatprep.subr.bf16.mxu0 %v4918_v18  ;;  %v914_v47 = vrot.slane %v5362_v23, 2  ;;  %v922_v6 = vrot.slane %v5533_v4, 5  ;;  %4648 = vmatmul.mubr.msk.bf16.vlgmr.msra.gmra.mrb[8].mxu1 %vm630_vm7, %v827_v44  ;;  %v6806_v19 = vld [vmem:[#allocation30_spill] sm:$0xff] }
 0x175   :  { %v2303_v34 = vsel %vm598_vm6, %v6794_v57, %v2301_v11  ;;  %v909_v51 = vsel %vm589_vm3, %v908_v31, %v907_v0  ;;  %v924_v22 = vrot.slane %v5561_v16, 4  ;;  %v926_v7 = vrot.slane %v5541_v42, 3  ;;  %4652 = vmatpush3.bf16.msra.mxu1 %v4919_v2  ;;  %v6797_v57 = vld [vmem:[#allocation12_spill] sm:$0xff] }
 0x176   :  { %v2306_v60 = vpack.c.b16 %v2303_v34, %v2289_v46  ;;  %v911_v40 = vsel %vm592_vm4, %v910_v13, %v909_v51  ;;  %v923_v38 = vsel %vm589_vm3, %v922_v6, %v5516_v8  ;;  %v928_v25 = vrot.slane %v5608_v17, 2  ;;  %v4921_v8 = vld [vmem:[%s6686_s3 + $0x40] sm:$0xff]   ;;  %4653 = vmatprep.subr.bf16.mxu1 %v4920_v24  ;;  %v6798_v51 = vld [vmem:[#allocation19_spill] sm:$0xff] }
 0x177   :  { %v6796_v11 = vrot.slane %v5657_v43, 1  ;;  %4734 = vmatpush3.bf16.msra.mxu0 %v4918_v18  ;;  %v913_v31 = vsel %vm595_vm5, %v912_v3, %v911_v40  ;;  %v925_v44 = vsel %vm592_vm4, %v924_v22, %v923_v38  ;;  %v2484_v13 = vrot.slane %v6797_v57, 1  ;;  %v4931_v18 = vld [vmem:[%s6686_s3 + $0xf8] sm:$0xff]  }
 0x178   :  { %4735 = vmatprep.mubr.msk.bf16.mxu0 %vm630_vm7, %v2306_v60  ;;  %v915_v34 = vsel %vm598_vm6, %v914_v47, %v913_v31  ;;  %v927_v28 = vsel %vm595_vm5, %v926_v7, %v925_v44  ;;  %v2488_v0 = vrot.slane %v5402_v12, 6  ;;  %v2490_v6 = vrot.slane %v5404_v10, 5  ;;  %4747 = vmatprep.subr.bf16.mxu0 %v4929_v61  ;;  %v6799_v40 = vld [vmem:[#allocation15_spill] sm:$0xff] }
 0x179   :  { %v2305_v46 = vsel %vm580_vm0, %v5669_v33, %v6796_v11  ;;  %v929_v3 = vsel %vm598_vm6, %v928_v25, %v927_v28  ;;  %v2485_v60 = vsel %vm580_vm0, %v5335_v59, %v2484_v13  ;;  %v2492_v22 = vrot.slane %v6798_v51, 4  ;;  %4654 = vmatpush3.bf16.msra.mxu1 %v4920_v24  ;;  %v6804_v24 = vld [vmem:[#allocation11_spill] sm:$0xff] }
 0x17a   :  { %v2307_v2 = vpack.c.b16 %v2305_v46, %v2305_v46  ;;  %v2496_v47 = vrot.slane %v5440_v30, 2  ;;  %v932_v7 = vpack.c.b16 %v929_v3, %v915_v34  ;;  %v6800_v38 = vrot.slane %v6799_v40, 7  ;;  %v6801_v46 = vld [vmem:[#allocation21_spill] sm:$0xff]  ;;  %4659 = vmatprep.subr.bf16.mxu1 %v4921_v8 }
 0x17b   :  { %v6802_v31 = vrot.slane %v6801_v46, 1  ;;  %v2500_v25 = vrot.slane %v5571_v37, 7  ;;  %v2504_v28 = vrot.slane %v5641_v15, 5  ;;  %v2506_v34 = vrot.slane %v5646_v9, 4 }
 0x17c   :  { %4736 = vmatmul.mubr.msk.bf16.vlgmr.msra.gmra.mrb[36].mxu0 %vm630_vm7, %v2307_v2  ;;  %v2487_v11 = vsel %vm583_vm1, %v6800_v38, %v2485_v60  ;;  %v2508_v2 = vrot.slane %v5652_v53, 3  ;;  %4655 = vmatprep.mubr.msk.bf16.mxu1 %vm630_vm7, %v932_v7  ;;  %v930_v38 = vrot.slane %v5610_v63, 1  ;;  %v6805_v26 = vrot.slane %v6804_v24, 5 }
 0x17d   :  { %v2499_v44 = vsel %vm580_vm0, %v5551_v54, %v6802_v31  ;;  %v2489_v13 = vsel %vm586_vm2, %v2488_v0, %v2487_v11  ;;  %4748 = vmatpush3.bf16.msra.mxu0 %v4929_v61  ;;  %v6803_v31 = vld [vmem:[#allocation8_spill] sm:$0xff]  ;;  %v6807_v35 = vrot.slane %v6806_v19, 6  ;;  %v1200_v7 = vrot.slane %v6797_v57, 4 }
 0x17e   :  { %v2491_v3 = vsel %vm589_vm3, %v2490_v6, %v2489_v13  ;;  %v2501_v60 = vsel %vm583_vm1, %v2500_v25, %v2499_v44  ;;  %v1199_v0 = vsel %vm586_vm2, %v6805_v26, %v6803_v31  ;;  %4749 = vmatprep.subr.bf16.mxu0 %v4931_v18  ;;  %v1202_v6 = vrot.slane %v5335_v59, 3 }
 0x17f   :  { %v2493_v11 = vsel %vm592_vm4, %v2492_v22, %v2491_v3  ;;  %v2503_v61 = vsel %vm586_vm2, %v6807_v35, %v2501_v60  ;;  %v6808_v44 = vrot.slane %v6792_v52, 3  ;;  %v931_v26 = vsel %vm580_vm0, %v5613_v27, %v930_v38 }
 0x180   :  { %v2505_v13 = vsel %vm589_vm3, %v2504_v28, %v2503_v61  ;;  %v1204_v31 = vrot.slane %v5394_v50, 2  ;;  %v933_v35 = vpack.c.b16 %v931_v26, %v931_v26  ;;  %v1201_v60 = vsel %vm589_vm3, %v1200_v7, %v1199_v0  ;;  %v6809_v61 = vld [vmem:[#allocation27_spill] sm:$0xff] }
 0x181   :  { %v2495_v25 = vsel %vm595_vm5, %v6808_v44, %v2493_v11  ;;  %v2507_v3 = vsel %vm592_vm4, %v2506_v34, %v2505_v13  ;;  %4750 = vmatpush3.bf16.msra.mxu0 %v4931_v18  ;;  %v1203_v28 = vsel %vm592_vm4, %v1202_v6, %v1201_v60  ;;  %v1206_v38 = vrot.slane %v5402_v12, 1  ;;  %v6810_v44 = vld [vmem:[#allocation22_spill] sm:$0xff] }
 0x182   :  { %v2497_v22 = vsel %vm598_vm6, %v2496_v47, %v2495_v25  ;;  %v2509_v11 = vsel %vm595_vm5, %v2508_v2, %v2507_v3  ;;  %v6811_v41 = vrot.slane %v6810_v44, 5  ;;  %v6812_v34 = vrot.slane %v5657_v43, 2  ;;  %4656 = vmatmul.mubr.msk.bf16.vlgmr.msra.gmra.mrb[12].mxu1 %vm630_vm7, %v933_v35  ;;  %v6813_v18 = vld [vmem:[#allocation26_spill] sm:$0xff] }
 0x183   :  { %v1205_v7 = vsel %vm595_vm5, %v1204_v31, %v1203_v28  ;;  %v6814_v25 = vrot.slane %v6813_v18, 4  ;;  %v1216_v6 = vrot.slane %v5551_v54, 3  ;;  %4660 = vmatpush3.bf16.msra.mxu1 %v4921_v8  ;;  %v1220_v3 = vrot.slane %v5629_v36, 1  ;;  %v4923_v31 = vld [vmem:[%s6686_s3 + $0x50] sm:$0xff]  }
 0x184   :  { %v1213_v47 = vsel %vm586_vm2, %v6811_v41, %v6809_v61  ;;  %v2511_v0 = vsel %vm598_vm6, %v6812_v34, %v2509_v11  ;;  %v1207_v26 = vsel %vm598_vm6, %v1206_v38, %v1205_v7  ;;  %v1218_v41 = vrot.slane %v5571_v37, 2  ;;  %4661 = vmatprep.subr.bf16.mxu1 %v4922_v32  ;;  %v6815_v11 = vld [vmem:[#allocation7_spill] sm:$0xff]  ;;  %v6817_v7 = vld [vmem:[#allocation28_spill] sm:$0xff] }
 0x185   :  { %v1215_v2 = vsel %vm589_vm3, %v6814_v25, %v1213_v47  ;;  %v2514_v13 = vpack.c.b16 %v2511_v0, %v2497_v22  ;;  %v1222_v35 = vrot.slane %v5646_v9, 7  ;;  %v6816_v28 = vrot.slane %v6804_v24, 6 }
 0x186   :  { %v1217_v60 = vsel %vm592_vm4, %v1216_v6, %v1215_v2  ;;  %v1306_v22 = vrot.slane %v6797_v57, 5  ;;  %v1308_v61 = vrot.slane %v5335_v59, 4  ;;  %v1310_v44 = vrot.slane %v5394_v50, 3 }
 0x187   :  { %v1305_v8 = vsel %vm586_vm2, %v6816_v28, %v6815_v11  ;;  %4751 = vmatprep.mubr.msk.bf16.mxu0 %vm630_vm7, %v2514_v13  ;;  %v1219_v38 = vsel %vm595_vm5, %v1218_v41, %v1217_v60  ;;  %v1312_v47 = vrot.slane %v5402_v12, 2  ;;  %v1223_v0 = vsel %vm580_vm0, %v1222_v35, %v5641_v15  ;;  %4662 = vmatpush3.bf16.msra.mxu1 %v4922_v32 }
 0x188   :  { %v1221_v34 = vsel %vm598_vm6, %v1220_v3, %v1219_v38  ;;  %v1307_v24 = vsel %vm589_vm3, %v1306_v22, %v1305_v8  ;;  %v6818_v25 = vrot.slane %v6813_v18, 5  ;;  %v1225_v13 = vpack.c.b16 %v1223_v0, %v1223_v0  ;;  %4667 = vmatprep.subr.bf16.mxu1 %v4923_v31  ;;  %v4924_v18 = vld [vmem:[%s6686_s3 + $0x58] sm:$0xff]   ;;  %v6819_v8 = vld [vmem:[#allocation9_spill] sm:$0xff] }
 0x189   :  { %v1224_v6 = vpack.c.b16 %v1221_v34, %v1207_v26  ;;  %v1309_v41 = vsel %vm592_vm4, %v1308_v61, %v1307_v24  ;;  %v1322_v60 = vrot.slane %v5551_v54, 4  ;;  %v1324_v11 = vrot.slane %v5571_v37, 3 }
 0x18a   :  { %v1321_v2 = vsel %vm589_vm3, %v6818_v25, %v6817_v7  ;;  %v1311_v3 = vsel %vm595_vm5, %v1310_v44, %v1309_v41  ;;  %v1326_v35 = vrot.slane %v5629_v36, 2  ;;  %v1328_v28 = vrot.slane %v5641_v15, 1  ;;  %v6820_v7 = vld [vmem:[#allocation24_spill] sm:$0xff] }
 0x18b   :  { %4663 = vmatprep.mubr.msk.bf16.mxu1 %vm630_vm7, %v1224_v6  ;;  %v1313_v32 = vsel %vm598_vm6, %v1312_v47, %v1311_v3  ;;  %v1323_v26 = vsel %vm592_vm4, %v1322_v60, %v1321_v2  ;;  %v1427_v38 = vsel %vm586_vm2, %v1306_v22, %v6819_v8  ;;  %v1429_v44 = vrot.slane %v6799_v40, 3  ;;  %v6830_v6 = vld [vmem:[#allocation25_spill] sm:$0xff] }
 0x18c   :  { %4664 = vmatmul.mubr.msk.bf16.vlgmr.msra.gmra.mrb[16].mxu1 %vm630_vm7, %v1225_v13  ;;  %v1325_v34 = vsel %vm595_vm5, %v1324_v11, %v1323_v26  ;;  %v1329_v0 = vsel %vm580_vm0, %v5646_v9, %v1328_v28  ;;  %v1428_v24 = vsel %vm589_vm3, %v1308_v61, %v1427_v38  ;;  %v1437_v25 = vsel %vm589_vm3, %v1322_v60, %v6820_v7  ;;  %v6821_v13 = vld [vmem:[#allocation34_spill] sm:$0xff]  ;;  %v4925_v61 = vld [vmem:[%s6686_s3 + $0x60] sm:$0xff]  }
 0x18d   :  { %4668 = vmatpush3.bf16.msra.mxu1 %v4923_v31  ;;  %v1327_v2 = vsel %vm598_vm6, %v1326_v35, %v1325_v34  ;;  %v1430_v22 = vsel %vm592_vm4, %v1429_v44, %v1428_v24  ;;  %v1438_v41 = vsel %vm592_vm4, %v1324_v11, %v1437_v25  ;;  %v2378_v3 = vpack.c.bf16 %v6821_v13, %v6821_v13  ;;  %v6823_v7 = vld [vmem:[#allocation10_spill] sm:$0xff] }
 0x18e   :  { %v1330_v26 = vpack.c.b16 %v1327_v2, %v1313_v32  ;;  %4669 = vmatprep.subr.bf16.mxu1 %v4924_v18  ;;  %v1431_v60 = vsel %vm595_vm5, %v1312_v47, %v1430_v22  ;;  %v1439_v8 = vrot.slane %v6806_v19, 2  ;;  %v1331_v31 = vpack.c.b16 %v1329_v0, %v1329_v0 }
 0x18f   :  { %v1524_v35 = vrot.slane %v6797_v57, 6  ;;  %v1526_v38 = vrot.slane %v5335_v59, 5  ;;  %v1528_v11 = vrot.slane %v6799_v40, 4  ;;  %v6822_v32 = vrot.slane %v5404_v10, 1 }
 0x190   :  { %4671 = vmatprep.mubr.msk.bf16.mxu1 %vm630_vm7, %v1330_v26  ;;  %v1440_v34 = vsel %vm595_vm5, %v1439_v8, %v1438_v41  ;;  %v1442_v24 = vrot.slane %v5652_v53, 7  ;;  %v1530_v47 = vrot.slane %v5402_v12, 3  ;;  %v1532_v2 = vrot.slane %v5404_v10, 2  ;;  %v4926_v41 = vld [vmem:[%s6686_s3 + $0x68] sm:$0xff]  }
 0x191   :  { %v1432_v44 = vsel %vm598_vm6, %v6822_v32, %v1431_v60  ;;  %4670 = vmatpush3.bf16.msra.mxu1 %v4924_v18  ;;  %v1441_v0 = vsel %vm598_vm6, %v1328_v28, %v1440_v34  ;;  %v1525_v25 = vsel %vm586_vm2, %v1524_v35, %v6823_v7  ;;  %v1540_v22 = vrot.slane %v5551_v54, 5  ;;  %v6824_v35 = vld [vmem:[#allocation23_spill] sm:$0xff]  ;;  %v6826_v7 = vld [vmem:[#allocation16_spill] sm:$0xff] }
 0x192   :  { %4675 = vmatprep.subr.bf16.mxu1 %v4925_v61  ;;  %v1444_v13 = vpack.c.b16 %v1441_v0, %v1432_v44  ;;  %v1527_v26 = vsel %vm589_vm3, %v1526_v38, %v1525_v25  ;;  %v1542_v60 = vrot.slane %v5571_v37, 4  ;;  %v1544_v18 = vrot.slane %v6806_v19, 3  ;;  %v6825_v38 = vld [vmem:[#allocation13_spill] sm:$0xff] }
 0x193   :  { %v6038_v28 = vunpack.c.l.b16 %v2378_v3  ;;  %v1529_v8 = vsel %vm592_vm4, %v1528_v11, %v1527_v26  ;;  %v1541_v32 = vsel %vm589_vm3, %v1540_v22, %v6824_v35  ;;  %v1546_v34 = vrot.slane %v5641_v15, 2  ;;  %v4927_v26 = vld [vmem:[%s6686_s3 + $0x70] sm:$0xff]  }
 0x194   :  { %4672 = vmatmul.mubr.msk.bf16.vlgmr.msra.gmra.mrb[20].mxu1 %vm630_vm7, %v1331_v31  ;;  %v1531_v44 = vsel %vm595_vm5, %v1530_v47, %v1529_v8  ;;  %v1543_v0 = vsel %vm592_vm4, %v1542_v60, %v1541_v32  ;;  %v6827_v25 = vrot.slane %v6826_v7, 5  ;;  %v1694_v3 = vrot.slane %v5357_v14, 4 }
 0x195   :  { %4676 = vmatpush3.bf16.msra.mxu1 %v4925_v61  ;;  %4679 = vmatprep.mubr.msk.bf16.mxu1 %vm630_vm7, %v1444_v13  ;;  %v1443_v11 = vsel %vm580_vm0, %v1442_v24, %v5646_v9  ;;  %v1545_v22 = vsel %vm595_vm5, %v1544_v18, %v1543_v0  ;;  %v1548_v31 = vrot.slane %v5646_v9, 1  ;;  %v1696_v47 = vrot.slane %v5362_v23, 3  ;;  %v6828_v0 = vld [vmem:[#allocation18_spill] sm:$0xff] }
 0x196   :  { %v1693_v1 = vsel %vm586_vm2, %v6827_v25, %v6825_v38  ;;  %4677 = vmatprep.subr.bf16.mxu1 %v4926_v41  ;;  %v1533_v60 = vsel %vm598_vm6, %v1532_v2, %v1531_v44  ;;  %v1547_v61 = vsel %vm598_vm6, %v1546_v34, %v1545_v22  ;;  %v1704_v8 = vrot.slane %v5533_v4, 6 }
 0x197   :  { %v1695_v13 = vsel %vm589_vm3, %v1694_v3, %v1693_v1  ;;  %v1550_v24 = vpack.c.b16 %v1547_v61, %v1533_v60  ;;  %v1706_v35 = vrot.slane %v5561_v16, 5  ;;  %v1710_v32 = vrot.slane %v5608_v17, 3  ;;  %v4928_v61 = vld [vmem:[%s6686_s3 + $0x78] sm:$0xff]  }
 0x198   :  { %v1697_v18 = vsel %vm592_vm4, %v1696_v47, %v1695_v13  ;;  %v6829_v38 = vrot.slane %v6828_v0, 2  ;;  %v1705_v2 = vsel %vm583_vm1, %v1704_v8, %v6830_v6  ;;  %v1712_v34 = vrot.slane %v5610_v63, 2 }
 0x199   :  { %v2512_v1 = vrot.slane %v5669_v33, 1  ;;  %4678 = vmatpush3.bf16.msra.mxu1 %v4926_v41  ;;  %v1445_v44 = vpack.c.b16 %v1443_v11, %v1443_v11  ;;  %v6831_v3 = vrot.slane %v5408_v39, 1  ;;  %v1707_v47 = vsel %vm586_vm2, %v1706_v35, %v1705_v2 }
 0x19a   :  { %v1699_v25 = vsel %vm595_vm5, %v6829_v38, %v1697_v18  ;;  %v1796_v60 = vrot.slane %v5304_v21, 7  ;;  %4683 = vmatprep.subr.bf16.mxu1 %v4927_v26  ;;  %v6832_v6 = vrot.slane %v5583_v55, 4  ;;  %v1800_v11 = vrot.slane %v5357_v14, 5  ;;  %v6833_v38 = vld [vmem:[#allocation14_spill] sm:$0xff] }
 0x19b   :  { %v1701_v22 = vsel %vm598_vm6, %v6831_v3, %v1699_v25  ;;  %v2513_v41 = vsel %vm580_vm0, %v6038_v28, %v2512_v1  ;;  %v1802_v8 = vrot.slane %v5362_v23, 4  ;;  %v1822_v18 = vrot.slane %v5637_v49, 1 }
 0x19c   :  { %v1709_v13 = vsel %vm589_vm3, %v6832_v6, %v1707_v47  ;;  %v2515_v35 = vpack.c.b16 %v2513_v41, %v2513_v41  ;;  %v1797_v25 = vsel %vm583_vm1, %v1796_v60, %v6833_v38  ;;  %4680 = vmatmul.mubr.msk.bf16.vlgmr.msra.gmra.mrb[24].mxu1 %vm630_vm7, %v1445_v44  ;;  %v1549_v2 = vsel %vm580_vm0, %v5652_v53, %v1548_v31 }
 0x19d   :  { %v1711_v21 = vsel %vm592_vm4, %v1710_v32, %v1709_v13  ;;  %v6834_v1 = vrot.slane %v6826_v7, 6  ;;  %v1812_v23 = vrot.slane %v5561_v16, 6  ;;  %4684 = vmatpush3.bf16.msra.mxu1 %v4927_v26  ;;  %4687 = vmatprep.mubr.msk.bf16.mxu1 %vm630_vm7, %v1550_v24  ;;  %v6835_v32 = vrot.slane %v5631_v48, 1  ;;  %v4930_v7 = vld [vmem:[%s6686_s3 + $0x80] sm:$0xff]  }
 0x19e   :  { %v1713_v3 = vsel %vm595_vm5, %v1712_v34, %v1711_v21  ;;  %v1816_v6 = vrot.slane %v5608_v17, 4  ;;  %v1818_v31 = vrot.slane %v5610_v63, 3  ;;  %4685 = vmatprep.subr.bf16.mxu1 %v4928_v61  ;;  %4752 = vmatmul.mubr.msk.bf16.vlgmr.msra.gmra.mrb[40].mxu0 %vm630_vm7, %v2515_v35  ;;  %v6836_v16 = vld [vmem:[#allocation32_spill] sm:$0xff]  ;;  %v6837_v13 = vld [vmem:[#allocation29_spill] sm:$0xff]  ;;  %v6838_v21 = vrot.slane %v6828_v0, 3 }
 0x19f   :  { %v1799_v14 = vsel %vm586_vm2, %v6834_v1, %v1797_v25  ;;  %v1715_v47 = vsel %vm598_vm6, %v6835_v32, %v1713_v3  ;;  %v1716_v26 = vrot.slane %v6836_v16, 7  ;;  %v1813_v41 = vsel %vm586_vm2, %v1812_v23, %v6837_v13 }
 0x1a0   :  { %v1801_v44 = vsel %vm589_vm3, %v1800_v11, %v1799_v14  ;;  %v1718_v34 = vpack.c.b16 %v1715_v47, %v1701_v22  ;;  %v6839_v63 = vrot.slane %v5583_v55, 5  ;;  %v1906_v22 = vsel %vm580_vm0, %v1796_v60, %v5302_v20  ;;  %v4932_v60 = vld [vmem:[%s6686_s3 + $0x88] sm:$0xff]  }
 0x1a1   :  { %v1803_v24 = vsel %vm592_vm4, %v1802_v8, %v1801_v44  ;;  %v1911_v35 = vrot.slane %v5383_v56, 3  ;;  %v2196_v25 = vrot.slane %v5655_v58, 1  ;;  %v6840_v3 = vrot.slane %v5408_v39, 2  ;;  %4686 = vmatpush3.bf16.msra.mxu1 %v4928_v61 }
 0x1a2   :  { %v1805_v17 = vsel %vm595_vm5, %v6838_v21, %v1803_v24  ;;  %v1815_v38 = vsel %vm589_vm3, %v6839_v63, %v1813_v41  ;;  %v6841_v14 = vrot.slane %v5322_v45, 6  ;;  %v1551_v32 = vpack.c.b16 %v1549_v2, %v1549_v2  ;;  %4691 = vmatprep.subr.bf16.mxu1 %v4930_v7 }
 0x1a3   :  { %v6130_v1 = vsel %vm598_vm6, %v6840_v3, %v1805_v17  ;;  %v1817_v0 = vsel %vm592_vm4, %v1816_v6, %v1815_v38  ;;  %v6842_v56 = vrot.slane %v5533_v4, 7  ;;  %v6843_v45 = vrot.slane %v5631_v48, 2 }
 0x1a4   :  { %v1908_v55 = vsel %vm583_vm1, %v6841_v14, %v1906_v22  ;;  %v1819_v47 = vsel %vm595_vm5, %v1818_v31, %v1817_v0  ;;  %v1717_v4 = vsel %vm580_vm0, %v1716_v26, %v5637_v49  ;;  %v6844_v13 = vrot.slane %v5541_v42, 5  ;;  %4688 = vmatmul.mubr.msk.bf16.vlgmr.msra.gmra.mrb[28].mxu1 %vm630_vm7, %v1551_v32  ;;  %v4936_v49 = vld [vmem:[%s6686_s3 + $0xa8] sm:$0xff]  }
 0x1a5   :  { %v1909_v20 = vsel %vm586_vm2, %v1800_v11, %v1908_v55  ;;  %v1915_v58 = vsel %vm580_vm0, %v6842_v56, %v5417_v29  ;;  %v1821_v44 = vsel %vm598_vm6, %v6843_v45, %v1819_v47  ;;  %v1921_v11 = vrot.slane %v5613_v27, 2  ;;  %v6846_v27 = vld [vmem:[#allocation17_spill] sm:$0xff]  ;;  %4692 = vmatpush3.bf16.msra.mxu1 %v4930_v7  ;;  %4695 = vmatprep.mubr.msk.bf16.mxu1 %vm630_vm7, %v1718_v34 }
 0x1a6   :  { %v1910_v61 = vsel %vm589_vm3, %v1802_v8, %v1909_v20  ;;  %v1916_v2 = vsel %vm583_vm1, %v1812_v23, %v1915_v58  ;;  %v1824_v29 = vpack.c.b16 %v1821_v44, %v6130_v1  ;;  %v6845_v48 = vmov %v6840_v3  ;;  %4693 = vmatprep.subr.bf16.mxu1 %v4932_v60  ;;  %v6849_v3 = vld [vmem:[#allocation31_spill] sm:$0xff] }
 0x1a7   :  { %v1912_v24 = vsel %vm592_vm4, %v1911_v35, %v1910_v61  ;;  %v1918_v41 = vsel %vm586_vm2, %v6844_v13, %v1916_v2  ;;  %v6847_v21 = vrot.slane %v5394_v50, 5  ;;  %v2176_v17 = vrot.slane %v5402_v12, 4  ;;  %v4933_v50 = vld [vmem:[%s6686_s3 + $0x90] sm:$0xff]  }
 0x1a8   :  { %v1913_v8 = vsel %vm595_vm5, %v6845_v48, %v1912_v24  ;;  %v1919_v23 = vsel %vm589_vm3, %v1816_v6, %v1918_v41  ;;  %v6848_v42 = vrot.slane %v5415_v62, 1  ;;  %v2178_v38 = vrot.slane %v5404_v10, 3 }
 0x1a9   :  { %v2175_v26 = vsel %vm586_vm2, %v6847_v21, %v6846_v27  ;;  %v1920_v39 = vsel %vm592_vm4, %v1818_v31, %v1919_v23  ;;  %v2186_v6 = vrot.slane %v5551_v54, 6  ;;  %v2188_v34 = vrot.slane %v5571_v37, 5  ;;  %4694 = vmatpush3.bf16.msra.mxu1 %v4932_v60  ;;  %v4934_v60 = vld [vmem:[%s6686_s3 + $0x98] sm:$0xff]  }
 0x1aa   :  { %v1914_v63 = vsel %vm598_vm6, %v6848_v42, %v1913_v8  ;;  %v1922_v22 = vsel %vm595_vm5, %v1921_v11, %v1920_v39  ;;  %v2177_v7 = vsel %vm589_vm3, %v2176_v17, %v2175_v26  ;;  %v2192_v62 = vrot.slane %v5641_v15, 3  ;;  %4699 = vmatprep.subr.bf16.mxu1 %v4933_v50 }
 0x1ab   :  { %v1923_v31 = vsel %vm598_vm6, %v1822_v18, %v1922_v22  ;;  %v2179_v35 = vsel %vm592_vm4, %v2178_v38, %v2177_v7  ;;  %v2187_v1 = vsel %vm583_vm1, %v2186_v6, %v6849_v3  ;;  %v2194_v0 = vrot.slane %v5646_v9, 2 }
 0x1ac   :  { %v2406_v14 = vrot.slane %v6038_v28, 7  ;;  %v1926_v55 = vpack.c.b16 %v1923_v31, %v1914_v63  ;;  %v6850_v32 = vrot.slane %v5427_v5, 2  ;;  %v2189_v20 = vsel %vm586_vm2, %v2188_v34, %v2187_v1  ;;  %v4938_v34 = vld [vmem:[%s6686_s3 + $0xc8] sm:$0xff]   ;;  %v4939_v31 = vld [vmem:[%s6686_s3 + $0xe0] sm:$0xff]  }
 0x1ad   :  { %v6851_v56 = vrot.slane %v6792_v52, 1  ;;  %v6852_v45 = vrot.slane %v5629_v36, 4  ;;  %v6853_v61 = vrot.slane %v5335_v59, 7  ;;  %v2393_v5 = vrot.slane %v6798_v51, 3 }
 0x1ae   :  { %v2181_v47 = vsel %vm595_vm5, %v6850_v32, %v2179_v35  ;;  %v1719_v2 = vpack.c.b16 %v1717_v4, %v1717_v4  ;;  %v6854_v24 = vrot.slane %v6799_v40, 6  ;;  %v6855_v13 = vrot.slane %v5551_v54, 7  ;;  %v4942_v32 = vld [vmem:[%s6688_s5] sm:$0xff]  }
 0x1af   :  { %v2183_v58 = vsel %vm598_vm6, %v6851_v56, %v2181_v47  ;;  %v2191_v44 = vsel %vm589_vm3, %v6852_v45, %v2189_v20  ;;  %v2388_v28 = vsel %vm580_vm0, %v6853_v61, %v6797_v57  ;;  %v6856_v51 = vrot.slane %v5402_v12, 5  ;;  %v4943_v20 = vld [vmem:[%s6688_s5 + $0x28] sm:$0xff]   ;;  %v4945_v61 = vld [vmem:[%s6688_s5 + $0x30] sm:$0xff]  }
 0x1b0   :  { %v2193_v11 = vsel %vm592_vm4, %v2192_v62, %v2191_v44  ;;  %v2390_v36 = vsel %vm583_vm1, %v6854_v24, %v2388_v28  ;;  %v2397_v59 = vsel %vm580_vm0, %v6855_v13, %v6801_v46  ;;  %v6857_v41 = vrot.slane %v5571_v37, 6  ;;  %4696 = vmatmul.mubr.msk.bf16.vlgmr.msra.gmra.mrb[32].mxu1 %vm630_vm7, %v1719_v2  ;;  %v4944_v56 = vld [vmem:[%s6688_s5 + $0x8] sm:$0xff]   ;;  %v4946_v28 = vld [vmem:[%s6688_s5 + $0x10] sm:$0xff]   ;;  %v4948_v13 = vld [vmem:[%s6688_s5 + $0x18] sm:$0xff]  }
 0x1b1   :  { %v2195_v57 = vsel %vm595_vm5, %v2194_v0, %v2193_v11  ;;  %v2391_v4 = vsel %vm586_vm2, %v6856_v51, %v2390_v36  ;;  %v6858_v8 = vrot.slane %v5404_v10, 4  ;;  %v6859_v46 = vrot.slane %v6806_v19, 5  ;;  %4700 = vmatpush3.bf16.msra.mxu1 %v4933_v50  ;;  %4703 = vmatprep.mubr.msk.bf16.mxu1 %vm630_vm7, %v1824_v29  ;;  %v4935_v10 = vld [vmem:[%s6686_s3 + $0xa0] sm:$0xff]   ;;  %v4947_v36 = vld [vmem:[%s6688_s5 + $0x38] sm:$0xff]  }
 0x1b2   :  { %v2398_v48 = vsel %vm583_vm1, %v6857_v41, %v2397_v59  ;;  %v2197_v40 = vsel %vm598_vm6, %v2196_v25, %v2195_v57  ;;  %v2403_v12 = vrot.slane %v5652_v53, 2  ;;  %v6860_v21 = vrot.slane %v5641_v15, 4  ;;  %4701 = vmatprep.subr.bf16.mxu1 %v4934_v60  ;;  %v6865_v50 = vld [vmem:[#allocation33_spill] sm:$0xff] }
 0x1b3   :  { %v2392_v54 = vsel %vm589_vm3, %v6858_v8, %v2391_v4  ;;  %v2400_v23 = vsel %vm586_vm2, %v6859_v46, %v2398_v48  ;;  %v2200_v37 = vpack.c.b16 %v2197_v40, %v2183_v58  ;;  %v6861_v19 = vrot.slane %v6792_v52, 2 }
 0x1b4   :  { %v2394_v27 = vsel %vm592_vm4, %v2393_v5, %v2392_v54  ;;  %v2401_v25 = vsel %vm589_vm3, %v6860_v21, %v2400_v23  ;;  %v6862_v53 = vrot.slane %v5646_v9, 3  ;;  %v2407_v17 = vsel %vm580_vm0, %v2406_v14, %v5669_v33 }
 0x1b5   :  { %v2395_v26 = vsel %vm595_vm5, %v6861_v19, %v2394_v27  ;;  %v1823_v15 = vsel %vm580_vm0, %v6836_v16, %v1822_v18  ;;  %v6863_v63 = vrot.slane %v5440_v30, 1  ;;  %v6864_v39 = vrot.slane %v5657_v43, 1  ;;  %4702 = vmatpush3.bf16.msra.mxu1 %v4934_v60  ;;  %v4937_v30 = vld [vmem:[%s6686_s3 + $0xc0] sm:$0xff]  }
 0x1b6   :  { %v2402_v29 = vsel %vm592_vm4, %v6862_v53, %v2401_v25  ;;  %4707 = vmatprep.subr.bf16.mxu1 %v4935_v10  ;;  %v1825_v6 = vpack.c.b16 %v1823_v15, %v1823_v15  ;;  %v1924_v18 = vrot.slane %v6865_v50, 7  ;;  %v2198_v62 = vrot.slane %v5669_v33, 7  ;;  %v4940_v33 = vld [vmem:[%s6686_s3 + $0xe8] sm:$0xff]  }
 0x1b7   :  { %v2404_v42 = vsel %vm595_vm5, %v2403_v12, %v2402_v29  ;;  %v2396_v52 = vsel %vm598_vm6, %v6863_v63, %v2395_v26  ;;  %v2409_v3 = vpack.c.b16 %v2407_v17, %v2407_v17  ;;  %v5059_v47 = vmov 0.0  }
 0x1b8   :  { %v2405_v9 = vsel %vm598_vm6, %v6864_v39, %v2404_v42  ;;  %4704 = vmatmul.mubr.msk.bf16.vlgmr.msra.gmra.mrb[36].mxu1 %vm630_vm7, %v1825_v6  ;;  %v1925_v22 = vsel %vm580_vm0, %v1924_v18, %v6836_v16  ;;  %v2199_v16 = vsel %vm580_vm0, %v2198_v62, %v5657_v43  ;;  %4767 = vmatprep.subr.bf16.mxu0 %v5059_v47 }
 0x1b9   :  { %v2408_v38 = vpack.c.b16 %v2405_v9, %v2396_v52  ;;  %4708 = vmatpush3.bf16.msra.mxu1 %v4935_v10  ;;  %4711 = vmatprep.mubr.msk.bf16.mxu1 %vm630_vm7, %v1926_v55  ;;  %v1927_v7 = vpack.c.b16 %v1925_v22, %v1925_v22  ;;  %v2201_v35 = vpack.c.b16 %v2199_v16, %v2199_v16  ;;  %v4941_v55 = vld [vmem:[%s6688_s5 + $0x20] sm:$0xff]  }
 0x1ba   :  { %4709 = vmatprep.subr.bf16.mxu1 %v4936_v49  ;;  %4768 = vmatpush3.bf16.msra.mxu0 %v4942_v32 }
 0x1bb   :  { %4769 = vmatprep.subr.bf16.mxu0 %v5059_v47  ;;  %4775 = vmatprep.mubr.msk.bf16.mxu0 %vm5060_vm8, %v5059_v47 }
 0x1bd   :  { %4710 = vmatpush3.bf16.msra.mxu1 %v4936_v49 }
 0x1be   :  { %4723 = vmatprep.subr.bf16.mxu1 %v4937_v30  ;;  %4770 = vmatpush3.bf16.msra.mxu0 %v4944_v56 }
 0x1bf   :  { %4771 = vmatprep.subr.bf16.mxu0 %v5059_v47 }
 0x1c0   :  { %4712 = vmatmul.mubr.msk.bf16.vlgmr.msra.gmra.mrb[40].mxu1 %vm630_vm7, %v1927_v7 }
 0x1c1   :  { %4724 = vmatpush3.bf16.msra.mxu1 %v4937_v30  ;;  %4727 = vmatprep.mubr.msk.bf16.mxu1 %vm630_vm7, %v2200_v37 }
 0x1c2   :  { %4725 = vmatprep.subr.bf16.mxu1 %v4938_v34  ;;  %4772 = vmatpush3.bf16.msra.mxu0 %v4946_v28 }
 0x1c3   :  { %4773 = vmatprep.subr.bf16.mxu0 %v5059_v47 }
 0x1c5   :  { %4726 = vmatpush3.bf16.msra.mxu1 %v4938_v34 }
 0x1c6   :  { %4739 = vmatprep.subr.bf16.mxu1 %v4939_v31  ;;  %4774 = vmatpush3.bf16.msra.mxu0 %v4948_v13 }
 0x1c7   :  { %4791 = vmatprep.subr.bf16.mxu0 %v5059_v47 }
 0x1c8   :  { %4728 = vmatmul.mubr.msk.bf16.vlgmr.msra.gmra.mrb[44].mxu1 %vm630_vm7, %v2201_v35 }
 0x1c9   :  { %4740 = vmatpush3.bf16.msra.mxu1 %v4939_v31  ;;  %4743 = vmatprep.mubr.msk.bf16.mxu1 %vm630_vm7, %v2408_v38 }
 0x1ca   :  { %4741 = vmatprep.subr.bf16.mxu1 %v4940_v33 }
 0x1cd   :  { %4742 = vmatpush3.bf16.msra.mxu1 %v4940_v33 }
 0x1ce   :  { %4755 = vmatprep.subr.bf16.mxu1 %v5059_v47 }
 0x1d0   :  { %4744 = vmatmul.mubr.msk.bf16.vlgmr.msra.gmra.mrb[48].mxu1 %vm630_vm7, %v2409_v3 }
 0x1d1   :  { %4756 = vmatpush3.bf16.msra.mxu1 %v4941_v55  ;;  %4763 = vmatprep.mubr.msk.bf16.mxu1 %vm5060_vm8, %v5059_v47 }
 0x1d2   :  { %4757 = vmatprep.subr.bf16.mxu1 %v5059_v47 }
 0x1d5   :  { %4758 = vmatpush3.bf16.msra.mxu1 %v4943_v20 }
 0x1d6   :  { %4759 = vmatprep.subr.bf16.mxu1 %v5059_v47 }
 0x1d9   :  { %4760 = vmatpush3.bf16.msra.mxu1 %v4945_v61 }
 0x1da   :  { %4761 = vmatprep.subr.bf16.mxu1 %v5059_v47 }
 0x1dd   :  { %4762 = vmatpush3.bf16.msra.mxu1 %v4947_v36 }
 0x1de   :  { %4779 = vmatprep.subr.bf16.mxu1 %v5059_v47 }
 0x235   :  { %v4633_v1 = vpop.f32.mrb[0].mxu1 }
 0x236   :  { %v671_v0 = vpop.f32.mrb[1].mxu1 }
 0x237   :  { %v4634_v43 = vpop.f32.mrb[2].mxu1 }
 0x238   :  { %v674_v14 = vpop.f32.mrb[3].mxu1 }
 0x23d   :  { %v4641_v58 = vpop.f32.mrb[4].mxu1 }
 0x23e   :  { %v778_v45 = vadd.f32 %v4641_v58, %v4633_v1  ;;  %v769_v44 = vpop.f32.mrb[5].mxu1 }
 0x23f   :  { %v770_v5 = vadd.f32 %v769_v44, %v671_v0  ;;  %v4642_v2 = vpop.f32.mrb[6].mxu1 }
 0x240   :  { %v772_v60 = vpop.f32.mrb[7].mxu1 }
 0x241   :  { %v773_v11 = vadd.f32 %v772_v60, %v674_v14 }
 0x245   :  { %v6315_v24 = vpop.f32.mrb[32].mxu0 }
 0x246   :  { %v6323_v59 = vpop.f32.mrb[33].mxu0 }
 0x247   :  { %v4722_v57 = vpop.f32.mrb[34].mxu0  ;;  %v4649_v51 = vpop.f32.mrb[8].mxu1 }
 0x248   :  { %v6327_v4 = vpop.f32.mrb[35].mxu0  ;;  %v896_v41 = vadd.f32 %v4649_v51, %v778_v45  ;;  %v880_v48 = vpop.f32.mrb[9].mxu1 }
 0x249   :  { %v894_v40 = vadd.f32 %v880_v48, %v770_v5  ;;  %v4650_v8 = vpop.f32.mrb[10].mxu1 }
 0x24a   :  { %v883_v54 = vpop.f32.mrb[11].mxu1 }
 0x24b   :  { %v895_v46 = vadd.f32 %v883_v54, %v773_v11 }
 0x24f   :  { %v6331_v23 = vpop.f32.mrb[36].mxu0 }
 0x250   :  { %v6333_v12 = vpop.f32.mrb[37].mxu0 }
 0x251   :  { %v4738_v37 = vpop.f32.mrb[38].mxu0 }
 0x252   :  { %v6335_v27 = vpop.f32.mrb[39].mxu0 }
 0x255   :  { %v4657_v21 = vpop.f32.mrb[12].mxu1 }
 0x256   :  { %v1002_v25 = vadd.f32 %v4657_v21, %v896_v41  ;;  %v986_v10 = vpop.f32.mrb[13].mxu1 }
 0x257   :  { %v1000_v19 = vadd.f32 %v986_v10, %v894_v40  ;;  %v4658_v26 = vpop.f32.mrb[14].mxu1 }
 0x258   :  { %v989_v53 = vpop.f32.mrb[15].mxu1 }
 0x259   :  { %v1001_v29 = vadd.f32 %v989_v53, %v895_v46 }
 0x25f   :  { %v4665_v17 = vpop.f32.mrb[16].mxu1 }
 0x260   :  { %v1294_v15 = vadd.f32 %v4665_v17, %v1002_v25  ;;  %v1278_v42 = vpop.f32.mrb[17].mxu1 }
 0x261   :  { %v1292_v63 = vadd.f32 %v1278_v42, %v1000_v19  ;;  %v4666_v52 = vpop.f32.mrb[18].mxu1 }
 0x262   :  { %v1281_v39 = vpop.f32.mrb[19].mxu1 }
 0x263   :  { %v1293_v9 = vadd.f32 %v1281_v39, %v1001_v29 }
 0x267   :  { %v4673_v38 = vpop.f32.mrb[20].mxu1 }
 0x268   :  { %v1400_v6 = vadd.f32 %v4673_v38, %v1294_v15  ;;  %v1384_v49 = vpop.f32.mrb[21].mxu1 }
 0x269   :  { %v1398_v50 = vadd.f32 %v1384_v49, %v1292_v63  ;;  %v4674_v18 = vpop.f32.mrb[22].mxu1 }
 0x26a   :  { %v1387_v30 = vpop.f32.mrb[23].mxu1 }
 0x26b   :  { %v1399_v22 = vadd.f32 %v1387_v30, %v1293_v9 }
 0x26f   :  { %v4681_v7 = vpop.f32.mrb[24].mxu1 }
 0x270   :  { %v1514_v34 = vadd.f32 %v4681_v7, %v1400_v6  ;;  %v1498_v62 = vpop.f32.mrb[25].mxu1  ;;  %v5061_v6 = vmov 1966171168  }
 0x271   :  { %v1512_v31 = vadd.f32 %v1498_v62, %v1398_v50  ;;  %v4682_v16 = vpop.f32.mrb[26].mxu1  ;;  %v4753_v35 = vpop.f32.mrb[40].mxu0  ;;  %v2603_v49 = vunpack.c.l.s4 %v5061_v6 }
 0x272   :  { %v1501_v33 = vpop.f32.mrb[27].mxu1  ;;  %v2568_v3 = vpop.f32.mrb[41].mxu0 }
 0x273   :  { %v1513_v1 = vadd.f32 %v1501_v33, %v1399_v22  ;;  %v4754_v0 = vpop.f32.mrb[42].mxu0 }
 0x274   :  { %v2571_v43 = vpop.f32.mrb[43].mxu0 }
 0x277   :  { %v4689_v14 = vpop.f32.mrb[28].mxu1 }
 0x278   :  { %v1620_v55 = vadd.f32 %v4689_v14, %v1514_v34  ;;  %v1604_v32 = vpop.f32.mrb[29].mxu1 }
 0x279   :  { %v1618_v20 = vadd.f32 %v1604_v32, %v1512_v31  ;;  %v4690_v56 = vpop.f32.mrb[30].mxu1 }
 0x27a   :  { %v1607_v58 = vpop.f32.mrb[31].mxu1 }
 0x27b   :  { %v1619_v45 = vadd.f32 %v1607_v58, %v1513_v1 }
 0x283   :  { %v4697_v44 = vpop.f32.mrb[32].mxu1 }
 0x284   :  { %v1788_v61 = vadd.f32 %v4697_v44, %v1620_v55  ;;  %v1772_v28 = vpop.f32.mrb[33].mxu1 }
 0x285   :  { %v1786_v5 = vadd.f32 %v1772_v28, %v1618_v20  ;;  %v4698_v2 = vpop.f32.mrb[34].mxu1 }
 0x286   :  { %v1775_v60 = vpop.f32.mrb[35].mxu1 }
 0x287   :  { %v1787_v11 = vadd.f32 %v1775_v60, %v1619_v45 }
 0x28b   :  { %v4705_v36 = vpop.f32.mrb[36].mxu1 }
 0x28c   :  { %v1894_v13 = vadd.f32 %v4705_v36, %v1788_v61  ;;  %v1878_v57 = vpop.f32.mrb[37].mxu1 }
 0x28d   :  { %v1892_v51 = vadd.f32 %v1878_v57, %v1786_v5  ;;  %v4706_v41 = vpop.f32.mrb[38].mxu1 }
 0x28e   :  { %v1881_v48 = vpop.f32.mrb[39].mxu1 }
 0x28f   :  { %v1893_v40 = vadd.f32 %v1881_v48, %v1787_v11 }
 0x293   :  { %v4713_v8 = vpop.f32.mrb[40].mxu1 }
 0x294   :  { %v1996_v54 = vadd.f32 %v4713_v8, %v1894_v13  ;;  %v1980_v46 = vpop.f32.mrb[41].mxu1 }
 0x295   :  { %v1994_v37 = vadd.f32 %v1980_v46, %v1892_v51  ;;  %v4714_v21 = vpop.f32.mrb[42].mxu1 }
 0x296   :  { %v1983_v25 = vpop.f32.mrb[43].mxu1  ;;  %v2102_v10 = vadd.f32 %v6315_v24, %v1996_v54 }
 0x297   :  { %v1995_v19 = vadd.f32 %v1983_v25, %v1893_v40  ;;  %v2100_v26 = vadd.f32 %v6323_v59, %v1994_v37  ;;  %v2604_v59 = vunpack.c.0.s8 %v2603_v49 }
 0x299   :  { %v2101_v53 = vadd.f32 %v6327_v4, %v1995_v19  ;;  %v4248_v4 = vld [vmem:[%s6687_s4] ss:$0 sm:$0xff] }
 0x29b   :  { %v4729_v29 = vpop.f32.mrb[44].mxu1 }
 0x29c   :  { %v2270_v17 = vadd.f32 %v4729_v29, %v2102_v10  ;;  %v2254_v15 = vpop.f32.mrb[45].mxu1 }
 0x29d   :  { %v2268_v42 = vadd.f32 %v2254_v15, %v2100_v26  ;;  %v4730_v63 = vpop.f32.mrb[46].mxu1 }
 0x29e   :  { %v2257_v52 = vpop.f32.mrb[47].mxu1  ;;  %v2376_v39 = vadd.f32 %v6331_v23, %v2270_v17 }
 0x29f   :  { %v2269_v9 = vadd.f32 %v2257_v52, %v2101_v53  ;;  %v2374_v38 = vadd.f32 %v6333_v12, %v2268_v42  ;;  %v6866_v12 = vld [vmem:[#allocation5_spill] sm:$0xff] }
 0x2a0   :  { %v2607_v33 = vsub.s32 %v2604_v59, %v6866_v12 }
 0x2a1   :  { %v2375_v24 = vadd.f32 %v6335_v27, %v2269_v9 }
 0x2a3   :  { %v4745_v50 = vpop.f32.mrb[48].mxu1 }
 0x2a4   :  { %v2478_v18 = vadd.f32 %v4745_v50, %v2376_v39  ;;  %v2462_v30 = vpop.f32.mrb[49].mxu1 }
 0x2a5   :  { %v2476_v22 = vadd.f32 %v2462_v30, %v2374_v38  ;;  %v4746_v7 = vpop.f32.mrb[50].mxu1 }
 0x2a6   :  { %v2584_v34 = vadd.f32 %v4753_v35, %v2478_v18  ;;  %v2465_v62 = vpop.f32.mrb[51].mxu1 }
 0x2a7   :  { %v2582_v23 = vadd.f32 %v2568_v3, %v2476_v22  ;;  %v2477_v31 = vadd.f32 %v2465_v62, %v2375_v24 }
 0x2a8   :  { %v2594_v16 = vadd.f32 %v4248_v4, %v2584_v34 }
 0x2a9   :  { %v2592_v1 = vadd.f32 %v4248_v4, %v2582_v23  ;;  %v2583_v0 = vadd.f32 %v2571_v43, %v2477_v31 }
 0x2aa   :  { %v2597_v27 = vmax.f32 %v2594_v16, 0.0 }
 0x2ab   :  { %v2595_v14 = vmax.f32 %v2592_v1, 0.0  ;;  %v2593_v55 = vadd.f32 %v4248_v4, %v2583_v0 }
 0x2ac   :  { %v2705_v32 = vrot.slane %v2597_v27, %v2607_v33 }
 0x2ad   :  { %v2601_v20 = vcombine.high %v2595_v14, %v2595_v14  ;;  %v2608_v56 = vrot.slane %v2595_v14, %v2607_v33  ;;  %v2596_v58 = vmax.f32 %v2593_v55, 0.0 }
 0x2ae   :  { %v2706_v45 = vcombine.high %v2705_v32, %v2705_v32  ;;  %v2713_v44 = vrot.slane %v2705_v32, %v2607_v33 }
 0x2af   :  { %v2615_v61 = vrot.slane %v2601_v20, %v2607_v33  ;;  %v2616_v28 = vcombine.high %v2608_v56, %v2608_v56  ;;  %v2624_v35 = vrot.slane %v2608_v56, %v2607_v33  ;;  %v2650_v2 = vcombine.high %v2596_v58, %v2596_v58 }
 0x2b0   :  { %v2720_v5 = vrot.slane %v2706_v45, %v2607_v33  ;;  %v3340_v3 = vpack.c.bf16 %v2713_v44, %v2713_v44  ;;  %v2657_v8 = vrot.slane %v2596_v58, %v2607_v33 }
 0x2b1   :  { %v2617_v60 = vcombine.high %v2615_v61, %v2615_v61  ;;  %v2631_v11 = vrot.slane %v2615_v61, %v2607_v33  ;;  %v2638_v36 = vrot.slane %v2616_v28, %v2607_v33  ;;  %v2646_v13 = vcombine.high %v2624_v35, %v2624_v35 }
 0x2b2   :  { %v3353_v43 = vunpack.c.l.b16 %v3340_v3  ;;  %v3426_v57 = vpack.c.bf16 %v2720_v5, %v2720_v5  ;;  %v2739_v51 = vpack.c.bf16 %v2624_v35, %v2624_v35  ;;  %v2664_v21 = vrot.slane %v2650_v2, %v2607_v33 }
 0x2b3   :  { %v2645_v41 = vrot.slane %v2617_v60, %v2607_v33  ;;  %v2648_v48 = vcombine.high %v2638_v36, %v2638_v36  ;;  %v2749_v40 = vpack.c.bf16 %v2638_v36, %v2638_v36  ;;  %v2647_v46 = vcombine.high %v2631_v11, %v2631_v11  ;;  %v4950_v36 = vld [vmem:[%s6688_s5 + $0x60] sm:$0xff]  }
 0x2b4   :  { %v6347_v54 = vunpack.c.l.b16 %v3426_v57  ;;  %v2909_v37 = vpack.c.bf16 %v2646_v13, %v2646_v13  ;;  %v3081_v19 = vpack.c.bf16 %v2631_v11, %v2631_v11  ;;  %v3354_v26 = vrot.slane %v3353_v43, 7 }
 0x2b5   :  { %v2649_v25 = vcombine.high %v2645_v41, %v2645_v41  ;;  %v2995_v10 = vpack.c.bf16 %v2648_v48, %v2648_v48  ;;  %v2837_v53 = vunpack.c.l.b16 %v2739_v51  ;;  %v3167_v29 = vpack.c.bf16 %v2645_v41, %v2645_v41  ;;  %v4949_v48 = vld [vmem:[%s6688_s5 + $0x40] sm:$0xff]  }
 0x2b6   :  { %v3440_v17 = vrot.slane %v6347_v54, 7  ;;  %v2762_v15 = vunpack.c.l.b16 %v2749_v40  ;;  %v2665_v63 = vcombine.high %v2657_v8, %v2657_v8  ;;  %v2922_v52 = vunpack.c.l.b16 %v2909_v37 }
 0x2b7   :  { %v3339_v42 = vpack.c.bf16 %v2649_v25, %v2649_v25  ;;  %v3253_v39 = vpack.c.bf16 %v2647_v46, %v2647_v46  ;;  %v2666_v9 = vcombine.high %v2664_v21, %v2664_v21  ;;  %v2673_v38 = vrot.slane %v2657_v8, %v2607_v33 }
 0x2b8   :  { %v3008_v6 = vunpack.c.l.b16 %v2995_v10  ;;  %v3094_v49 = vunpack.c.l.b16 %v3081_v19  ;;  %v2680_v24 = vrot.slane %v2664_v21, %v2607_v33  ;;  %v2687_v50 = vrot.slane %v2665_v63, %v2607_v33  ;;  %v4952_v21 = vld [vmem:[%s6688_s5 + $0x68] sm:$0xff]   ;;  %v4954_v19 = vld [vmem:[%s6688_s5 + $0x70] sm:$0xff]  }
 0x2b9   :  { %v3180_v18 = vunpack.c.l.b16 %v3167_v29  ;;  %v3352_v59 = vunpack.c.l.b16 %v3339_v42  ;;  %v2694_v30 = vrot.slane %v2666_v9, %v2607_v33  ;;  %v2695_v4 = vcombine.high %v2673_v38, %v2673_v38  ;;  %v4951_v10 = vld [vmem:[%s6688_s5 + $0x48] sm:$0xff]   ;;  %v4955_v29 = vld [vmem:[%s6688_s5 + $0x58] sm:$0xff]   ;;  %v4957_v42 = vld [vmem:[%s6688_s5 + $0x80] sm:$0xff]  }
 0x2ba   :  { %v2696_v22 = vcombine.high %v2680_v24, %v2680_v24  ;;  %v2697_v7 = vcombine.high %v2687_v50, %v2687_v50  ;;  %v2740_v34 = vpack.c.bf16 %v2687_v50, %v2687_v50  ;;  %v2996_v62 = vpack.c.bf16 %v2680_v24, %v2680_v24  ;;  %v4962_v9 = vld [vmem:[%s6688_s5 + $0xb0] sm:$0xff]   ;;  %v4966_v24 = vld [vmem:[%s6688_s5 + $0xe0] sm:$0xff]  }
 0x2bb   :  { %v2698_v23 = vcombine.high %v2694_v30, %v2694_v30  ;;  %v2750_v31 = vpack.c.bf16 %v2695_v4, %v2695_v4  ;;  %v3082_v16 = vpack.c.bf16 %v2694_v30, %v2694_v30  ;;  %v3425_v1 = vpack.c.bf16 %v2673_v38, %v2673_v38  ;;  %v4961_v38 = vld [vmem:[%s6688_s5 + $0x90] sm:$0xff]   ;;  %v4968_v30 = vld [vmem:[%s6688_s5 + $0xe8] sm:$0xff]  }
 0x2bc   :  { %v2838_v0 = vunpack.c.l.b16 %v2740_v34  ;;  %v2910_v27 = vpack.c.bf16 %v2697_v7, %v2697_v7  ;;  %v3009_v14 = vunpack.c.l.b16 %v2996_v62  ;;  %v3168_v55 = vpack.c.bf16 %v2696_v22, %v2696_v22  ;;  %v4967_v4 = vld [vmem:[%s6688_s5 + $0xc8] sm:$0xff]   ;;  %v4970_v22 = vld [vmem:[%s6688_s5 + $0xf0] sm:$0xff]   ;;  %v4972_v34 = vld [vmem:[%s6688_s5 + $0xf8] sm:$0xff]  }
 0x2bd   :  { %v2763_v32 = vunpack.c.l.b16 %v2750_v31  ;;  %v3095_v20 = vunpack.c.l.b16 %v3082_v16  ;;  %v3254_v56 = vpack.c.bf16 %v2698_v23, %v2698_v23  ;;  %v6351_v58 = vsel %vm580_vm0, %v3354_v26, %v3352_v59  ;;  %v4953_v26 = vld [vmem:[%s6688_s5 + $0x50] sm:$0xff]   ;;  %v4971_v62 = vld [vmem:[%s6688_s5 + $0xd8] sm:$0xff]   ;;  %v4973_v31 = vld [vmem:[%s6688_s5 + $0x100] sm:$0xff]  }
 0x2be   :  { %v2839_v33 = vrot.slane %v2838_v0, 7  ;;  %v2923_v45 = vunpack.c.l.b16 %v2910_v27  ;;  %v3010_v44 = vrot.slane %v3009_v14, 7  ;;  %v3181_v61 = vunpack.c.l.b16 %v3168_v55  ;;  %v4969_v7 = vld [vmem:[%s6688_s5 + $0xd0] sm:$0xff]   ;;  %v4976_v27 = vld [vmem:[%s6688_s5 + $0x118] sm:$0xff]  }
 0x2bf   :  { %v2764_v28 = vrot.slane %v2763_v32, 7  ;;  %v3096_v35 = vrot.slane %v3095_v20, 7  ;;  %v3267_v5 = vunpack.c.l.b16 %v3254_v56  ;;  %v3438_v3 = vunpack.c.l.b16 %v3425_v1  ;;  %v4974_v1 = vld [vmem:[%s6688_s5 + $0x108] sm:$0xff]   ;;  %v4975_v0 = vld [vmem:[%s6688_s5 + $0x110] sm:$0xff]  }
 0x2c0   :  { %v2924_v2 = vrot.slane %v2923_v45, 7  ;;  %v3182_v60 = vrot.slane %v3181_v61, 7  ;;  %v2840_v11 = vsel %vm580_vm0, %v2839_v33, %v2837_v53  ;;  %v3011_v13 = vsel %vm580_vm0, %v3010_v44, %v3008_v6  ;;  %v4956_v53 = vld [vmem:[%s6688_s5 + $0x78] sm:$0xff]   ;;  %v4977_v55 = vld [vmem:[%s6690_s7] ss:$16 sps:$4 sm:$0xff]  }
 0x2c1   :  { %v3266_v43 = vunpack.c.l.b16 %v3253_v39  ;;  %v3268_v57 = vrot.slane %v3267_v5, 7  ;;  %v2765_v51 = vsel %vm580_vm0, %v2764_v28, %v2762_v15  ;;  %v2841_v41 = vpack.c.b16 %v2840_v11, %v2840_v11  ;;  %v4959_v39 = vld [vmem:[%s6688_s5 + $0x88] sm:$0xff]   ;;  %v4964_v6 = vld [vmem:[%s6688_s5 + $0xb8] sm:$0xff]   ;;  %v4979_v32 = vld [vmem:[%s6690_s7 + $0x4] ss:$16 sps:$4 sm:$0xff]  }
 0x2c2   :  { %v2766_v40 = vpack.c.b16 %v2765_v51, %v2765_v51  ;;  %v2925_v8 = vsel %vm580_vm0, %v2924_v2, %v2922_v52  ;;  %v6364_v54 = vsel %vm580_vm0, %v3096_v35, %v3094_v49  ;;  %v6367_v46 = vsel %vm580_vm0, %v3182_v60, %v3180_v18  ;;  %v4960_v52 = vld [vmem:[%s6688_s5 + $0xa8] sm:$0xff]   ;;  %v4963_v49 = vld [vmem:[%s6688_s5 + $0x98] sm:$0xff]   ;;  %v4965_v18 = vld [vmem:[%s6688_s5 + $0xc0] sm:$0xff]  }
 0x2c3   :  { %4776 = vmatmul.mubr.msk.bf16.vlgmr.msra.gmra.mrb[44].mxu0 %vm2791_vm9, %v2841_v41  ;;  %v6371_v37 = vsel %vm580_vm0, %v3268_v57, %v3266_v43  ;;  %v6378_v25 = vsel %vm580_vm0, %v3440_v17, %v3438_v3  ;;  %v4958_v17 = vld [vmem:[%s6688_s5 + $0xa0] sm:$0xff]   ;;  %v3012_v15 = vpack.c.b16 %v3011_v13, %v3011_v13  ;;  %v2926_v63 = vpack.c.b16 %v2925_v8, %v2925_v8  ;;  %v4980_v20 = vld [vmem:[%s6690_s7 + $0x8] ss:$16 sps:$4 sm:$0xff]   ;;  %v4994_v35 = vld [vmem:[%s6690_s7 + $0x4c] ss:$16 sps:$4 sm:$0xff]  }
 0x2c4   :  { %4764 = vmatmul.mubr.msk.bf16.vlgmr.msra.gmra.mrb[52].mxu1 %vm2791_vm9, %v2766_v40  ;;  %4792 = vmatpush3.bf16.msra.mxu0 %v4950_v36  ;;  %v3184_v50 = vpack.c.b16 %v6367_v46, %v6367_v46  ;;  %v3098_v59 = vpack.c.b16 %v6364_v54, %v6364_v54  ;;  %v3356_v23 = vpack.c.b16 %v6351_v58, %v6351_v58  ;;  %v4985_v56 = vld [vmem:[%s6690_s7 + $0x24] ss:$16 sps:$4 sm:$0xff]   ;;  %v4988_v58 = vld [vmem:[%s6690_s7 + $0x2c] ss:$16 sps:$4 sm:$0xff]   ;;  %v4983_v33 = vld [vmem:[%s6690_s7 + $0x20] ss:$16 sps:$4 sm:$0xff]  }
 0x2c5   :  { %4780 = vmatpush3.bf16.msra.mxu1 %v4949_v48  ;;  %4793 = vmatprep.subr.bf16.mxu0 %v5059_v47  ;;  %v3270_v16 = vpack.c.b16 %v6371_v37, %v6371_v37  ;;  %v3442_v14 = vpack.c.b16 %v6378_v25, %v6378_v25  ;;  %v4986_v45 = vld [vmem:[%s6690_s7 + $0x28] ss:$16 sps:$4 sm:$0xff]   ;;  %v4989_v44 = vld [vmem:[%s6690_s7 + $0x40] ss:$16 sps:$4 sm:$0xff]   ;;  %v4991_v61 = vld [vmem:[%s6690_s7 + $0x44] ss:$16 sps:$4 sm:$0xff]  }
 0x2c6   :  { %4781 = vmatprep.subr.bf16.mxu1 %v5059_v47  ;;  %4787 = vmatprep.mubr.msk.bf16.mxu1 %vm5060_vm8, %v5059_v47  ;;  %v4992_v28 = vld [vmem:[%s6690_s7 + $0x48] ss:$16 sps:$4 sm:$0xff]   ;;  %v4997_v5 = vld [vmem:[%s6690_s7 + $0x64] ss:$16 sps:$4 sm:$0xff]   ;;  %v5000_v3 = vld [vmem:[%s6690_s7 + $0x6c] ss:$16 sps:$4 sm:$0xff]  }
 0x2c7   :  { %4799 = vmatprep.mubr.msk.bf16.mxu0 %vm5060_vm8, %v5059_v47  ;;  %v4995_v2 = vld [vmem:[%s6690_s7 + $0x60] ss:$16 sps:$4 sm:$0xff]   ;;  %v4998_v60 = vld [vmem:[%s6690_s7 + $0x68] ss:$16 sps:$4 sm:$0xff]   ;;  %v5062_v36 = vmov 0  }
 0x2c8   :  { %4794 = vmatpush3.bf16.msra.mxu0 %v4952_v21  ;;  %v5001_v11 = vld [vmem:[%s6692_s9 + $0x40] sm:$0xff]  }
 0x2c9   :  { %4782 = vmatpush3.bf16.msra.mxu1 %v4951_v10  ;;  %4795 = vmatprep.subr.bf16.mxu0 %v5059_v47  ;;  %v5002_v13 = vld [vmem:[%s6692_s9 + $0xc0] sm:$0xff]  }
 0x2ca   :  { %4783 = vmatprep.subr.bf16.mxu1 %v5059_v47 }
 0x2cc   :  { %4796 = vmatpush3.bf16.msra.mxu0 %v4954_v19 }
 0x2cd   :  { %4784 = vmatpush3.bf16.msra.mxu1 %v4953_v26  ;;  %4797 = vmatprep.subr.bf16.mxu0 %v5059_v47 }
 0x2ce   :  { %4785 = vmatprep.subr.bf16.mxu1 %v5059_v47 }
 0x2d0   :  { %4798 = vmatpush3.bf16.msra.mxu0 %v4956_v53 }
 0x2d1   :  { %4786 = vmatpush3.bf16.msra.mxu1 %v4955_v29  ;;  %4815 = vmatprep.subr.bf16.mxu0 %v5059_v47 }
 0x2d2   :  { %4803 = vmatprep.subr.bf16.mxu1 %v5059_v47 }
 0x2d3   :  { %4800 = vmatmul.mubr.msk.bf16.vlgmr.msra.gmra.mrb[48].mxu0 %vm2791_vm9, %v3012_v15 }
 0x2d4   :  { %4788 = vmatmul.mubr.msk.bf16.vlgmr.msra.gmra.mrb[56].mxu1 %vm2791_vm9, %v2926_v63  ;;  %4816 = vmatpush3.bf16.msra.mxu0 %v4958_v17 }
 0x2d5   :  { %4804 = vmatpush3.bf16.msra.mxu1 %v4957_v42  ;;  %4817 = vmatprep.subr.bf16.mxu0 %v5059_v47 }
 0x2d6   :  { %4805 = vmatprep.subr.bf16.mxu1 %v5059_v47  ;;  %4811 = vmatprep.mubr.msk.bf16.mxu1 %vm5060_vm8, %v5059_v47 }
 0x2d7   :  { %4823 = vmatprep.mubr.msk.bf16.mxu0 %vm5060_vm8, %v5059_v47 }
 0x2d8   :  { %4818 = vmatpush3.bf16.msra.mxu0 %v4960_v52 }
 0x2d9   :  { %4806 = vmatpush3.bf16.msra.mxu1 %v4959_v39  ;;  %4819 = vmatprep.subr.bf16.mxu0 %v5059_v47 }
 0x2da   :  { %4807 = vmatprep.subr.bf16.mxu1 %v5059_v47 }
 0x2dc   :  { %4820 = vmatpush3.bf16.msra.mxu0 %v4962_v9 }
 0x2dd   :  { %4808 = vmatpush3.bf16.msra.mxu1 %v4961_v38  ;;  %4821 = vmatprep.subr.bf16.mxu0 %v5059_v47 }
 0x2de   :  { %4809 = vmatprep.subr.bf16.mxu1 %v5059_v47 }
 0x2e0   :  { %4822 = vmatpush3.bf16.msra.mxu0 %v4964_v6 }
 0x2e1   :  { %4810 = vmatpush3.bf16.msra.mxu1 %v4963_v49  ;;  %4839 = vmatprep.subr.bf16.mxu0 %v5059_v47 }
 0x2e2   :  { %4827 = vmatprep.subr.bf16.mxu1 %v5059_v47 }
 0x2e3   :  { %4824 = vmatmul.mubr.msk.bf16.vlgmr.msra.gmra.mrb[52].mxu0 %vm2791_vm9, %v3184_v50 }
 0x2e4   :  { %4812 = vmatmul.mubr.msk.bf16.vlgmr.msra.gmra.mrb[60].mxu1 %vm2791_vm9, %v3098_v59  ;;  %4840 = vmatpush3.bf16.msra.mxu0 %v4966_v24 }
 0x2e5   :  { %4828 = vmatpush3.bf16.msra.mxu1 %v4965_v18  ;;  %4841 = vmatprep.subr.bf16.mxu0 %v5059_v47 }
 0x2e6   :  { %4829 = vmatprep.subr.bf16.mxu1 %v5059_v47  ;;  %4835 = vmatprep.mubr.msk.bf16.mxu1 %vm5060_vm8, %v5059_v47 }
 0x2e7   :  { %4847 = vmatprep.mubr.msk.bf16.mxu0 %vm5060_vm8, %v5059_v47 }
 0x2e8   :  { %4842 = vmatpush3.bf16.msra.mxu0 %v4968_v30 }
 0x2e9   :  { %4830 = vmatpush3.bf16.msra.mxu1 %v4967_v4  ;;  %4843 = vmatprep.subr.bf16.mxu0 %v5059_v47 }
 0x2ea   :  { %4831 = vmatprep.subr.bf16.mxu1 %v5059_v47 }
 0x2ec   :  { %4844 = vmatpush3.bf16.msra.mxu0 %v4970_v22 }
 0x2ed   :  { %4832 = vmatpush3.bf16.msra.mxu1 %v4969_v7  ;;  %4845 = vmatprep.subr.bf16.mxu0 %v5059_v47 }
 0x2ee   :  { %4833 = vmatprep.subr.bf16.mxu1 %v5059_v47 }
 0x2f0   :  { %4846 = vmatpush3.bf16.msra.mxu0 %v4972_v34 }
 0x2f1   :  { %4834 = vmatpush3.bf16.msra.mxu1 %v4971_v62  ;;  %3642 = vmatprep.subr.bf16.mxu0 %v4979_v32 }
 0x2f2   :  { %4851 = vmatprep.subr.bf16.mxu1 %v5059_v47 }
 0x2f3   :  { %4848 = vmatmul.mubr.msk.bf16.vlgmr.msra.gmra.mrb[56].mxu0 %vm2791_vm9, %v3356_v23 }
 0x2f4   :  { %4836 = vmatmul.mubr.msk.bf16.vlgmr.msra.gmra.mrb[64].mxu1 %vm2791_vm9, %v3270_v16  ;;  %3643 = vmatpush1.bf16.msra.mxu0 %v4977_v55 }
 0x2f5   :  { %4852 = vmatpush3.bf16.msra.mxu1 %v4973_v31  ;;  %4859 = vmatprep.mubr.msk.bf16.mxu1 %vm5060_vm8, %v5059_v47 }
 0x2f6   :  { %4853 = vmatprep.subr.bf16.mxu1 %v5059_v47  ;;  %3644 = vmatprep.subr.bf16.mxu0 %v4985_v56  ;;  %v5004_v56 = vld [vmem:[%s6692_s9 + $0x80] sm:$0xff]  }
 0x2f7   :  { %3674 = vmatprep.mubr.bf16.mxu0 %v5062_v36 }
 0x2f8   :  { %3645 = vmatpush1.bf16.msra.mxu0 %v4983_v33  ;;  %v5005_v33 = vld [vmem:[%s6692_s9 + $0x48] sm:$0xff]  }
 0x2f9   :  { %4854 = vmatpush3.bf16.msra.mxu1 %v4974_v1  ;;  %3646 = vmatprep.subr.bf16.mxu0 %v4991_v61  ;;  %v4358_v1 = vld [vmem:[%s6689_s6] ss:$0 sm:$0xff]  ;;  %v5008_v61 = vld [vmem:[%s6692_s9 + $0x88] sm:$0xff]  }
 0x2fa   :  { %4855 = vmatprep.subr.bf16.mxu1 %v5059_v47 }
 0x2fc   :  { %3647 = vmatpush1.bf16.msra.mxu0 %v4989_v44  ;;  %v5007_v44 = vld [vmem:[%s6692_s9 + $0x8] sm:$0xff]  }
 0x2fd   :  { %4856 = vmatpush3.bf16.msra.mxu1 %v4975_v0  ;;  %3648 = vmatprep.subr.bf16.mxu0 %v4997_v5  ;;  %v5011_v5 = vld [vmem:[%s6692_s9 + $0x10] sm:$0xff]  }
 0x2fe   :  { %4857 = vmatprep.subr.bf16.mxu1 %v5059_v47  ;;  %v4982_v47 = vld [vmem:[%s6690_s7 + $0xc] ss:$16 sps:$4 sm:$0xff]  }
 0x300   :  { %3649 = vmatpush1.bf16.msra.mxu0 %v4995_v2  ;;  %v5013_v2 = vld [vmem:[%s6692_s9 + $0x58] sm:$0xff]  }
 0x301   :  { %4858 = vmatpush3.bf16.msra.mxu1 %v4976_v27  ;;  %4583 = vmatprep.subr.bf16.mxu0 %v5001_v11  ;;  %v5015_v11 = vld [vmem:[%s6692_s9 + $0x18] sm:$0xff]  }
 0x302   :  { %3683 = vmatprep.subr.bf16.mxu1 %v4982_v47  ;;  %v5003_v47 = vld [vmem:[%s6692_s9] sm:$0xff]  }
 0x304   :  { %4860 = vmatmul.mubr.msk.bf16.vlgmr.msra.gmra.mrb[68].mxu1 %vm2791_vm9, %v3442_v14 }
 0x305   :  { %3684 = vmatpush1.bf16.msra.mxu1 %v4980_v20  ;;  %3715 = vmatprep.mubr.bf16.mxu1 %v5062_v36  ;;  %v5016_v36 = vld [vmem:[%s6692_s9 + $0x98] sm:$0xff]  }
 0x306   :  { %3685 = vmatprep.subr.bf16.mxu1 %v4988_v58 }
 0x309   :  { %3686 = vmatpush1.bf16.msra.mxu1 %v4986_v45  ;;  %v5006_v45 = vld [vmem:[%s6692_s9 + $0xc8] sm:$0xff]  }
 0x30a   :  { %3687 = vmatprep.subr.bf16.mxu1 %v4994_v35  ;;  %v5010_v35 = vld [vmem:[%s6692_s9 + $0xd0] sm:$0xff]  }
 0x30d   :  { %3688 = vmatpush1.bf16.msra.mxu1 %v4992_v28  ;;  %v5009_v28 = vld [vmem:[%s6692_s9 + $0x50] sm:$0xff]  }
 0x30e   :  { %3689 = vmatprep.subr.bf16.mxu1 %v5000_v3  ;;  %v5012_v3 = vld [vmem:[%s6692_s9 + $0x90] sm:$0xff]  }
 0x311   :  { %3690 = vmatpush1.bf16.msra.mxu1 %v4998_v60  ;;  %v5014_v60 = vld [vmem:[%s6692_s9 + $0xd8] sm:$0xff]  }
 0x312   :  { %4605 = vmatprep.subr.bf16.mxu1 %v5002_v13  ;;  %v5017_v13 = vld [vmem:[%s6692_s9 + $0x60] sm:$0xff]  }
 0x396   :  { %v2903_v43 = vpop.f32.mrb[44].mxu0 }
 0x397   :  { %v2829_v57 = vpop.f32.mrb[52].mxu1  ;;  %v4777_v51 = vpop.f32.mrb[45].mxu0 }
 0x398   :  { %v2904_v41 = vadd.f32 %v2903_v43, %v2829_v57  ;;  %v4765_v48 = vpop.f32.mrb[53].mxu1  ;;  %v2906_v40 = vpop.f32.mrb[46].mxu0  ;;  %v5018_v43 = vld [vmem:[%s6692_s9 + $0xe0] sm:$0xff]  }
 0x399   :  { %v2832_v8 = vpop.f32.mrb[54].mxu1  ;;  %v4778_v54 = vpop.f32.mrb[47].mxu0  ;;  %v5019_v57 = vld [vmem:[%s6692_s9 + $0x20] sm:$0xff]   ;;  %v5022_v48 = vld [vmem:[%s6692_s9 + $0xe8] sm:$0xff]  }
 0x39a   :  { %v4766_v46 = vpop.f32.mrb[55].mxu1  ;;  %v5020_v51 = vld [vmem:[%s6692_s9 + $0xa0] sm:$0xff]   ;;  %v5023_v40 = vld [vmem:[%s6692_s9 + $0x28] sm:$0xff]   ;;  %v5025_v54 = vld [vmem:[%s6692_s9 + $0x70] sm:$0xff]  }
 0x39b   :  { %v5024_v8 = vld [vmem:[%s6692_s9 + $0xa8] sm:$0xff]   ;;  %v5026_v46 = vld [vmem:[%s6692_s9 + $0xf0] sm:$0xff]  }
 0x3a6   :  { %v3074_v37 = vpop.f32.mrb[48].mxu0 }
 0x3a7   :  { %v2988_v21 = vpop.f32.mrb[56].mxu1  ;;  %v4801_v25 = vpop.f32.mrb[49].mxu0 }
 0x3a8   :  { %v2994_v10 = vadd.f32 %v2988_v21, %v2904_v41  ;;  %v4789_v19 = vpop.f32.mrb[57].mxu1  ;;  %v3077_v26 = vpop.f32.mrb[50].mxu0  ;;  %v5021_v41 = vld [vmem:[%s6692_s9 + $0x68] sm:$0xff]   ;;  %v5028_v21 = vld [vmem:[%s6692_s9 + $0xb0] sm:$0xff]   ;;  %v5029_v25 = vld [vmem:[%s6692_s9 + $0x78] sm:$0xff]  }
 0x3a9   :  { %v2991_v53 = vpop.f32.mrb[58].mxu1  ;;  %v4802_v29 = vpop.f32.mrb[51].mxu0  ;;  %v5031_v19 = vld [vmem:[%s6692_s9 + $0x38] sm:$0xff]  }
 0x3aa   :  { %v3080_v17 = vadd.f32 %v3074_v37, %v2994_v10  ;;  %v4790_v15 = vpop.f32.mrb[59].mxu1  ;;  %v5027_v37 = vld [vmem:[%s6692_s9 + $0x30] sm:$0xff]   ;;  %v5030_v10 = vld [vmem:[%s6692_s9 + $0xf8] sm:$0xff]   ;;  %v3541_v53 = vsub.s32 0, %v6866_v12  ;;  %v3549_v29 = vsub.s32 2, %v6866_v12 }
 0x3ab   :  { %v5032_v26 = vld [vmem:[%s6692_s9 + $0xb8] sm:$0xff]   ;;  %v3545_v15 = vsub.s32 1, %v6866_v12 }
 0x3b6   :  { %v3246_v42 = vpop.f32.mrb[52].mxu0 }
 0x3b7   :  { %v3160_v63 = vpop.f32.mrb[60].mxu1  ;;  %v4825_v52 = vpop.f32.mrb[53].mxu0 }
 0x3b8   :  { %v3166_v39 = vadd.f32 %v3160_v63, %v3080_v17  ;;  %v4813_v9 = vpop.f32.mrb[61].mxu1  ;;  %v3249_v38 = vpop.f32.mrb[54].mxu0  ;;  %v3537_v17 = vld [vmem:[%s6691_s8] sm:$0xf] }
 0x3b9   :  { %v3163_v6 = vpop.f32.mrb[62].mxu1  ;;  %v4826_v49 = vpop.f32.mrb[55].mxu0  ;;  %v3542_v63 = vrot.slane %v3537_v17, %v3541_v53  ;;  %v3550_v52 = vrot.slane %v3537_v17, %v3549_v29 }
 0x3ba   :  { %v3252_v24 = vadd.f32 %v3246_v42, %v3166_v39  ;;  %v4814_v50 = vpop.f32.mrb[63].mxu1  ;;  %v3553_v42 = vsub.s32 3, %v6866_v12  ;;  %v3546_v39 = vrot.slane %v3537_v17, %v3545_v15 }
 0x3bc   :  { %v3554_v9 = vrot.slane %v3537_v17, %v3553_v42 }
 0x3c6   :  { %v3418_v18 = vpop.f32.mrb[56].mxu0 }
 0x3c7   :  { %v3332_v59 = vpop.f32.mrb[64].mxu1  ;;  %v4849_v30 = vpop.f32.mrb[57].mxu0 }
 0x3c8   :  { %v3338_v4 = vadd.f32 %v3332_v59, %v3252_v24  ;;  %v4837_v22 = vpop.f32.mrb[65].mxu1  ;;  %v3421_v7 = vpop.f32.mrb[58].mxu0 }
 0x3c9   :  { %v3335_v34 = vpop.f32.mrb[66].mxu1  ;;  %v4850_v62 = vpop.f32.mrb[59].mxu0 }
 0x3ca   :  { %v3424_v23 = vadd.f32 %v3418_v18, %v3338_v4  ;;  %v4838_v31 = vpop.f32.mrb[67].mxu1 }
 0x3d7   :  { %v3504_v16 = vpop.f32.mrb[68].mxu1 }
 0x3d8   :  { %v3510_v0 = vadd.f32 %v3504_v16, %v3424_v23  ;;  %v4861_v27 = vpop.f32.mrb[69].mxu1 }
 0x3d9   :  { %v3507_v14 = vpop.f32.mrb[70].mxu1 }
 0x3da   :  { %v3518_v55 = vadd.f32 %v4358_v1, %v3510_v0  ;;  %v4862_v32 = vpop.f32.mrb[71].mxu1 }
 0x3db   :  { %v4377_v32 = vld [vmem:[%s6693_s10] ss:$0 sm:$0xff] }
 0x3dc   :  { %v3519_v20 = vmax.f32 %v3518_v55, 0.0 }
 0x3de   :  { %v3520_v58 = vpack.c.bf16 %v3519_v20, %v3519_v20 }
 0x3e0   :  { %4375 = vmatmul.mubr.msk.bf16.vlgmr.msra.gmra.mrb[60].mxu0 %vm2791_vm9, %v3520_v58  ;;  %4376 = vmatmul.mubr.msk.bf16.vlgmr.msra.gmra.mrb[72].mxu1 %vm2791_vm9, %v3520_v58 }
 0x3e1   :  { %4584 = vmatpush3.bf16.msra.mxu0 %v5003_v47  ;;  %4606 = vmatpush3.bf16.msra.mxu1 %v5004_v56 }
 0x3e2   :  { %4585 = vmatprep.subr.bf16.mxu0 %v5005_v33  ;;  %4607 = vmatprep.subr.bf16.mxu1 %v5006_v45 }
 0x3e5   :  { %4586 = vmatpush3.bf16.msra.mxu0 %v5007_v44  ;;  %4608 = vmatpush3.bf16.msra.mxu1 %v5008_v61 }
 0x3e6   :  { %4587 = vmatprep.subr.bf16.mxu0 %v5009_v28  ;;  %4609 = vmatprep.subr.bf16.mxu1 %v5010_v35 }
 0x3e9   :  { %4588 = vmatpush3.bf16.msra.mxu0 %v5011_v5  ;;  %4610 = vmatpush3.bf16.msra.mxu1 %v5012_v3 }
 0x3ea   :  { %4589 = vmatprep.subr.bf16.mxu0 %v5013_v2  ;;  %4611 = vmatprep.subr.bf16.mxu1 %v5014_v60 }
 0x3ed   :  { %4590 = vmatpush3.bf16.msra.mxu0 %v5015_v11  ;;  %4612 = vmatpush3.bf16.msra.mxu1 %v5016_v36 }
 0x3ee   :  { %4591 = vmatprep.subr.bf16.mxu0 %v5017_v13  ;;  %4613 = vmatprep.subr.bf16.mxu1 %v5018_v43 }
 0x3f1   :  { %4592 = vmatpush3.bf16.msra.mxu0 %v5019_v57  ;;  %4614 = vmatpush3.bf16.msra.mxu1 %v5020_v51 }
 0x3f2   :  { %4593 = vmatprep.subr.bf16.mxu0 %v5021_v41  ;;  %4615 = vmatprep.subr.bf16.mxu1 %v5022_v48 }
 0x3f5   :  { %4594 = vmatpush3.bf16.msra.mxu0 %v5023_v40  ;;  %4616 = vmatpush3.bf16.msra.mxu1 %v5024_v8 }
 0x3f6   :  { %4595 = vmatprep.subr.bf16.mxu0 %v5025_v54  ;;  %4617 = vmatprep.subr.bf16.mxu1 %v5026_v46 }
 0x3f9   :  { %4596 = vmatpush3.bf16.msra.mxu0 %v5027_v37  ;;  %4618 = vmatpush3.bf16.msra.mxu1 %v5028_v21 }
 0x3fa   :  { %4597 = vmatprep.subr.bf16.mxu0 %v5029_v25  ;;  %4619 = vmatprep.subr.bf16.mxu1 %v5030_v10 }
 0x3fd   :  { %4598 = vmatpush3.bf16.msra.mxu0 %v5031_v19  ;;  %4620 = vmatpush3.bf16.msra.mxu1 %v5032_v26 }
 0x4b3   :  { %v3676_v38 = vpop.f32.mrb[60].mxu0  ;;  %v3717_v6 = vpop.f32.mrb[72].mxu1 }
 0x4b4   :  { %v3677_v49 = vadd.f32 %v3676_v38, %v3542_v63  ;;  %v3718_v24 = vadd.f32 %v3717_v6, %v3550_v52  ;;  %v3678_v50 = vpop.f32.mrb[61].mxu0  ;;  %v3719_v18 = vpop.f32.mrb[73].mxu1 }
 0x4b5   :  { %v3679_v59 = vadd.f32 %v3678_v50, %v3546_v39  ;;  %v3720_v30 = vadd.f32 %v3719_v18, %v3554_v9  ;;  %v3680_v4 = vpop.f32.mrb[62].mxu0  ;;  %v3721_v22 = vpop.f32.mrb[74].mxu1 }
 0x4b6   :  { %v3724_v7 = vmax.f32 %v3677_v49, 0.0  ;;  %v3726_v34 = vmax.f32 %v3718_v24, 0.0  ;;  %v3681_v62 = vpop.f32.mrb[63].mxu0  ;;  %v3722_v23 = vpop.f32.mrb[75].mxu1 }
 0x4b7   :  { %v3725_v31 = vmax.f32 %v3679_v59, 0.0  ;;  %v3727_v12 = vmax.f32 %v3720_v30, 0.0 }
 0x4b8   :  { %v3728_v0 = vpack.c.bf16 %v3724_v7, %v3724_v7  ;;  %v3730_v27 = vpack.c.bf16 %v3726_v34, %v3726_v34 }
 0x4b9   :  { %v3729_v16 = vpack.c.bf16 %v3725_v31, %v3725_v31  ;;  %v3731_v1 = vpack.c.bf16 %v3727_v12, %v3727_v12 }
 0x4bb   :  { %4027 = vmatprep.mubr.bf16.mxu0 %v3729_v16  ;;  %4067 = vmatprep.mubr.bf16.mxu1 %v3731_v1 }
 0x4bc   :  { %4028 = vmatmul.mubr.bf16.vlgmr.msra.gmra.mrb[64].mxu0 %v3728_v0  ;;  %4068 = vmatmul.mubr.bf16.vlgmr.msra.gmra.mrb[76].mxu1 %v3730_v27 }
 0x58f   :  { %v4599_v14 = vpop.f32.mrb[64].mxu0  ;;  %v4621_v55 = vpop.f32.mrb[76].mxu1 }
 0x590   :  { %v4600_v20 = vpop.f32.mrb[65].mxu0  ;;  %v4622_v47 = vpop.f32.mrb[77].mxu1 }
 0x591   :  { %v4601_v56 = vadd.f32 %v4600_v20, %v4599_v14  ;;  %v4623_v58 = vadd.f32 %v4622_v47, %v4621_v55  ;;  %v4602_v33 = vpop.f32.mrb[66].mxu0  ;;  %v4624_v45 = vpop.f32.mrb[78].mxu1 }
 0x592   :  { %v4603_v44 = vpop.f32.mrb[67].mxu0  ;;  %v4625_v61 = vpop.f32.mrb[79].mxu1 }
 0x593   :  { %v4030_v28 = vadd.f32 %v4601_v56, %v4377_v32 }
 0x595   :  { %v4070_v35 = vadd.f32 %v4623_v58, %v4030_v28 }
 0x597   :  { %4076 = vst.msk [vmem:[#allocation2] sm:$0x3] %vm4075_vm10, %v4070_v35 }
 0x598   :  { %5045 = shalt.err (!%p5042_p4)
}
 0x599   :  { %s5046_s24 = scalar_lea.hbm %s6694_s11, 32 }
 0x59a   :  { %p5047_p5 = scmp.ne.s32.totalorder %s6694_s11, %s5046_s24  ;;  %p5050_p6 = scmp.lt.u32.totalorder %s5046_s24, %s6694_s11 }
 0x59c   :  { %p5052_p7 = pnand %p5050_p6, %p5047_p5 }
 0x59e   :  { %5055 = shalt.err (!%p5052_p7)
}
 0x59f   :  { %4086 = dma.vmem_to_hbm [thread:$0]  %s4084_s21, 32, %s6694_s11, [#allocation3]  }
 0x5a0   :  { %5056 = dma.done.wait [#allocation3], 32  }
 0x5a1   :  { %5057 = vsyncadd [#allocation3], 4294967264 }
 0x5a2   :  { %4090 = vsyncpa [#allocation3], 1 }

</bundles_post_ra>
